<compile_context>
chip_gen: v5e
topology: v5e:2x2
jax: 0.10.0
libtpu: 0.0.40
codegen_flags: <defaults>
</compile_context>

<pallas_src>
import functools

import jax
import jax.numpy as jnp
from jax.experimental import pallas as pl
from jax.experimental.pallas import tpu as pltpu


def _ru(x, m):
    return ((x + m - 1) // m) * m


def gru_recurrence_kernel(x_ref, h0_ref, wxf_ref, bxf_ref, whzr_ref, bhzr_ref,
                          whn_ref, bhn_ref, wm_ref, bm_ref,
                          out_ref, psum_ref, psq_ref,
                          xp_ref, hp_ref,
                          *, steps, K, L, BB, off):
    """One batch block (BB batch elements flattened to R = BB*L rows) per grid step.

    x_ref   : (R, Cp)      f32   input rows (channels last, batch-major, lane-padded)
    h0_ref  : (1, Cp)      f32   TrainableHState parameter (broadcast over B and L)
    wxf_ref : (Cp, 3Cp)    bf16  fused x-side 1x1-conv weights for gates [z|r|n]
    bxf_ref : (1, 3Cp)     f32
    whzr_ref: (Cp, 2Cp)    bf16  fused h-side weights for gates [z|r]
    bhzr_ref: (1, 2Cp)     f32
    whn_ref : (Cp, Cp)     bf16  h-side n-gate weight (input is hmix*rt)
    bhn_ref : (1, Cp)      f32
    wm_ref  : (K, Cp, Cp)  bf16  mixer Conv1d taps
    bm_ref  : (1, Cp)      f32
    out_ref : (R, Cp)      f32   final hidden state (rows t >= L-steps zeroed)
    psum_ref: (1, 1, Cp)   f32   per-block sum of valid output rows (for BatchNorm)
    psq_ref : (1, 1, Cp)   f32   per-block sum of squares of valid output rows
    xp_ref  : (R+XT, 3Cp)  f32   VMEM scratch: hoisted fused x-side projections
    hp_ref  : (off+R+HT, Cp) f32 VMEM scratch: zero-padded mixer halo buffer
    """
    f32, bf16 = jnp.float32, jnp.bfloat16
    R, Cp = out_ref.shape
    P = K // 2
    OFF = off
    HTAIL = hp_ref.shape[0] - OFF - R
    XTAIL = xp_ref.shape[0] - R

    # ---- hoisted, fused x-side gate projections, kept in a VMEM ref -------------
    xp_ref[0:R, :] = jnp.dot(x_ref[...].astype(bf16), wxf_ref[...],
                             preferred_element_type=f32) + bxf_ref[...]
    if XTAIL:  # zero tail rows so shifted per-step reads stay finite & in-bounds
        xp_ref[R:, :] = jnp.zeros((XTAIL, 3 * Cp), f32)

    # ---- zero only the pad rows of the mixer halo buffer ------------------------
    # (interior rows [OFF, OFF+R) are fully rewritten every step)
    if OFF:
        hp_ref[0:OFF, :] = jnp.zeros((OFF, Cp), f32)
    if HTAIL:
        hp_ref[OFF + R:, :] = jnp.zeros((HTAIL, Cp), f32)

    # ---- masks hoisted out of the recurrence -------------------------------------
    t_idx = jax.lax.broadcasted_iota(jnp.int32, (R, 1), 0)
    if BB > 1:
        t_idx = t_idx % L                       # per-row time index within its batch element
    # torch's shrinking valid length: rows t >= L-s are stale at the start of step s
    step_mask = [None] + [(t_idx < (L - s)).astype(f32) for s in range(1, steps)]
    final_mask = (t_idx < (L - steps)).astype(f32)
    # per-tap masks: kill mixer leakage across batch boundaries inside the flat block
    tap_mask = {}
    if BB > 1:
        for k in range(K):
            d = k - P
            if d != 0:
                tap_mask[k] = jnp.logical_and(t_idx + d >= 0,
                                              t_idx + d < L).astype(f32)

    bhzr = bhzr_ref[...]
    bhn = bhn_ref[...]
    bm = bm_ref[...]

    h = jnp.broadcast_to(h0_ref[...], (R, Cp))  # hinit expand over batch and time

    # TODO(synk): switch to lax.fori_loop if recurrent_steps grows beyond a handful
    # (shapes are already fixed per step), to bound live ranges / code size.
    for s in range(steps):
        # mask stale tail rows so the mixer sees correct zero padding
        hm = h if s == 0 else h * step_mask[s]
        hp_ref[OFF:OFF + R, :] = hm             # halo-buffer interior store

        # ---- mixer Conv1d(C, C, K, padding=K//2) + ReLU as K accumulating
        #      bf16 matmuls (no (R, K*C) operand materialized) ----
        acc = None
        for k in range(K):
            d = k - P
            v = hp_ref[OFF + d:OFF + d + R, :]  # output row r reads h[r + d]
            if k in tap_mask:
                v = v * tap_mask[k]
            pk = jnp.dot(v.astype(bf16), wm_ref[k], preferred_element_type=f32)
            acc = pk if acc is None else acc + pk
        hmix = jnp.maximum(acc + bm, 0.0)       # ReLU

        # ---- GRU gates (x projections reused via a shifted static slice) ----
        xzr = xp_ref[s:s + R, 0:2 * Cp]         # row t pairs with x[t + s]
        xn = xp_ref[s:s + R, 2 * Cp:3 * Cp]
        hzr = jnp.dot(hmix.astype(bf16), whzr_ref[...],
                      preferred_element_type=f32) + bhzr
        g = jax.nn.sigmoid(xzr + hzr)           # [zt | rt] in one EUP stream
        zt = g[:, :Cp]
        rt = g[:, Cp:]
        hn = jnp.dot((hmix * rt).astype(bf16), whn_ref[...],
                     preferred_element_type=f32) + bhn
        nt = jnp.tanh(xn + hn)
        h = (1.0 - zt) * hmix + zt * nt
        # torch's x = x[:,:,1:] / h = h[:,:,:-1] is realized by the shifted xzr/xn
        # reads plus the shrinking validity masks (fixed shapes every step).

    hf = h * final_mask                          # zero the dropped tail rows
    out_ref[...] = hf.astype(out_ref.dtype)
    # partial BatchNorm statistics over this block's valid rows
    psum_ref[0, :, :] = jnp.sum(hf, axis=0, keepdims=True)
    psq_ref[0, :, :] = jnp.sum(hf * hf, axis=0, keepdims=True)


def bn_apply_kernel(h_ref, scale_ref, shift_ref, out_ref):
    """Training-mode BatchNorm1d applied as one lane-dense FMA (stats precomputed)."""
    out_ref[...] = (h_ref[...] * scale_ref[...] + shift_ref[...]).astype(out_ref.dtype)


def init_params(key, C, K):
    """Deterministic synthetic parameters (shapes mirror the torch module)."""
    ks = jax.random.split(key, 7)
    s = 1.0 / float(C) ** 0.5
    h0 = jax.random.normal(ks[0], (1, C), jnp.float32)          # TrainableHState (randn(1, C, 1))
    wx = jax.random.normal(ks[1], (3, C, C), jnp.float32) * s   # s2szx, s2srx, s2snx (in, out)
    bx = jax.random.normal(ks[2], (3, 1, C), jnp.float32) * s
    wh = jax.random.normal(ks[3], (3, C, C), jnp.float32) * s   # s2szh, s2srh, s2snh
    bh = jax.random.normal(ks[4], (3, 1, C), jnp.float32) * s
    wm = jax.random.normal(ks[5], (K, C, C), jnp.float32) * (1.0 / float(C * K) ** 0.5)
    bm = jax.random.normal(ks[6], (1, C), jnp.float32) * s      # mixer (tap, in, out)
    gamma = jnp.ones((1, C), jnp.float32)                       # BatchNorm1d affine defaults
    beta = jnp.zeros((1, C), jnp.float32)
    return h0, wx, bx, wh, bh, wm, bm, gamma, beta


def _batch_blocking(B, L, Cp, budget_bytes=16 * 1024 * 1024, batch_block=None):
    """Batch elements per grid block: biggest block under a VMEM budget, while
    keeping >=2 grid blocks (maps onto v7x's two TensorCores) whenever possible."""
    if batch_block is not None:
        assert B % batch_block == 0
        return B // batch_block, batch_block
    per_elem = 96 * L * Cp                    # rough resident f32 bytes per batch element
    cands = [bb for bb in range(1, B + 1)
             if B % bb == 0 and (bb == B or (bb * L) % 8 == 0)]   # (8,128) sublane rule
    multi = [bb for bb in cands if B // bb >= 2]
    fitting = [bb for bb in multi if bb * per_elem <= budget_bytes]
    if fitting:
        bb = max(fitting)
    elif multi:
        # TODO(synk): intra-sequence row tiling with an S*P-row halo for very long L
        # (mandatory to stay under v7x's 64 MiB VMEM at production sequence lengths).
        bb = min(multi)
    else:
        bb = B
    return B // bb, bb


def _pad2(a, rows, cols):
    return jnp.pad(a, ((0, rows - a.shape[0]), (0, cols - a.shape[1])))


def parallel_gru_layer_v4(x_ncl, params, *, recurrent_steps=3, mixer_amount=25,
                          eps=1e-5, batch_block=None):
    assert mixer_amount % 2 == 1, "mixer kernel must be odd for same-length conv"
    B, C, L = x_ncl.shape
    K = mixer_amount
    S = recurrent_steps
    Lf = L - S
    assert Lf > 0

    h0, wx, bx, wh, bh, wm, bm, gamma, beta = params
    f32, bf16 = jnp.float32, jnp.bfloat16

    # ---- lane-dense channel padding + weight fusion (done once, outside the kernel) ----
    Cp = max(128, _ru(C, 128))
    wxf = jnp.concatenate([_pad2(wx[i], Cp, Cp) for i in range(3)], axis=1).astype(bf16)
    bxf = jnp.concatenate([_pad2(bx[i], 1, Cp) for i in range(3)], axis=1)
    whzr = jnp.concatenate([_pad2(wh[i], Cp, Cp) for i in range(2)], axis=1).astype(bf16)
    bhzr = jnp.concatenate([_pad2(bh[i], 1, Cp) for i in range(2)], axis=1)
    whn = _pad2(wh[2], Cp, Cp).astype(bf16)
    bhn = _pad2(bh[2], 1, Cp)
    wmp = jnp.stack([_pad2(wm[k], Cp, Cp) for k in range(K)], axis=0).astype(bf16)
    bmp = _pad2(bm, 1, Cp)
    h0p = _pad2(h0, 1, Cp)
    gammap = _pad2(gamma, 1, Cp)
    betap = _pad2(beta, 1, Cp)

    # PyTorch NCL (B, C, L) -> channels-last, lane-padded, batch-flattened (B*L, Cp).
    # TODO(synk): for stacked layers keep activations channels-last (padded) between
    # layers so these boundary transposes leave the hot path entirely.
    x = jnp.transpose(x_ncl, (0, 2, 1)).astype(f32)
    x = jnp.pad(x, ((0, 0), (0, 0), (0, Cp - C)))
    x_flat = x.reshape(B * L, Cp)

    nb, BB = _batch_blocking(B, L, Cp, batch_block=batch_block)
    R = BB * L
    P = K // 2
    OFF = _ru(P, 8) if P else 0          # 8-sublane-aligned halo offset
    HTAIL = OFF
    XTAIL = _ru(S, 8)

    gru = pl.pallas_call(
        functools.partial(gru_recurrence_kernel, steps=S, K=K, L=L, BB=BB, off=OFF),
        out_shape=[
            jax.ShapeDtypeStruct((B * L, Cp), f32),    # hidden state (tails zeroed)
            jax.ShapeDtypeStruct((nb, 1, Cp), f32),    # partial sums
            jax.ShapeDtypeStruct((nb, 1, Cp), f32),    # partial sums of squares
        ],
        grid=(nb,),
        in_specs=[
            pl.BlockSpec((R, Cp), lambda i: (i, 0)),            # x (batch block)
            pl.BlockSpec((1, Cp), lambda i: (0, 0)),            # h0
            pl.BlockSpec((Cp, 3 * Cp), lambda i: (0, 0)),       # wxf
            pl.BlockSpec((1, 3 * Cp), lambda i: (0, 0)),        # bxf
            pl.BlockSpec((Cp, 2 * Cp), lambda i: (0, 0)),       # whzr
            pl.BlockSpec((1, 2 * Cp), lambda i: (0, 0)),        # bhzr
            pl.BlockSpec((Cp, Cp), lambda i: (0, 0)),           # whn
            pl.BlockSpec((1, Cp), lambda i: (0, 0)),            # bhn
            pl.BlockSpec((K, Cp, Cp), lambda i: (0, 0, 0)),     # mixer taps
            pl.BlockSpec((1, Cp), lambda i: (0, 0)),            # bm
        ],
        out_specs=[
            pl.BlockSpec((R, Cp), lambda i: (i, 0)),
            pl.BlockSpec((1, 1, Cp), lambda i: (i, 0, 0)),
            pl.BlockSpec((1, 1, Cp), lambda i: (i, 0, 0)),
        ],
        scratch_shapes=[
            pltpu.VMEM((R + XTAIL, 3 * Cp), f32),         # hoisted x projections
            pltpu.VMEM((OFF + R + HTAIL, Cp), f32),       # zero-padded mixer halo buffer
        ],
        compiler_params=pltpu.CompilerParams(
            dimension_semantics=("parallel",),
            vmem_limit_bytes=32 * 1024 * 1024),
    )
    h_flat, psum, psq = gru(x_flat, h0p, wxf, bxf, whzr, bhzr, whn, bhn, wmp, bmp)

    # ---- BatchNorm1d (training mode, batch statistics, biased variance) ----
    # Tiny reduction over (nb, 1, Cp) partials done in plain JAX; kernel only does
    # the lane-dense per-row FMA and aliases its input buffer.
    count = float(B * Lf)
    s1 = jnp.sum(psum, axis=0)                       # (1, Cp)
    s2 = jnp.sum(psq, axis=0)
    mean = s1 / count
    var = jnp.maximum(s2 / count - mean * mean, 0.0)
    scale = gammap * jax.lax.rsqrt(var + eps)        # (1, Cp)
    shift = betap - mean * scale                     # (1, Cp)

    bn = pl.pallas_call(
        bn_apply_kernel,
        out_shape=jax.ShapeDtypeStruct((B * L, Cp), f32),
        grid=(nb,),
        in_specs=[
            pl.BlockSpec((R, Cp), lambda i: (i, 0)),
            pl.BlockSpec((1, Cp), lambda i: (0, 0)),
            pl.BlockSpec((1, Cp), lambda i: (0, 0)),
        ],
        out_specs=pl.BlockSpec((R, Cp), lambda i: (i, 0)),
        input_output_aliases={0: 0},                 # reuse the h buffer, no 2nd HBM alloc
        compiler_params=pltpu.CompilerParams(
            dimension_semantics=("parallel",)),
    )
    y_flat = bn(h_flat, scale, shift)

    # drop padded channels / truncated tail rows, back to PyTorch NCL (B, C, L - S)
    y = y_flat.reshape(B, L, Cp)[:, :Lf, :C]
    return jnp.transpose(y, (0, 2, 1))
    # TODO(synk): BatchNorm running_mean/running_var buffer updates (training side
    # effect) are not produced; only the normalized forward output is returned.


def reference_forward(x_ncl, params, *, recurrent_steps, mixer_amount, eps=1e-5,
                      matmul_dtype=jnp.bfloat16):
    """Pure-JAX mirror of the PyTorch forward (training-mode BN). Matmul operands
    are rounded to `matmul_dtype` to match the kernel's MXU inputs."""
    h0, wx, bx, wh, bh, wm, bm, gamma, beta = params
    B, C, L = x_ncl.shape
    K, P, S = mixer_amount, mixer_amount // 2, recurrent_steps
    md, f32 = matmul_dtype, jnp.float32

    def proj(a, w, b):   # 1x1 conv, channels-last
        return jnp.einsum("blc,cd->bld", a.astype(md), w.astype(md),
                          preferred_element_type=f32) + b

    x = jnp.transpose(x_ncl, (0, 2, 1)).astype(f32)             # (B, L, C)
    h = jnp.broadcast_to(h0[None, :, :], (B, L, C))
    for _ in range(S):
        l = h.shape[1]
        hpad = jnp.pad(h, ((0, 0), (P, P), (0, 0)))
        hm = bm
        for k in range(K):
            hm = hm + jnp.einsum("blc,cd->bld", hpad[:, k:k + l, :].astype(md),
                                 wm[k].astype(md), preferred_element_type=f32)
        hm = jnp.maximum(hm, 0.0)
        zt = jax.nn.sigmoid(proj(x, wx[0], bx[0]) + proj(hm, wh[0], bh[0]))
        rt = jax.nn.sigmoid(proj(x, wx[1], bx[1]) + proj(hm, wh[1], bh[1]))
        nt = jnp.tanh(proj(x, wx[2], bx[2]) + proj(hm * rt, wh[2], bh[2]))
        h = (1.0 - zt) * hm + zt * nt
        x = x[:, 1:, :]
        h = h[:, :-1, :]
    mean = jnp.mean(h, axis=(0, 1), keepdims=True)
    var = jnp.mean((h - mean) ** 2, axis=(0, 1), keepdims=True)
    y = gamma[None] * (h - mean) * jax.lax.rsqrt(var + eps) + beta[None]
    return jnp.transpose(y, (0, 2, 1))


if __name__ == "__main__":
    steps, K = 3, 7              # recurrent_steps, mixer_amount (odd)
    eps = 1e-5
    key = jax.random.PRNGKey(0)
    k1, k2, k3, k4 = jax.random.split(key, 4)

    # Config A: B=2 -> default blocking (2 grid blocks x 1 batch element each)
    B, C, L = 2, 32, 24
    params = init_params(k1, C, K)
    x = jax.random.normal(k2, (B, C, L), jnp.float32)
    fwd = jax.jit(functools.partial(parallel_gru_layer_v4,
                                    recurrent_steps=steps, mixer_amount=K, eps=eps))
    y = jax.block_until_ready(fwd(x, params))
    assert y.shape == (B, C, L - steps), y.shape
    assert bool(jnp.all(jnp.isfinite(y)))
    y_ref = reference_forward(x, params, recurrent_steps=steps, mixer_amount=K, eps=eps)
    err = float(jnp.max(jnp.abs(y - y_ref)))
    assert err < 2e-2, f"config A mismatch vs reference: max|diff|={err}"

    # Config B: 2 batch elements per block (exercises cross-batch-boundary masking)
    B2 = 4
    params2 = init_params(k3, C, K)
    x2 = jax.random.normal(k4, (B2, C, L), jnp.float32)
    fwd2 = jax.jit(functools.partial(parallel_gru_layer_v4, recurrent_steps=steps,
                                     mixer_amount=K, eps=eps, batch_block=2))
    y2 = jax.block_until_ready(fwd2(x2, params2))
    assert y2.shape == (B2, C, L - steps), y2.shape
    y2_ref = reference_forward(x2, params2, recurrent_steps=steps, mixer_amount=K, eps=eps)
    err2 = float(jnp.max(jnp.abs(y2 - y2_ref)))
    assert err2 < 2e-2, f"config B mismatch vs reference: max|diff|={err2}"

    print("KERNEL_OK")
</pallas_src>

<mosaic_0001>
module attributes {stable_mosaic.version = 11 : i64} {
  func.func @bn_apply_kernel(%arg0: i32, %arg1: memref<24x128xf32, #tpu.memory_space<vmem>>, %arg2: memref<1x128xf32, #tpu.memory_space<vmem>>, %arg3: memref<1x128xf32, #tpu.memory_space<vmem>>, %arg4: memref<24x128xf32, #tpu.memory_space<vmem>>) attributes {dimension_semantics = [#tpu.dimension_semantics<parallel>], iteration_bounds = array<i64: 2>, scalar_prefetch = 0 : i64, scratch_operands = 0 : i64, tpu.core_type = #tpu.core_type<tc>, window_params = [{transform_indices = @transform_0, window_bounds = array<i64: 24, 128>}, {pipeline_mode = #tpu.pipeline_mode<synchronous>, transform_indices = @transform_1, window_bounds = array<i64: 1, 128>}, {pipeline_mode = #tpu.pipeline_mode<synchronous>, transform_indices = @transform_2, window_bounds = array<i64: 1, 128>}, {transform_indices = @transform_3, window_bounds = array<i64: 24, 128>}]} {
    %c0 = arith.constant 0 : index
    %c0_0 = arith.constant 0 : index
    %0 = vector.load %arg1[%c0, %c0_0] : memref<24x128xf32, #tpu.memory_space<vmem>>, vector<24x128xf32>
    %c0_1 = arith.constant 0 : index
    %c0_2 = arith.constant 0 : index
    %1 = vector.load %arg2[%c0_1, %c0_2] : memref<1x128xf32, #tpu.memory_space<vmem>>, vector<1x128xf32>
    %2 = vector.broadcast %1 : vector<1x128xf32> to vector<24x128xf32>
    %3 = arith.mulf %0, %2 : vector<24x128xf32>
    %c0_3 = arith.constant 0 : index
    %c0_4 = arith.constant 0 : index
    %4 = vector.load %arg3[%c0_3, %c0_4] : memref<1x128xf32, #tpu.memory_space<vmem>>, vector<1x128xf32>
    %5 = vector.broadcast %4 : vector<1x128xf32> to vector<24x128xf32>
    %6 = arith.addf %3, %5 : vector<24x128xf32>
    %c0_5 = arith.constant 0 : index
    %c0_6 = arith.constant 0 : index
    %7 = vector.load %arg4[%c0_5, %c0_6] : memref<24x128xf32, #tpu.memory_space<vmem>>, vector<24x128xf32>
    tpu.vector_store %arg4[%c0_5, %c0_6], %6 {strides = array<i32>} : memref<24x128xf32, #tpu.memory_space<vmem>>, vector<24x128xf32>,
    return
  }
  func.func @transform_0(%arg0: i32) -> (i32, i32) {
    %c0_i32 = arith.constant 0 : i32
    %c0_i32_0 = arith.constant 0 : i32
    return %arg0, %c0_i32 : i32, i32
  }
  func.func @transform_1(%arg0: i32) -> (i32, i32) {
    %c0_i32 = arith.constant 0 : i32
    %c0_i32_0 = arith.constant 0 : i32
    %c0_i32_1 = arith.constant 0 : i32
    return %c0_i32, %c0_i32_0 : i32, i32
  }
  func.func @transform_2(%arg0: i32) -> (i32, i32) {
    %c0_i32 = arith.constant 0 : i32
    %c0_i32_0 = arith.constant 0 : i32
    %c0_i32_1 = arith.constant 0 : i32
    return %c0_i32, %c0_i32_0 : i32, i32
  }
  func.func @transform_3(%arg0: i32) -> (i32, i32) {
    %c0_i32 = arith.constant 0 : i32
    %c0_i32_0 = arith.constant 0 : i32
    return %arg0, %c0_i32 : i32, i32
  }
}

module attributes {stable_mosaic.version = 11 : i64} {
  func.func @gru_recurrence_kernel(%arg0: i32, %arg1: memref<24x128xf32, #tpu.memory_space<vmem>>, %arg2: memref<1x128xf32, #tpu.memory_space<vmem>>, %arg3: memref<128x384xbf16, #tpu.memory_space<vmem>>, %arg4: memref<1x384xf32, #tpu.memory_space<vmem>>, %arg5: memref<128x256xbf16, #tpu.memory_space<vmem>>, %arg6: memref<1x256xf32, #tpu.memory_space<vmem>>, %arg7: memref<128x128xbf16, #tpu.memory_space<vmem>>, %arg8: memref<1x128xf32, #tpu.memory_space<vmem>>, %arg9: memref<7x128x128xbf16, #tpu.memory_space<vmem>>, %arg10: memref<1x128xf32, #tpu.memory_space<vmem>>, %arg11: memref<24x128xf32, #tpu.memory_space<vmem>>, %arg12: memref<1x1x128xf32, #tpu.memory_space<vmem>>, %arg13: memref<1x1x128xf32, #tpu.memory_space<vmem>>, %arg14: memref<32x384xf32, #tpu.memory_space<vmem>>, %arg15: memref<40x128xf32, #tpu.memory_space<vmem>>) attributes {dimension_semantics = [#tpu.dimension_semantics<parallel>], iteration_bounds = array<i64: 2>, scalar_prefetch = 0 : i64, scratch_operands = 2 : i64, tpu.core_type = #tpu.core_type<tc>, window_params = [{transform_indices = @transform_0, window_bounds = array<i64: 24, 128>}, {pipeline_mode = #tpu.pipeline_mode<synchronous>, transform_indices = @transform_1, window_bounds = array<i64: 1, 128>}, {pipeline_mode = #tpu.pipeline_mode<synchronous>, transform_indices = @transform_2, window_bounds = array<i64: 128, 384>}, {pipeline_mode = #tpu.pipeline_mode<synchronous>, transform_indices = @transform_3, window_bounds = array<i64: 1, 384>}, {pipeline_mode = #tpu.pipeline_mode<synchronous>, transform_indices = @transform_4, window_bounds = array<i64: 128, 256>}, {pipeline_mode = #tpu.pipeline_mode<synchronous>, transform_indices = @transform_5, window_bounds = array<i64: 1, 256>}, {pipeline_mode = #tpu.pipeline_mode<synchronous>, transform_indices = @transform_6, window_bounds = array<i64: 128, 128>}, {pipeline_mode = #tpu.pipeline_mode<synchronous>, transform_indices = @transform_7, window_bounds = array<i64: 1, 128>}, {pipeline_mode = #tpu.pipeline_mode<synchronous>, transform_indices = @transform_8, window_bounds = array<i64: 7, 128, 128>}, {pipeline_mode = #tpu.pipeline_mode<synchronous>, transform_indices = @transform_9, window_bounds = array<i64: 1, 128>}, {transform_indices = @transform_10, window_bounds = array<i64: 24, 128>}, {transform_indices = @transform_11, window_bounds = array<i64: 1, 1, 128>}, {transform_indices = @transform_12, window_bounds = array<i64: 1, 1, 128>}]} {
    %c0 = arith.constant 0 : index
    %c0_0 = arith.constant 0 : index
    %0 = vector.load %arg1[%c0, %c0_0] : memref<24x128xf32, #tpu.memory_space<vmem>>, vector<24x128xf32>
    %1 = arith.truncf %0 : vector<24x128xf32> to vector<24x128xbf16>
    %c0_1 = arith.constant 0 : index
    %c0_2 = arith.constant 0 : index
    %2 = vector.load %arg3[%c0_1, %c0_2] : memref<128x384xbf16, #tpu.memory_space<vmem>>, vector<128x384xbf16>
    %cst = arith.constant dense<0.000000e+00> : vector<24x384xf32>
    %3 = tpu.matmul %1, %2, %cst {dimension_numbers = #tpu.dot_dimension_numbers<[1], [0], [0], [1], [0, 0, 1, 1], [], []>} : vector<24x128xbf16>, vector<128x384xbf16>, vector<24x384xf32> -> vector<24x384xf32>
    %c0_3 = arith.constant 0 : index
    %c0_4 = arith.constant 0 : index
    %4 = vector.load %arg4[%c0_3, %c0_4] : memref<1x384xf32, #tpu.memory_space<vmem>>, vector<1x384xf32>
    %5 = vector.broadcast %4 : vector<1x384xf32> to vector<24x384xf32>
    %6 = arith.addf %3, %5 : vector<24x384xf32>
    %c0_5 = arith.constant 0 : index
    %c0_6 = arith.constant 0 : index
    %7 = vector.load %arg14[%c0_5, %c0_6] : memref<32x384xf32, #tpu.memory_space<vmem>>, vector<24x384xf32>
    tpu.vector_store %arg14[%c0_5, %c0_6], %6 {strides = array<i32>} : memref<32x384xf32, #tpu.memory_space<vmem>>, vector<24x384xf32>,
    %cst_7 = arith.constant 0.000000e+00 : f32
    %8 = vector.broadcast %cst_7 : f32 to vector<8x384xf32>
    %c24 = arith.constant 24 : index
    %c0_8 = arith.constant 0 : index
    %9 = vector.load %arg14[%c24, %c0_8] : memref<32x384xf32, #tpu.memory_space<vmem>>, vector<8x384xf32>
    tpu.vector_store %arg14[%c24, %c0_8], %8 {strides = array<i32>} : memref<32x384xf32, #tpu.memory_space<vmem>>, vector<8x384xf32>,
    %cst_9 = arith.constant 0.000000e+00 : f32
    %10 = vector.broadcast %cst_9 : f32 to vector<8x128xf32>
    %c0_10 = arith.constant 0 : index
    %c0_11 = arith.constant 0 : index
    %11 = vector.load %arg15[%c0_10, %c0_11] : memref<40x128xf32, #tpu.memory_space<vmem>>, vector<8x128xf32>
    tpu.vector_store %arg15[%c0_10, %c0_11], %10 {strides = array<i32>} : memref<40x128xf32, #tpu.memory_space<vmem>>, vector<8x128xf32>,
    %cst_12 = arith.constant 0.000000e+00 : f32
    %12 = vector.broadcast %cst_12 : f32 to vector<8x128xf32>
    %c32 = arith.constant 32 : index
    %c0_13 = arith.constant 0 : index
    %13 = vector.load %arg15[%c32, %c0_13] : memref<40x128xf32, #tpu.memory_space<vmem>>, vector<8x128xf32>
    tpu.vector_store %arg15[%c32, %c0_13], %12 {strides = array<i32>} : memref<40x128xf32, #tpu.memory_space<vmem>>, vector<8x128xf32>,
    %14 = tpu.iota {dimensions = array<i32: 0>} : vector<24x1xi32>
    %c23_i32 = arith.constant 23 : i32
    %15 = vector.broadcast %c23_i32 : i32 to vector<24x1xi32>
    %16 = arith.cmpi slt, %14, %15 : vector<24x1xi32>
    %17 = arith.extui %16 : vector<24x1xi1> to vector<24x1xi32>
    %18 = arith.sitofp %17 : vector<24x1xi32> to vector<24x1xf32>
    %c22_i32 = arith.constant 22 : i32
    %19 = vector.broadcast %c22_i32 : i32 to vector<24x1xi32>
    %20 = arith.cmpi slt, %14, %19 : vector<24x1xi32>
    %21 = arith.extui %20 : vector<24x1xi1> to vector<24x1xi32>
    %22 = arith.sitofp %21 : vector<24x1xi32> to vector<24x1xf32>
    %c21_i32 = arith.constant 21 : i32
    %23 = vector.broadcast %c21_i32 : i32 to vector<24x1xi32>
    %24 = arith.cmpi slt, %14, %23 : vector<24x1xi32>
    %25 = arith.extui %24 : vector<24x1xi1> to vector<24x1xi32>
    %26 = arith.sitofp %25 : vector<24x1xi32> to vector<24x1xf32>
    %c0_14 = arith.constant 0 : index
    %c0_15 = arith.constant 0 : index
    %27 = vector.load %arg6[%c0_14, %c0_15] : memref<1x256xf32, #tpu.memory_space<vmem>>, vector<1x256xf32>
    %c0_16 = arith.constant 0 : index
    %c0_17 = arith.constant 0 : index
    %28 = vector.load %arg8[%c0_16, %c0_17] : memref<1x128xf32, #tpu.memory_space<vmem>>, vector<1x128xf32>
    %c0_18 = arith.constant 0 : index
    %c0_19 = arith.constant 0 : index
    %29 = vector.load %arg10[%c0_18, %c0_19] : memref<1x128xf32, #tpu.memory_space<vmem>>, vector<1x128xf32>
    %c0_20 = arith.constant 0 : index
    %c0_21 = arith.constant 0 : index
    %30 = vector.load %arg2[%c0_20, %c0_21] : memref<1x128xf32, #tpu.memory_space<vmem>>, vector<1x128xf32>
    %31 = vector.shape_cast %30 : vector<1x128xf32> to vector<1x128xf32>
    %32 = vector.broadcast %31 : vector<1x128xf32> to vector<24x128xf32>
    %c8 = arith.constant 8 : index
    %c0_22 = arith.constant 0 : index
    %33 = vector.load %arg15[%c8, %c0_22] : memref<40x128xf32, #tpu.memory_space<vmem>>, vector<24x128xf32>
    tpu.vector_store %arg15[%c8, %c0_22], %32 {strides = array<i32>} : memref<40x128xf32, #tpu.memory_space<vmem>>, vector<24x128xf32>,
    %c5 = arith.constant 5 : index
    %c0_23 = arith.constant 0 : index
    %34 = vector.load %arg15[%c5, %c0_23] : memref<40x128xf32, #tpu.memory_space<vmem>>, vector<24x128xf32>
    %35 = arith.truncf %34 : vector<24x128xf32> to vector<24x128xbf16>
    %c0_24 = arith.constant 0 : index
    %c0_25 = arith.constant 0 : index
    %c0_26 = arith.constant 0 : index
    %36 = vector.load %arg9[%c0_24, %c0_25, %c0_26] : memref<7x128x128xbf16, #tpu.memory_space<vmem>>, vector<1x128x128xbf16>
    %37 = vector.shape_cast %36 : vector<1x128x128xbf16> to vector<128x128xbf16>
    %cst_27 = arith.constant dense<0.000000e+00> : vector<24x128xf32>
    %38 = tpu.matmul %35, %37, %cst_27 {dimension_numbers = #tpu.dot_dimension_numbers<[1], [0], [0], [1], [0, 0, 1, 1], [], []>} : vector<24x128xbf16>, vector<128x128xbf16>, vector<24x128xf32> -> vector<24x128xf32>
    %c6 = arith.constant 6 : index
    %c0_28 = arith.constant 0 : index
    %39 = vector.load %arg15[%c6, %c0_28] : memref<40x128xf32, #tpu.memory_space<vmem>>, vector<24x128xf32>
    %40 = arith.truncf %39 : vector<24x128xf32> to vector<24x128xbf16>
    %c1 = arith.constant 1 : index
    %c0_29 = arith.constant 0 : index
    %c0_30 = arith.constant 0 : index
    %41 = vector.load %arg9[%c1, %c0_29, %c0_30] : memref<7x128x128xbf16, #tpu.memory_space<vmem>>, vector<1x128x128xbf16>
    %42 = vector.shape_cast %41 : vector<1x128x128xbf16> to vector<128x128xbf16>
    %cst_31 = arith.constant dense<0.000000e+00> : vector<24x128xf32>
    %43 = tpu.matmul %40, %42, %cst_31 {dimension_numbers = #tpu.dot_dimension_numbers<[1], [0], [0], [1], [0, 0, 1, 1], [], []>} : vector<24x128xbf16>, vector<128x128xbf16>, vector<24x128xf32> -> vector<24x128xf32>
    %44 = arith.addf %38, %43 : vector<24x128xf32>
    %c7 = arith.constant 7 : index
    %c0_32 = arith.constant 0 : index
    %45 = vector.load %arg15[%c7, %c0_32] : memref<40x128xf32, #tpu.memory_space<vmem>>, vector<24x128xf32>
    %46 = arith.truncf %45 : vector<24x128xf32> to vector<24x128xbf16>
    %c2 = arith.constant 2 : index
    %c0_33 = arith.constant 0 : index
    %c0_34 = arith.constant 0 : index
    %47 = vector.load %arg9[%c2, %c0_33, %c0_34] : memref<7x128x128xbf16, #tpu.memory_space<vmem>>, vector<1x128x128xbf16>
    %48 = vector.shape_cast %47 : vector<1x128x128xbf16> to vector<128x128xbf16>
    %cst_35 = arith.constant dense<0.000000e+00> : vector<24x128xf32>
    %49 = tpu.matmul %46, %48, %cst_35 {dimension_numbers = #tpu.dot_dimension_numbers<[1], [0], [0], [1], [0, 0, 1, 1], [], []>} : vector<24x128xbf16>, vector<128x128xbf16>, vector<24x128xf32> -> vector<24x128xf32>
    %50 = arith.addf %44, %49 : vector<24x128xf32>
    %c8_36 = arith.constant 8 : index
    %c0_37 = arith.constant 0 : index
    %51 = vector.load %arg15[%c8_36, %c0_37] : memref<40x128xf32, #tpu.memory_space<vmem>>, vector<24x128xf32>
    %52 = arith.truncf %51 : vector<24x128xf32> to vector<24x128xbf16>
    %c3 = arith.constant 3 : index
    %c0_38 = arith.constant 0 : index
    %c0_39 = arith.constant 0 : index
    %53 = vector.load %arg9[%c3, %c0_38, %c0_39] : memref<7x128x128xbf16, #tpu.memory_space<vmem>>, vector<1x128x128xbf16>
    %54 = vector.shape_cast %53 : vector<1x128x128xbf16> to vector<128x128xbf16>
    %cst_40 = arith.constant dense<0.000000e+00> : vector<24x128xf32>
    %55 = tpu.matmul %52, %54, %cst_40 {dimension_numbers = #tpu.dot_dimension_numbers<[1], [0], [0], [1], [0, 0, 1, 1], [], []>} : vector<24x128xbf16>, vector<128x128xbf16>, vector<24x128xf32> -> vector<24x128xf32>
    %56 = arith.addf %50, %55 : vector<24x128xf32>
    %c9 = arith.constant 9 : index
    %c0_41 = arith.constant 0 : index
    %57 = vector.load %arg15[%c9, %c0_41] : memref<40x128xf32, #tpu.memory_space<vmem>>, vector<24x128xf32>
    %58 = arith.truncf %57 : vector<24x128xf32> to vector<24x128xbf16>
    %c4 = arith.constant 4 : index
    %c0_42 = arith.constant 0 : index
    %c0_43 = arith.constant 0 : index
    %59 = vector.load %arg9[%c4, %c0_42, %c0_43] : memref<7x128x128xbf16, #tpu.memory_space<vmem>>, vector<1x128x128xbf16>
    %60 = vector.shape_cast %59 : vector<1x128x128xbf16> to vector<128x128xbf16>
    %cst_44 = arith.constant dense<0.000000e+00> : vector<24x128xf32>
    %61 = tpu.matmul %58, %60, %cst_44 {dimension_numbers = #tpu.dot_dimension_numbers<[1], [0], [0], [1], [0, 0, 1, 1], [], []>} : vector<24x128xbf16>, vector<128x128xbf16>, vector<24x128xf32> -> vector<24x128xf32>
    %62 = arith.addf %56, %61 : vector<24x128xf32>
    %c10 = arith.constant 10 : index
    %c0_45 = arith.constant 0 : index
    %63 = vector.load %arg15[%c10, %c0_45] : memref<40x128xf32, #tpu.memory_space<vmem>>, vector<24x128xf32>
    %64 = arith.truncf %63 : vector<24x128xf32> to vector<24x128xbf16>
    %c5_46 = arith.constant 5 : index
    %c0_47 = arith.constant 0 : index
    %c0_48 = arith.constant 0 : index
    %65 = vector.load %arg9[%c5_46, %c0_47, %c0_48] : memref<7x128x128xbf16, #tpu.memory_space<vmem>>, vector<1x128x128xbf16>
    %66 = vector.shape_cast %65 : vector<1x128x128xbf16> to vector<128x128xbf16>
    %cst_49 = arith.constant dense<0.000000e+00> : vector<24x128xf32>
    %67 = tpu.matmul %64, %66, %cst_49 {dimension_numbers = #tpu.dot_dimension_numbers<[1], [0], [0], [1], [0, 0, 1, 1], [], []>} : vector<24x128xbf16>, vector<128x128xbf16>, vector<24x128xf32> -> vector<24x128xf32>
    %68 = arith.addf %62, %67 : vector<24x128xf32>
    %c11 = arith.constant 11 : index
    %c0_50 = arith.constant 0 : index
    %69 = vector.load %arg15[%c11, %c0_50] : memref<40x128xf32, #tpu.memory_space<vmem>>, vector<24x128xf32>
    %70 = arith.truncf %69 : vector<24x128xf32> to vector<24x128xbf16>
    %c6_51 = arith.constant 6 : index
    %c0_52 = arith.constant 0 : index
    %c0_53 = arith.constant 0 : index
    %71 = vector.load %arg9[%c6_51, %c0_52, %c0_53] : memref<7x128x128xbf16, #tpu.memory_space<vmem>>, vector<1x128x128xbf16>
    %72 = vector.shape_cast %71 : vector<1x128x128xbf16> to vector<128x128xbf16>
    %cst_54 = arith.constant dense<0.000000e+00> : vector<24x128xf32>
    %73 = tpu.matmul %70, %72, %cst_54 {dimension_numbers = #tpu.dot_dimension_numbers<[1], [0], [0], [1], [0, 0, 1, 1], [], []>} : vector<24x128xbf16>, vector<128x128xbf16>, vector<24x128xf32> -> vector<24x128xf32>
    %74 = arith.addf %68, %73 : vector<24x128xf32>
    %75 = vector.broadcast %29 : vector<1x128xf32> to vector<24x128xf32>
    %76 = arith.addf %74, %75 : vector<24x128xf32>
    %cst_55 = arith.constant 0.000000e+00 : f32
    %77 = vector.broadcast %cst_55 : f32 to vector<24x128xf32>
    %78 = arith.maximumf %76, %77 : vector<24x128xf32>
    %c0_56 = arith.constant 0 : index
    %c0_57 = arith.constant 0 : index
    %79 = vector.load %arg14[%c0_56, %c0_57] : memref<32x384xf32, #tpu.memory_space<vmem>>, vector<24x256xf32>
    %c0_58 = arith.constant 0 : index
    %c256 = arith.constant 256 : index
    %80 = vector.load %arg14[%c0_58, %c256] : memref<32x384xf32, #tpu.memory_space<vmem>>, vector<24x128xf32>
    %81 = arith.truncf %78 : vector<24x128xf32> to vector<24x128xbf16>
    %c0_59 = arith.constant 0 : index
    %c0_60 = arith.constant 0 : index
    %82 = vector.load %arg5[%c0_59, %c0_60] : memref<128x256xbf16, #tpu.memory_space<vmem>>, vector<128x256xbf16>
    %cst_61 = arith.constant dense<0.000000e+00> : vector<24x256xf32>
    %83 = tpu.matmul %81, %82, %cst_61 {dimension_numbers = #tpu.dot_dimension_numbers<[1], [0], [0], [1], [0, 0, 1, 1], [], []>} : vector<24x128xbf16>, vector<128x256xbf16>, vector<24x256xf32> -> vector<24x256xf32>
    %84 = vector.broadcast %27 : vector<1x256xf32> to vector<24x256xf32>
    %85 = arith.addf %83, %84 : vector<24x256xf32>
    %86 = arith.addf %79, %85 : vector<24x256xf32>
    %87 = arith.negf %86 : vector<24x256xf32>
    %88 = math.exp %87 : vector<24x256xf32>
    %cst_62 = arith.constant 1.000000e+00 : f32
    %89 = vector.broadcast %cst_62 : f32 to vector<24x256xf32>
    %90 = arith.addf %89, %88 : vector<24x256xf32>
    %91 = arith.divf %89, %90 : vector<24x256xf32>
    %92 = vector.extract_strided_slice %91 {offsets = [0, 0], sizes = [24, 128], strides = [1, 1]} : vector<24x256xf32> to vector<24x128xf32>
    %93 = vector.extract_strided_slice %91 {offsets = [0, 128], sizes = [24, 128], strides = [1, 1]} : vector<24x256xf32> to vector<24x128xf32>
    %94 = arith.mulf %78, %93 : vector<24x128xf32>
    %95 = arith.truncf %94 : vector<24x128xf32> to vector<24x128xbf16>
    %c0_63 = arith.constant 0 : index
    %c0_64 = arith.constant 0 : index
    %96 = vector.load %arg7[%c0_63, %c0_64] : memref<128x128xbf16, #tpu.memory_space<vmem>>, vector<128x128xbf16>
    %cst_65 = arith.constant dense<0.000000e+00> : vector<24x128xf32>
    %97 = tpu.matmul %95, %96, %cst_65 {dimension_numbers = #tpu.dot_dimension_numbers<[1], [0], [0], [1], [0, 0, 1, 1], [], []>} : vector<24x128xbf16>, vector<128x128xbf16>, vector<24x128xf32> -> vector<24x128xf32>
    %98 = vector.broadcast %28 : vector<1x128xf32> to vector<24x128xf32>
    %99 = arith.addf %97, %98 : vector<24x128xf32>
    %100 = arith.addf %80, %99 : vector<24x128xf32>
    %101 = math.tanh %100 : vector<24x128xf32>
    %cst_66 = arith.constant 1.000000e+00 : f32
    %102 = vector.broadcast %cst_66 : f32 to vector<24x128xf32>
    %103 = arith.subf %102, %92 : vector<24x128xf32>
    %104 = arith.mulf %103, %78 : vector<24x128xf32>
    %105 = arith.mulf %92, %101 : vector<24x128xf32>
    %106 = arith.addf %104, %105 : vector<24x128xf32>
    %107 = vector.broadcast %18 : vector<24x1xf32> to vector<24x128xf32>
    %108 = arith.mulf %106, %107 : vector<24x128xf32>
    %c8_67 = arith.constant 8 : index
    %c0_68 = arith.constant 0 : index
    %109 = vector.load %arg15[%c8_67, %c0_68] : memref<40x128xf32, #tpu.memory_space<vmem>>, vector<24x128xf32>
    tpu.vector_store %arg15[%c8_67, %c0_68], %108 {strides = array<i32>} : memref<40x128xf32, #tpu.memory_space<vmem>>, vector<24x128xf32>,
    %c5_69 = arith.constant 5 : index
    %c0_70 = arith.constant 0 : index
    %110 = vector.load %arg15[%c5_69, %c0_70] : memref<40x128xf32, #tpu.memory_space<vmem>>, vector<24x128xf32>
    %111 = arith.truncf %110 : vector<24x128xf32> to vector<24x128xbf16>
    %c0_71 = arith.constant 0 : index
    %c0_72 = arith.constant 0 : index
    %c0_73 = arith.constant 0 : index
    %112 = vector.load %arg9[%c0_71, %c0_72, %c0_73] : memref<7x128x128xbf16, #tpu.memory_space<vmem>>, vector<1x128x128xbf16>
    %113 = vector.shape_cast %112 : vector<1x128x128xbf16> to vector<128x128xbf16>
    %cst_74 = arith.constant dense<0.000000e+00> : vector<24x128xf32>
    %114 = tpu.matmul %111, %113, %cst_74 {dimension_numbers = #tpu.dot_dimension_numbers<[1], [0], [0], [1], [0, 0, 1, 1], [], []>} : vector<24x128xbf16>, vector<128x128xbf16>, vector<24x128xf32> -> vector<24x128xf32>
    %c6_75 = arith.constant 6 : index
    %c0_76 = arith.constant 0 : index
    %115 = vector.load %arg15[%c6_75, %c0_76] : memref<40x128xf32, #tpu.memory_space<vmem>>, vector<24x128xf32>
    %116 = arith.truncf %115 : vector<24x128xf32> to vector<24x128xbf16>
    %c1_77 = arith.constant 1 : index
    %c0_78 = arith.constant 0 : index
    %c0_79 = arith.constant 0 : index
    %117 = vector.load %arg9[%c1_77, %c0_78, %c0_79] : memref<7x128x128xbf16, #tpu.memory_space<vmem>>, vector<1x128x128xbf16>
    %118 = vector.shape_cast %117 : vector<1x128x128xbf16> to vector<128x128xbf16>
    %cst_80 = arith.constant dense<0.000000e+00> : vector<24x128xf32>
    %119 = tpu.matmul %116, %118, %cst_80 {dimension_numbers = #tpu.dot_dimension_numbers<[1], [0], [0], [1], [0, 0, 1, 1], [], []>} : vector<24x128xbf16>, vector<128x128xbf16>, vector<24x128xf32> -> vector<24x128xf32>
    %120 = arith.addf %114, %119 : vector<24x128xf32>
    %c7_81 = arith.constant 7 : index
    %c0_82 = arith.constant 0 : index
    %121 = vector.load %arg15[%c7_81, %c0_82] : memref<40x128xf32, #tpu.memory_space<vmem>>, vector<24x128xf32>
    %122 = arith.truncf %121 : vector<24x128xf32> to vector<24x128xbf16>
    %c2_83 = arith.constant 2 : index
    %c0_84 = arith.constant 0 : index
    %c0_85 = arith.constant 0 : index
    %123 = vector.load %arg9[%c2_83, %c0_84, %c0_85] : memref<7x128x128xbf16, #tpu.memory_space<vmem>>, vector<1x128x128xbf16>
    %124 = vector.shape_cast %123 : vector<1x128x128xbf16> to vector<128x128xbf16>
    %cst_86 = arith.constant dense<0.000000e+00> : vector<24x128xf32>
    %125 = tpu.matmul %122, %124, %cst_86 {dimension_numbers = #tpu.dot_dimension_numbers<[1], [0], [0], [1], [0, 0, 1, 1], [], []>} : vector<24x128xbf16>, vector<128x128xbf16>, vector<24x128xf32> -> vector<24x128xf32>
    %126 = arith.addf %120, %125 : vector<24x128xf32>
    %c8_87 = arith.constant 8 : index
    %c0_88 = arith.constant 0 : index
    %127 = vector.load %arg15[%c8_87, %c0_88] : memref<40x128xf32, #tpu.memory_space<vmem>>, vector<24x128xf32>
    %128 = arith.truncf %127 : vector<24x128xf32> to vector<24x128xbf16>
    %c3_89 = arith.constant 3 : index
    %c0_90 = arith.constant 0 : index
    %c0_91 = arith.constant 0 : index
    %129 = vector.load %arg9[%c3_89, %c0_90, %c0_91] : memref<7x128x128xbf16, #tpu.memory_space<vmem>>, vector<1x128x128xbf16>
    %130 = vector.shape_cast %129 : vector<1x128x128xbf16> to vector<128x128xbf16>
    %cst_92 = arith.constant dense<0.000000e+00> : vector<24x128xf32>
    %131 = tpu.matmul %128, %130, %cst_92 {dimension_numbers = #tpu.dot_dimension_numbers<[1], [0], [0], [1], [0, 0, 1, 1], [], []>} : vector<24x128xbf16>, vector<128x128xbf16>, vector<24x128xf32> -> vector<24x128xf32>
    %132 = arith.addf %126, %131 : vector<24x128xf32>
    %c9_93 = arith.constant 9 : index
    %c0_94 = arith.constant 0 : index
    %133 = vector.load %arg15[%c9_93, %c0_94] : memref<40x128xf32, #tpu.memory_space<vmem>>, vector<24x128xf32>
    %134 = arith.truncf %133 : vector<24x128xf32> to vector<24x128xbf16>
    %c4_95 = arith.constant 4 : index
    %c0_96 = arith.constant 0 : index
    %c0_97 = arith.constant 0 : index
    %135 = vector.load %arg9[%c4_95, %c0_96, %c0_97] : memref<7x128x128xbf16, #tpu.memory_space<vmem>>, vector<1x128x128xbf16>
    %136 = vector.shape_cast %135 : vector<1x128x128xbf16> to vector<128x128xbf16>
    %cst_98 = arith.constant dense<0.000000e+00> : vector<24x128xf32>
    %137 = tpu.matmul %134, %136, %cst_98 {dimension_numbers = #tpu.dot_dimension_numbers<[1], [0], [0], [1], [0, 0, 1, 1], [], []>} : vector<24x128xbf16>, vector<128x128xbf16>, vector<24x128xf32> -> vector<24x128xf32>
    %138 = arith.addf %132, %137 : vector<24x128xf32>
    %c10_99 = arith.constant 10 : index
    %c0_100 = arith.constant 0 : index
    %139 = vector.load %arg15[%c10_99, %c0_100] : memref<40x128xf32, #tpu.memory_space<vmem>>, vector<24x128xf32>
    %140 = arith.truncf %139 : vector<24x128xf32> to vector<24x128xbf16>
    %c5_101 = arith.constant 5 : index
    %c0_102 = arith.constant 0 : index
    %c0_103 = arith.constant 0 : index
    %141 = vector.load %arg9[%c5_101, %c0_102, %c0_103] : memref<7x128x128xbf16, #tpu.memory_space<vmem>>, vector<1x128x128xbf16>
    %142 = vector.shape_cast %141 : vector<1x128x128xbf16> to vector<128x128xbf16>
    %cst_104 = arith.constant dense<0.000000e+00> : vector<24x128xf32>
    %143 = tpu.matmul %140, %142, %cst_104 {dimension_numbers = #tpu.dot_dimension_numbers<[1], [0], [0], [1], [0, 0, 1, 1], [], []>} : vector<24x128xbf16>, vector<128x128xbf16>, vector<24x128xf32> -> vector<24x128xf32>
    %144 = arith.addf %138, %143 : vector<24x128xf32>
    %c11_105 = arith.constant 11 : index
    %c0_106 = arith.constant 0 : index
    %145 = vector.load %arg15[%c11_105, %c0_106] : memref<40x128xf32, #tpu.memory_space<vmem>>, vector<24x128xf32>
    %146 = arith.truncf %145 : vector<24x128xf32> to vector<24x128xbf16>
    %c6_107 = arith.constant 6 : index
    %c0_108 = arith.constant 0 : index
    %c0_109 = arith.constant 0 : index
    %147 = vector.load %arg9[%c6_107, %c0_108, %c0_109] : memref<7x128x128xbf16, #tpu.memory_space<vmem>>, vector<1x128x128xbf16>
    %148 = vector.shape_cast %147 : vector<1x128x128xbf16> to vector<128x128xbf16>
    %cst_110 = arith.constant dense<0.000000e+00> : vector<24x128xf32>
    %149 = tpu.matmul %146, %148, %cst_110 {dimension_numbers = #tpu.dot_dimension_numbers<[1], [0], [0], [1], [0, 0, 1, 1], [], []>} : vector<24x128xbf16>, vector<128x128xbf16>, vector<24x128xf32> -> vector<24x128xf32>
    %150 = arith.addf %144, %149 : vector<24x128xf32>
    %151 = vector.broadcast %29 : vector<1x128xf32> to vector<24x128xf32>
    %152 = arith.addf %150, %151 : vector<24x128xf32>
    %cst_111 = arith.constant 0.000000e+00 : f32
    %153 = vector.broadcast %cst_111 : f32 to vector<24x128xf32>
    %154 = arith.maximumf %152, %153 : vector<24x128xf32>
    %c1_112 = arith.constant 1 : index
    %c0_113 = arith.constant 0 : index
    %155 = vector.load %arg14[%c1_112, %c0_113] : memref<32x384xf32, #tpu.memory_space<vmem>>, vector<24x256xf32>
    %c1_114 = arith.constant 1 : index
    %c256_115 = arith.constant 256 : index
    %156 = vector.load %arg14[%c1_114, %c256_115] : memref<32x384xf32, #tpu.memory_space<vmem>>, vector<24x128xf32>
    %157 = arith.truncf %154 : vector<24x128xf32> to vector<24x128xbf16>
    %c0_116 = arith.constant 0 : index
    %c0_117 = arith.constant 0 : index
    %158 = vector.load %arg5[%c0_116, %c0_117] : memref<128x256xbf16, #tpu.memory_space<vmem>>, vector<128x256xbf16>
    %cst_118 = arith.constant dense<0.000000e+00> : vector<24x256xf32>
    %159 = tpu.matmul %157, %158, %cst_118 {dimension_numbers = #tpu.dot_dimension_numbers<[1], [0], [0], [1], [0, 0, 1, 1], [], []>} : vector<24x128xbf16>, vector<128x256xbf16>, vector<24x256xf32> -> vector<24x256xf32>
    %160 = vector.broadcast %27 : vector<1x256xf32> to vector<24x256xf32>
    %161 = arith.addf %159, %160 : vector<24x256xf32>
    %162 = arith.addf %155, %161 : vector<24x256xf32>
    %163 = arith.negf %162 : vector<24x256xf32>
    %164 = math.exp %163 : vector<24x256xf32>
    %cst_119 = arith.constant 1.000000e+00 : f32
    %165 = vector.broadcast %cst_119 : f32 to vector<24x256xf32>
    %166 = arith.addf %165, %164 : vector<24x256xf32>
    %167 = arith.divf %165, %166 : vector<24x256xf32>
    %168 = vector.extract_strided_slice %167 {offsets = [0, 0], sizes = [24, 128], strides = [1, 1]} : vector<24x256xf32> to vector<24x128xf32>
    %169 = vector.extract_strided_slice %167 {offsets = [0, 128], sizes = [24, 128], strides = [1, 1]} : vector<24x256xf32> to vector<24x128xf32>
    %170 = arith.mulf %154, %169 : vector<24x128xf32>
    %171 = arith.truncf %170 : vector<24x128xf32> to vector<24x128xbf16>
    %c0_120 = arith.constant 0 : index
    %c0_121 = arith.constant 0 : index
    %172 = vector.load %arg7[%c0_120, %c0_121] : memref<128x128xbf16, #tpu.memory_space<vmem>>, vector<128x128xbf16>
    %cst_122 = arith.constant dense<0.000000e+00> : vector<24x128xf32>
    %173 = tpu.matmul %171, %172, %cst_122 {dimension_numbers = #tpu.dot_dimension_numbers<[1], [0], [0], [1], [0, 0, 1, 1], [], []>} : vector<24x128xbf16>, vector<128x128xbf16>, vector<24x128xf32> -> vector<24x128xf32>
    %174 = vector.broadcast %28 : vector<1x128xf32> to vector<24x128xf32>
    %175 = arith.addf %173, %174 : vector<24x128xf32>
    %176 = arith.addf %156, %175 : vector<24x128xf32>
    %177 = math.tanh %176 : vector<24x128xf32>
    %cst_123 = arith.constant 1.000000e+00 : f32
    %178 = vector.broadcast %cst_123 : f32 to vector<24x128xf32>
    %179 = arith.subf %178, %168 : vector<24x128xf32>
    %180 = arith.mulf %179, %154 : vector<24x128xf32>
    %181 = arith.mulf %168, %177 : vector<24x128xf32>
    %182 = arith.addf %180, %181 : vector<24x128xf32>
    %183 = vector.broadcast %22 : vector<24x1xf32> to vector<24x128xf32>
    %184 = arith.mulf %182, %183 : vector<24x128xf32>
    %c8_124 = arith.constant 8 : index
    %c0_125 = arith.constant 0 : index
    %185 = vector.load %arg15[%c8_124, %c0_125] : memref<40x128xf32, #tpu.memory_space<vmem>>, vector<24x128xf32>
    tpu.vector_store %arg15[%c8_124, %c0_125], %184 {strides = array<i32>} : memref<40x128xf32, #tpu.memory_space<vmem>>, vector<24x128xf32>,
    %c5_126 = arith.constant 5 : index
    %c0_127 = arith.constant 0 : index
    %186 = vector.load %arg15[%c5_126, %c0_127] : memref<40x128xf32, #tpu.memory_space<vmem>>, vector<24x128xf32>
    %187 = arith.truncf %186 : vector<24x128xf32> to vector<24x128xbf16>
    %c0_128 = arith.constant 0 : index
    %c0_129 = arith.constant 0 : index
    %c0_130 = arith.constant 0 : index
    %188 = vector.load %arg9[%c0_128, %c0_129, %c0_130] : memref<7x128x128xbf16, #tpu.memory_space<vmem>>, vector<1x128x128xbf16>
    %189 = vector.shape_cast %188 : vector<1x128x128xbf16> to vector<128x128xbf16>
    %cst_131 = arith.constant dense<0.000000e+00> : vector<24x128xf32>
    %190 = tpu.matmul %187, %189, %cst_131 {dimension_numbers = #tpu.dot_dimension_numbers<[1], [0], [0], [1], [0, 0, 1, 1], [], []>} : vector<24x128xbf16>, vector<128x128xbf16>, vector<24x128xf32> -> vector<24x128xf32>
    %c6_132 = arith.constant 6 : index
    %c0_133 = arith.constant 0 : index
    %191 = vector.load %arg15[%c6_132, %c0_133] : memref<40x128xf32, #tpu.memory_space<vmem>>, vector<24x128xf32>
    %192 = arith.truncf %191 : vector<24x128xf32> to vector<24x128xbf16>
    %c1_134 = arith.constant 1 : index
    %c0_135 = arith.constant 0 : index
    %c0_136 = arith.constant 0 : index
    %193 = vector.load %arg9[%c1_134, %c0_135, %c0_136] : memref<7x128x128xbf16, #tpu.memory_space<vmem>>, vector<1x128x128xbf16>
    %194 = vector.shape_cast %193 : vector<1x128x128xbf16> to vector<128x128xbf16>
    %cst_137 = arith.constant dense<0.000000e+00> : vector<24x128xf32>
    %195 = tpu.matmul %192, %194, %cst_137 {dimension_numbers = #tpu.dot_dimension_numbers<[1], [0], [0], [1], [0, 0, 1, 1], [], []>} : vector<24x128xbf16>, vector<128x128xbf16>, vector<24x128xf32> -> vector<24x128xf32>
    %196 = arith.addf %190, %195 : vector<24x128xf32>
    %c7_138 = arith.constant 7 : index
    %c0_139 = arith.constant 0 : index
    %197 = vector.load %arg15[%c7_138, %c0_139] : memref<40x128xf32, #tpu.memory_space<vmem>>, vector<24x128xf32>
    %198 = arith.truncf %197 : vector<24x128xf32> to vector<24x128xbf16>
    %c2_140 = arith.constant 2 : index
    %c0_141 = arith.constant 0 : index
    %c0_142 = arith.constant 0 : index
    %199 = vector.load %arg9[%c2_140, %c0_141, %c0_142] : memref<7x128x128xbf16, #tpu.memory_space<vmem>>, vector<1x128x128xbf16>
    %200 = vector.shape_cast %199 : vector<1x128x128xbf16> to vector<128x128xbf16>
    %cst_143 = arith.constant dense<0.000000e+00> : vector<24x128xf32>
    %201 = tpu.matmul %198, %200, %cst_143 {dimension_numbers = #tpu.dot_dimension_numbers<[1], [0], [0], [1], [0, 0, 1, 1], [], []>} : vector<24x128xbf16>, vector<128x128xbf16>, vector<24x128xf32> -> vector<24x128xf32>
    %202 = arith.addf %196, %201 : vector<24x128xf32>
    %c8_144 = arith.constant 8 : index
    %c0_145 = arith.constant 0 : index
    %203 = vector.load %arg15[%c8_144, %c0_145] : memref<40x128xf32, #tpu.memory_space<vmem>>, vector<24x128xf32>
    %204 = arith.truncf %203 : vector<24x128xf32> to vector<24x128xbf16>
    %c3_146 = arith.constant 3 : index
    %c0_147 = arith.constant 0 : index
    %c0_148 = arith.constant 0 : index
    %205 = vector.load %arg9[%c3_146, %c0_147, %c0_148] : memref<7x128x128xbf16, #tpu.memory_space<vmem>>, vector<1x128x128xbf16>
    %206 = vector.shape_cast %205 : vector<1x128x128xbf16> to vector<128x128xbf16>
    %cst_149 = arith.constant dense<0.000000e+00> : vector<24x128xf32>
    %207 = tpu.matmul %204, %206, %cst_149 {dimension_numbers = #tpu.dot_dimension_numbers<[1], [0], [0], [1], [0, 0, 1, 1], [], []>} : vector<24x128xbf16>, vector<128x128xbf16>, vector<24x128xf32> -> vector<24x128xf32>
    %208 = arith.addf %202, %207 : vector<24x128xf32>
    %c9_150 = arith.constant 9 : index
    %c0_151 = arith.constant 0 : index
    %209 = vector.load %arg15[%c9_150, %c0_151] : memref<40x128xf32, #tpu.memory_space<vmem>>, vector<24x128xf32>
    %210 = arith.truncf %209 : vector<24x128xf32> to vector<24x128xbf16>
    %c4_152 = arith.constant 4 : index
    %c0_153 = arith.constant 0 : index
    %c0_154 = arith.constant 0 : index
    %211 = vector.load %arg9[%c4_152, %c0_153, %c0_154] : memref<7x128x128xbf16, #tpu.memory_space<vmem>>, vector<1x128x128xbf16>
    %212 = vector.shape_cast %211 : vector<1x128x128xbf16> to vector<128x128xbf16>
    %cst_155 = arith.constant dense<0.000000e+00> : vector<24x128xf32>
    %213 = tpu.matmul %210, %212, %cst_155 {dimension_numbers = #tpu.dot_dimension_numbers<[1], [0], [0], [1], [0, 0, 1, 1], [], []>} : vector<24x128xbf16>, vector<128x128xbf16>, vector<24x128xf32> -> vector<24x128xf32>
    %214 = arith.addf %208, %213 : vector<24x128xf32>
    %c10_156 = arith.constant 10 : index
    %c0_157 = arith.constant 0 : index
    %215 = vector.load %arg15[%c10_156, %c0_157] : memref<40x128xf32, #tpu.memory_space<vmem>>, vector<24x128xf32>
    %216 = arith.truncf %215 : vector<24x128xf32> to vector<24x128xbf16>
    %c5_158 = arith.constant 5 : index
    %c0_159 = arith.constant 0 : index
    %c0_160 = arith.constant 0 : index
    %217 = vector.load %arg9[%c5_158, %c0_159, %c0_160] : memref<7x128x128xbf16, #tpu.memory_space<vmem>>, vector<1x128x128xbf16>
    %218 = vector.shape_cast %217 : vector<1x128x128xbf16> to vector<128x128xbf16>
    %cst_161 = arith.constant dense<0.000000e+00> : vector<24x128xf32>
    %219 = tpu.matmul %216, %218, %cst_161 {dimension_numbers = #tpu.dot_dimension_numbers<[1], [0], [0], [1], [0, 0, 1, 1], [], []>} : vector<24x128xbf16>, vector<128x128xbf16>, vector<24x128xf32> -> vector<24x128xf32>
    %220 = arith.addf %214, %219 : vector<24x128xf32>
    %c11_162 = arith.constant 11 : index
    %c0_163 = arith.constant 0 : index
    %221 = vector.load %arg15[%c11_162, %c0_163] : memref<40x128xf32, #tpu.memory_space<vmem>>, vector<24x128xf32>
    %222 = arith.truncf %221 : vector<24x128xf32> to vector<24x128xbf16>
    %c6_164 = arith.constant 6 : index
    %c0_165 = arith.constant 0 : index
    %c0_166 = arith.constant 0 : index
    %223 = vector.load %arg9[%c6_164, %c0_165, %c0_166] : memref<7x128x128xbf16, #tpu.memory_space<vmem>>, vector<1x128x128xbf16>
    %224 = vector.shape_cast %223 : vector<1x128x128xbf16> to vector<128x128xbf16>
    %cst_167 = arith.constant dense<0.000000e+00> : vector<24x128xf32>
    %225 = tpu.matmul %222, %224, %cst_167 {dimension_numbers = #tpu.dot_dimension_numbers<[1], [0], [0], [1], [0, 0, 1, 1], [], []>} : vector<24x128xbf16>, vector<128x128xbf16>, vector<24x128xf32> -> vector<24x128xf32>
    %226 = arith.addf %220, %225 : vector<24x128xf32>
    %227 = vector.broadcast %29 : vector<1x128xf32> to vector<24x128xf32>
    %228 = arith.addf %226, %227 : vector<24x128xf32>
    %cst_168 = arith.constant 0.000000e+00 : f32
    %229 = vector.broadcast %cst_168 : f32 to vector<24x128xf32>
    %230 = arith.maximumf %228, %229 : vector<24x128xf32>
    %c2_169 = arith.constant 2 : index
    %c0_170 = arith.constant 0 : index
    %231 = vector.load %arg14[%c2_169, %c0_170] : memref<32x384xf32, #tpu.memory_space<vmem>>, vector<24x256xf32>
    %c2_171 = arith.constant 2 : index
    %c256_172 = arith.constant 256 : index
    %232 = vector.load %arg14[%c2_171, %c256_172] : memref<32x384xf32, #tpu.memory_space<vmem>>, vector<24x128xf32>
    %233 = arith.truncf %230 : vector<24x128xf32> to vector<24x128xbf16>
    %c0_173 = arith.constant 0 : index
    %c0_174 = arith.constant 0 : index
    %234 = vector.load %arg5[%c0_173, %c0_174] : memref<128x256xbf16, #tpu.memory_space<vmem>>, vector<128x256xbf16>
    %cst_175 = arith.constant dense<0.000000e+00> : vector<24x256xf32>
    %235 = tpu.matmul %233, %234, %cst_175 {dimension_numbers = #tpu.dot_dimension_numbers<[1], [0], [0], [1], [0, 0, 1, 1], [], []>} : vector<24x128xbf16>, vector<128x256xbf16>, vector<24x256xf32> -> vector<24x256xf32>
    %236 = vector.broadcast %27 : vector<1x256xf32> to vector<24x256xf32>
    %237 = arith.addf %235, %236 : vector<24x256xf32>
    %238 = arith.addf %231, %237 : vector<24x256xf32>
    %239 = arith.negf %238 : vector<24x256xf32>
    %240 = math.exp %239 : vector<24x256xf32>
    %cst_176 = arith.constant 1.000000e+00 : f32
    %241 = vector.broadcast %cst_176 : f32 to vector<24x256xf32>
    %242 = arith.addf %241, %240 : vector<24x256xf32>
    %243 = arith.divf %241, %242 : vector<24x256xf32>
    %244 = vector.extract_strided_slice %243 {offsets = [0, 0], sizes = [24, 128], strides = [1, 1]} : vector<24x256xf32> to vector<24x128xf32>
    %245 = vector.extract_strided_slice %243 {offsets = [0, 128], sizes = [24, 128], strides = [1, 1]} : vector<24x256xf32> to vector<24x128xf32>
    %246 = arith.mulf %230, %245 : vector<24x128xf32>
    %247 = arith.truncf %246 : vector<24x128xf32> to vector<24x128xbf16>
    %c0_177 = arith.constant 0 : index
    %c0_178 = arith.constant 0 : index
    %248 = vector.load %arg7[%c0_177, %c0_178] : memref<128x128xbf16, #tpu.memory_space<vmem>>, vector<128x128xbf16>
    %cst_179 = arith.constant dense<0.000000e+00> : vector<24x128xf32>
    %249 = tpu.matmul %247, %248, %cst_179 {dimension_numbers = #tpu.dot_dimension_numbers<[1], [0], [0], [1], [0, 0, 1, 1], [], []>} : vector<24x128xbf16>, vector<128x128xbf16>, vector<24x128xf32> -> vector<24x128xf32>
    %250 = vector.broadcast %28 : vector<1x128xf32> to vector<24x128xf32>
    %251 = arith.addf %249, %250 : vector<24x128xf32>
    %252 = arith.addf %232, %251 : vector<24x128xf32>
    %253 = math.tanh %252 : vector<24x128xf32>
    %cst_180 = arith.constant 1.000000e+00 : f32
    %254 = vector.broadcast %cst_180 : f32 to vector<24x128xf32>
    %255 = arith.subf %254, %244 : vector<24x128xf32>
    %256 = arith.mulf %255, %230 : vector<24x128xf32>
    %257 = arith.mulf %244, %253 : vector<24x128xf32>
    %258 = arith.addf %256, %257 : vector<24x128xf32>
    %259 = vector.broadcast %26 : vector<24x1xf32> to vector<24x128xf32>
    %260 = arith.mulf %258, %259 : vector<24x128xf32>
    %c0_181 = arith.constant 0 : index
    %c0_182 = arith.constant 0 : index
    %261 = vector.load %arg11[%c0_181, %c0_182] : memref<24x128xf32, #tpu.memory_space<vmem>>, vector<24x128xf32>
    tpu.vector_store %arg11[%c0_181, %c0_182], %260 {strides = array<i32>} : memref<24x128xf32, #tpu.memory_space<vmem>>, vector<24x128xf32>,
    %cst_183 = arith.constant dense<0.000000e+00> : vector<128xf32>
    %262 = vector.multi_reduction <add>, %260, %cst_183 [0] : vector<24x128xf32> to vector<128xf32>
    %263 = vector.shape_cast %262 : vector<128xf32> to vector<1x128xf32>
    %c0_184 = arith.constant 0 : index
    %c0_185 = arith.constant 0 : index
    %c0_186 = arith.constant 0 : index
    %264 = vector.load %arg12[%c0_184, %c0_185, %c0_186] : memref<1x1x128xf32, #tpu.memory_space<vmem>>, vector<1x1x128xf32>
    %265 = vector.shape_cast %264 : vector<1x1x128xf32> to vector<1x128xf32>
    %266 = vector.shape_cast %263 : vector<1x128xf32> to vector<1x1x128xf32>
    tpu.vector_store %arg12[%c0_184, %c0_185, %c0_186], %266 {strides = array<i32>} : memref<1x1x128xf32, #tpu.memory_space<vmem>>, vector<1x1x128xf32>,
    %267 = arith.mulf %260, %260 : vector<24x128xf32>
    %cst_187 = arith.constant dense<0.000000e+00> : vector<128xf32>
    %268 = vector.multi_reduction <add>, %267, %cst_187 [0] : vector<24x128xf32> to vector<128xf32>
    %269 = vector.shape_cast %268 : vector<128xf32> to vector<1x128xf32>
    %c0_188 = arith.constant 0 : index
    %c0_189 = arith.constant 0 : index
    %c0_190 = arith.constant 0 : index
    %270 = vector.load %arg13[%c0_188, %c0_189, %c0_190] : memref<1x1x128xf32, #tpu.memory_space<vmem>>, vector<1x1x128xf32>
    %271 = vector.shape_cast %270 : vector<1x1x128xf32> to vector<1x128xf32>
    %272 = vector.shape_cast %269 : vector<1x128xf32> to vector<1x1x128xf32>
    tpu.vector_store %arg13[%c0_188, %c0_189, %c0_190], %272 {strides = array<i32>} : memref<1x1x128xf32, #tpu.memory_space<vmem>>, vector<1x1x128xf32>,
    return
  }
  func.func @transform_0(%arg0: i32) -> (i32, i32) {
    %c0_i32 = arith.constant 0 : i32
    %c0_i32_0 = arith.constant 0 : i32
    return %arg0, %c0_i32 : i32, i32
  }
  func.func @transform_1(%arg0: i32) -> (i32, i32) {
    %c0_i32 = arith.constant 0 : i32
    %c0_i32_0 = arith.constant 0 : i32
    %c0_i32_1 = arith.constant 0 : i32
    return %c0_i32, %c0_i32_0 : i32, i32
  }
  func.func @transform_2(%arg0: i32) -> (i32, i32) {
    %c0_i32 = arith.constant 0 : i32
    %c0_i32_0 = arith.constant 0 : i32
    %c0_i32_1 = arith.constant 0 : i32
    return %c0_i32, %c0_i32_0 : i32, i32
  }
  func.func @transform_3(%arg0: i32) -> (i32, i32) {
    %c0_i32 = arith.constant 0 : i32
    %c0_i32_0 = arith.constant 0 : i32
    %c0_i32_1 = arith.constant 0 : i32
    return %c0_i32, %c0_i32_0 : i32, i32
  }
  func.func @transform_4(%arg0: i32) -> (i32, i32) {
    %c0_i32 = arith.constant 0 : i32
    %c0_i32_0 = arith.constant 0 : i32
    %c0_i32_1 = arith.constant 0 : i32
    return %c0_i32, %c0_i32_0 : i32, i32
  }
  func.func @transform_5(%arg0: i32) -> (i32, i32) {
    %c0_i32 = arith.constant 0 : i32
    %c0_i32_0 = arith.constant 0 : i32
    %c0_i32_1 = arith.constant 0 : i32
    return %c0_i32, %c0_i32_0 : i32, i32
  }
  func.func @transform_6(%arg0: i32) -> (i32, i32) {
    %c0_i32 = arith.constant 0 : i32
    %c0_i32_0 = arith.constant 0 : i32
    %c0_i32_1 = arith.constant 0 : i32
    return %c0_i32, %c0_i32_0 : i32, i32
  }
  func.func @transform_7(%arg0: i32) -> (i32, i32) {
    %c0_i32 = arith.constant 0 : i32
    %c0_i32_0 = arith.constant 0 : i32
    %c0_i32_1 = arith.constant 0 : i32
    return %c0_i32, %c0_i32_0 : i32, i32
  }
  func.func @transform_8(%arg0: i32) -> (i32, i32, i32) {
    %c0_i32 = arith.constant 0 : i32
    %c0_i32_0 = arith.constant 0 : i32
    %c0_i32_1 = arith.constant 0 : i32
    %c0_i32_2 = arith.constant 0 : i32
    return %c0_i32, %c0_i32_0, %c0_i32_1 : i32, i32, i32
  }
  func.func @transform_9(%arg0: i32) -> (i32, i32) {
    %c0_i32 = arith.constant 0 : i32
    %c0_i32_0 = arith.constant 0 : i32
    %c0_i32_1 = arith.constant 0 : i32
    return %c0_i32, %c0_i32_0 : i32, i32
  }
  func.func @transform_10(%arg0: i32) -> (i32, i32) {
    %c0_i32 = arith.constant 0 : i32
    %c0_i32_0 = arith.constant 0 : i32
    return %arg0, %c0_i32 : i32, i32
  }
  func.func @transform_11(%arg0: i32) -> (i32, i32, i32) {
    %c0_i32 = arith.constant 0 : i32
    %c0_i32_0 = arith.constant 0 : i32
    %c0_i32_1 = arith.constant 0 : i32
    return %arg0, %c0_i32, %c0_i32_0 : i32, i32, i32
  }
  func.func @transform_12(%arg0: i32) -> (i32, i32, i32) {
    %c0_i32 = arith.constant 0 : i32
    %c0_i32_0 = arith.constant 0 : i32
    %c0_i32_1 = arith.constant 0 : i32
    return %arg0, %c0_i32, %c0_i32_0 : i32, i32, i32
  }
}

</mosaic_0001>

<bundles_post_ra>
// kernel: parallel_gru_layer_v4.3
= control target key start
LH: loop header
LB: loop body
LE: loop exit
PB: predicated region body
PF: predicated region fallthrough
CT: control target
= control target key end

     0   :  { %s297_s12 = smov 0   ;;  %s320_s0 = inlined_call_operand.vmem [shape: f32[48,128], index: 0, kind: input, shape index: {}, may-alias: {0,3}]   ;;  %s321_s1 = inlined_call_operand.vmem [shape: f32[1,128], index: 1, kind: input, shape index: {}]   ;;  %s322_s2 = inlined_call_operand.vmem [shape: f32[1,128], index: 2, kind: input, shape index: {}]   ;;  %s323_s3 = inlined_call_operand.vmem [shape: f32[48,128], index: 3, kind: output, shape index: {}, may-alias: {0,3}]  }
   0x1 LB: > { %s250_s13 = sadd.s32 4294967295, %s275_s12   ;;  %p254_p0 = scmp.ge.s32.totalorder %s275_s12, 1  ;;  %s275_s12 = sphi %s297_s12, %s13_s12  }
   0x2   : > { %p138_p1 = scmp.lt.s32.totalorder %s275_s12, 3 }
   0x4   : > { %p139_p2 = pnand %p254_p0, %p138_p1 }
   0x5   : > { %s162_s14 = smul.u32 (!%p139_p2), 3, %s250_s13 }
   0x6   : > { %142 = sbr.rel (%p139_p2) target bundleno = 22 (0x16), region = 32 }
   0x7   : > { %p163_p3 = scmp.lt.s32.totalorder (!%p139_p2), %s162_s14, 5 }
   0xb   : > { %s325_s14 = smov (!%p163_p3, %s162_s14), 5  ;;  %v267_v0 = vld [vmem:[%s321_s1] ss:$0 sm:$0xff] }
   0xc   : > { %s255_s17 = sshll.u32 %s325_s14, 3  ;;  %v268_v1 = vld [vmem:[%s322_s2] ss:$0 sm:$0xff] }
   0xd   : > { %s166_s20 = scalar_lea.vmem %s320_s0, %s255_s17  ;;  %s172_s25 = scalar_lea.vmem %s323_s3, %s255_s17 }
   0xe   : > { %v174_v2 = vld [vmem:[%s166_s20] sm:$0xff]  ;;  %v175_v3 = vld [vmem:[%s166_s20 + $0x8] sm:$0xff]  ;;  %v176_v4 = vld [vmem:[%s166_s20 + $0x10] sm:$0xff] }
   0xf   : > { %v181_v5 = vmul.f32 %v267_v0, %v174_v2  ;;  %v182_v6 = vmul.f32 %v267_v0, %v175_v3  ;;  %v183_v7 = vmul.f32 %v267_v0, %v176_v4 }
  0x11   : > { %v188_v8 = vadd.f32 %v268_v1, %v181_v5  ;;  %v189_v9 = vadd.f32 %v268_v1, %v182_v6  ;;  %v190_v10 = vadd.f32 %v268_v1, %v183_v7 }
  0x13   : > { %191 = vst [vmem:[%s172_s25] sm:$0xff] %v188_v8 }
  0x14   : > { %192 = vst [vmem:[%s172_s25 + $0x8] sm:$0xff] %v189_v9 }
  0x15   : > { %193 = vst [vmem:[%s172_s25 + $0x10] sm:$0xff] %v190_v10 }
  0x16 PF: > { %s13_s12 = sadd.s32 1, %s275_s12  }
  0x17   : > { %p10_p4 = scmp.ge.s32.totalorder %s13_s12, 4  }
  0x19   :  { %12 = sbr.rel (!%p10_p4) target bundleno = 1 (0x1), region = 62 }

// kernel: parallel_gru_layer_v4.2
= control target key start
LH: loop header
LB: loop body
LE: loop exit
PB: predicated region body
PF: predicated region fallthrough
CT: control target
= control target key end

     0   :  { %s6008_s21 = smov 0   ;;  %s7609_s0 = inlined_call_operand.vmem [shape: f32[48,128], index: 0, kind: input, shape index: {}]   ;;  %s7610_s1 = inlined_call_operand.vmem [shape: f32[1,128], index: 1, kind: input, shape index: {}]   ;;  %s7611_s2 = inlined_call_operand.vmem [shape: bf16[128,384], index: 2, kind: input, shape index: {}]   ;;  %s7612_s3 = inlined_call_operand.vmem [shape: f32[1,384], index: 3, kind: input, shape index: {}]   ;;  %s7613_s4 = inlined_call_operand.vmem [shape: bf16[128,256], index: 4, kind: input, shape index: {}]   ;;  %s7614_s5 = inlined_call_operand.vmem [shape: f32[1,256], index: 5, kind: input, shape index: {}]   ;;  %s7615_s6 = inlined_call_operand.vmem [shape: bf16[128,128], index: 6, kind: input, shape index: {}]   ;;  %s7616_s7 = inlined_call_operand.vmem [shape: f32[1,128], index: 7, kind: input, shape index: {}]   ;;  %s7617_s8 = inlined_call_operand.vmem [shape: bf16[7,128,128], index: 8, kind: input, shape index: {}]   ;;  %s7618_s9 = inlined_call_operand.vmem [shape: f32[1,128], index: 9, kind: input, shape index: {}]   ;;  %s7619_s10 = inlined_call_operand.vmem [shape: f32[48,128], index: 10, kind: output, shape index: {0}]   ;;  %s7620_s11 = inlined_call_operand.vmem [shape: f32[2,1,128], index: 11, kind: output, shape index: {1}]   ;;  %s7621_s12 = inlined_call_operand.vmem [shape: f32[2,1,128], index: 12, kind: output, shape index: {2}]  }
   0x1 LB: > { %s6014_s22 = sadd.s32 4294967295, %s5939_s21   ;;  %p4159_p0 = scmp.ge.s32.totalorder %s5939_s21, 1  ;;  %s5939_s21 = sphi %s6008_s21, %s23_s21  }
   0x2   : > { %p368_p1 = scmp.lt.s32.totalorder %s5939_s21, 3 }
   0x4   : > { %p369_p2 = pnand %p4159_p0, %p368_p1 }
   0x5   : > { %s416_s15 = smul.u32 (!%p369_p2), 3, %s6014_s22  ;;  %p428_p4 = scmp.lt.s32.totalorder (!%p369_p2), %s6014_s22, 1 }
   0x6   : > { %372 = sbr.rel (%p369_p2) target bundleno = 1678 (0x68e), region = 60 }
   0x7   : > { %p6105_p3 = scmp.lt.s32.totalorder (!%p369_p2), %s416_s15, 5 }
   0xb   : > { %v4248_v0 = vld [vmem:[%s7611_s2 + $0xa8] sm:$0xf]  ;;  %v5555_v1 = vld [vmem:[%s7611_s2 + $0xb0] sm:$0xf0]  ;;  %v5554_v2 = vld [vmem:[%s7611_s2 + $0xac] sm:$0xf] }
   0xc   : > { %v4249_v3 = vor.u32 %v5555_v1, %v4248_v0  ;;  %v4250_v4 = vld [vmem:[%s7611_s2 + $0xb4] sm:$0xf0]  ;;  %v4256_v5 = vld [vmem:[%s7611_s2 + $0xb0] sm:$0xf]  ;;  %v5556_v6 = vld [vmem:[%s7611_s2 + $0xb8] sm:$0xf0] }
   0xd   : > { %v4253_v7 = vor.u32 %v5554_v2, %v4250_v4  ;;  %v4257_v8 = vor.u32 %v5556_v6, %v4256_v5  ;;  %v5572_v9 = vld [vmem:[%s7617_s8 + $0x78] sm:$0xff]  ;;  %v4236_v10 = vld [vmem:[%s7611_s2 + $0x90] sm:$0xf]  ;;  %v5551_v13 = vld [vmem:[%s7611_s2 + $0x94] sm:$0xf]  ;;  %v5941_v46 = vmov 0.0  }
   0xe   : > { %v5552_v11 = vld [vmem:[%s7611_s2 + $0x98] sm:$0xf0]  ;;  %607 = vmatpush.bf16.msra.mxu0 %v4249_v3  ;;  %v4238_v14 = vld [vmem:[%s7611_s2 + $0x9c] sm:$0xf0]  ;;  %v4244_v15 = vld [vmem:[%s7611_s2 + $0x98] sm:$0xf]  ;;  %807 = vmatpush.bf16.msra.mxu3 %v5572_v9 }
   0xf   : > { %v4237_v12 = vor.u32 %v5552_v11, %v4236_v10  ;;  %625 = vmatpush.bf16.msra.mxu1 %v4253_v7  ;;  %643 = vmatpush.bf16.msra.mxu2 %v4257_v8  ;;  %v4241_v16 = vor.u32 %v5551_v13, %v4238_v14  ;;  %v5553_v17 = vld [vmem:[%s7611_s2 + $0xa0] sm:$0xf0]  ;;  %v5571_v18 = vld [vmem:[%s7617_s8 + $0x70] sm:$0xff]  ;;  %v4224_v19 = vld [vmem:[%s7611_s2 + $0x78] sm:$0xf]  ;;  %673 = vst [vmem:[#allocation3] sm:$0xff] %v5941_v46 }
  0x10   : > { %v4245_v20 = vor.u32 %v5553_v17, %v4244_v15  ;;  %v5549_v21 = vld [vmem:[%s7611_s2 + $0x80] sm:$0xf0]  ;;  %v5548_v22 = vld [vmem:[%s7611_s2 + $0x7c] sm:$0xf]  ;;  %v4226_v23 = vld [vmem:[%s7611_s2 + $0x84] sm:$0xf0] }
  0x11   : > { %v4232_v24 = vld [vmem:[%s7611_s2 + $0x80] sm:$0xf]  ;;  %v5550_v25 = vld [vmem:[%s7611_s2 + $0x88] sm:$0xf0]  ;;  %v4225_v26 = vor.u32 %v5549_v21, %v4224_v19  ;;  %v4229_v28 = vor.u32 %v5548_v22, %v4226_v23  ;;  %v5545_v32 = vld [vmem:[%s7611_s2 + $0x64] sm:$0xf] }
  0x12   : > { %608 = vmatpush.bf16.msra.mxu0 %v4237_v12  ;;  %v5570_v27 = vld [vmem:[%s7617_s8 + $0x68] sm:$0xff]  ;;  %v4233_v29 = vor.u32 %v5550_v25, %v4232_v24  ;;  %v4212_v30 = vld [vmem:[%s7611_s2 + $0x60] sm:$0xf]  ;;  %808 = vmatpush.bf16.msra.mxu3 %v5571_v18  ;;  %v4214_v33 = vld [vmem:[%s7611_s2 + $0x6c] sm:$0xf0]  ;;  %s7652_s15 = smov (!%p6105_p3, %s416_s15), 5 }
  0x13   : > { %626 = vmatpush.bf16.msra.mxu1 %v4241_v16  ;;  %644 = vmatpush.bf16.msra.mxu2 %v4245_v20  ;;  %v5546_v31 = vld [vmem:[%s7611_s2 + $0x68] sm:$0xf0]  ;;  %v4220_v34 = vld [vmem:[%s7611_s2 + $0x68] sm:$0xf]  ;;  %v5547_v35 = vld [vmem:[%s7611_s2 + $0x70] sm:$0xf0]  ;;  %v4217_v38 = vor.u32 %v5545_v32, %v4214_v33 }
  0x14   : > { %v4213_v36 = vor.u32 %v5546_v31, %v4212_v30  ;;  %v4200_v37 = vld [vmem:[%s7611_s2 + $0x48] sm:$0xf]  ;;  %v4221_v39 = vor.u32 %v5547_v35, %v4220_v34  ;;  %v5543_v40 = vld [vmem:[%s7611_s2 + $0x50] sm:$0xf0]  ;;  %v5542_v41 = vld [vmem:[%s7611_s2 + $0x4c] sm:$0xf] }
  0x15   : > { %v4202_v42 = vld [vmem:[%s7611_s2 + $0x54] sm:$0xf0]  ;;  %v5569_v43 = vld [vmem:[%s7617_s8 + $0x60] sm:$0xff]  ;;  %v4208_v44 = vld [vmem:[%s7611_s2 + $0x50] sm:$0xf]  ;;  %v4201_v47 = vor.u32 %v5543_v40, %v4200_v37  ;;  %670 = vst [vmem:[#allocation2 + $0x48] sm:$0xff] %v5941_v46 }
  0x16   : > { %609 = vmatpush.bf16.msra.mxu0 %v4225_v26  ;;  %809 = vmatpush.bf16.msra.mxu3 %v5570_v27  ;;  %v5544_v45 = vld [vmem:[%s7611_s2 + $0x58] sm:$0xf0]  ;;  %v4188_v48 = vld [vmem:[%s7611_s2 + $0x30] sm:$0xf]  ;;  %v4205_v49 = vor.u32 %v5542_v41, %v4202_v42  ;;  %v5539_v53 = vld [vmem:[%s7611_s2 + $0x34] sm:$0xf] }
  0x17   : > { %627 = vmatpush.bf16.msra.mxu1 %v4229_v28  ;;  %645 = vmatpush.bf16.msra.mxu2 %v4233_v29  ;;  %v4209_v50 = vor.u32 %v5544_v45, %v4208_v44  ;;  %v5568_v51 = vld [vmem:[%s7617_s8 + $0x58] sm:$0xff]  ;;  %v4190_v54 = vld [vmem:[%s7611_s2 + $0x3c] sm:$0xf0]  ;;  %v5541_v56 = vld [vmem:[%s7611_s2 + $0x40] sm:$0xf0]  ;;  %671 = vst [vmem:[#allocation2 + $0x10] sm:$0xff] %v5941_v46 }
  0x18   : > { %v5540_v52 = vld [vmem:[%s7611_s2 + $0x38] sm:$0xf0]  ;;  %v4196_v55 = vld [vmem:[%s7611_s2 + $0x38] sm:$0xf]  ;;  %v5537_v59 = vld [vmem:[%s7611_s2 + $0x20] sm:$0xf0]  ;;  %v4193_v61 = vor.u32 %v5539_v53, %v4190_v54 }
  0x19   : > { %v4176_v57 = vld [vmem:[%s7611_s2 + $0x18] sm:$0xf]  ;;  %v4189_v58 = vor.u32 %v5540_v52, %v4188_v48  ;;  %v5536_v60 = vld [vmem:[%s7611_s2 + $0x1c] sm:$0xf]  ;;  %s4160_s19 = sshll.u32 %s7652_s15, 3  ;;  %672 = vst [vmem:[#allocation2 + $0x40] sm:$0xff] %v5941_v46  ;;  %v4197_v62 = vor.u32 %v5541_v56, %v4196_v55 }
  0x1a   : > { %610 = vmatpush.bf16.msra.mxu0 %v4213_v36  ;;  %810 = vmatpush.bf16.msra.mxu3 %v5569_v43  ;;  %v5567_v63 = vld [vmem:[%s7617_s8 + $0x50] sm:$0xff]  ;;  %v6170_v0 = vld [vmem:[%s7610_s1] ss:$0 sm:$0xff]  ;;  %674 = vst [vmem:[#allocation3 + $0x20] sm:$0xff] %v5941_v46  ;;  %v4178_v1 = vld [vmem:[%s7611_s2 + $0x24] sm:$0xf0]  ;;  %v4177_v4 = vor.u32 %v5537_v59, %v4176_v57  ;;  %s6200_s27 = scalar_lea.vmem %s7609_s0, %s4160_s19  ;;  %s7580_s26 = scalar_lea.vmem %s7619_s10, %s4160_s19 }
  0x1b   : > { %628 = vmatpush.bf16.msra.mxu1 %v4217_v38  ;;  %646 = vmatpush.bf16.msra.mxu2 %v4221_v39  ;;  %v4184_v2 = vld [vmem:[%s7611_s2 + $0x20] sm:$0xf]  ;;  %v5538_v3 = vld [vmem:[%s7611_s2 + $0x28] sm:$0xf0]  ;;  %713 = vst [vmem:[#allocation3 + $0x8] sm:$0xff] %v6170_v0  ;;  %v4181_v6 = vor.u32 %v5536_v60, %v4178_v1  ;;  %v5564_v20 = vld [vmem:[%s7617_s8 + $0x38] sm:$0xff] }
  0x1c   : > { %v4164_v5 = vld [vmem:[%s7611_s2] sm:$0xf]  ;;  %714 = vst [vmem:[#allocation3 + $0x10] sm:$0xff] %v6170_v0  ;;  %v4185_v7 = vor.u32 %v5538_v3, %v4184_v2  ;;  %v5566_v8 = vld [vmem:[%s7617_s8 + $0x48] sm:$0xff]  ;;  %v5533_v10 = vld [vmem:[%s7611_s2 + $0x4] sm:$0xf] }
  0x1d   : > { %v5534_v9 = vld [vmem:[%s7611_s2 + $0x8] sm:$0xf0]  ;;  %715 = vst [vmem:[#allocation3 + $0x18] sm:$0xff] %v6170_v0  ;;  %v4166_v11 = vld [vmem:[%s7611_s2 + $0xc] sm:$0xf0]  ;;  %v434_v15 = vld [vmem:[%s6200_s27] sm:$0xff] }
  0x1e   : > { %611 = vmatpush.bf16.msra.mxu0 %v4201_v47  ;;  %811 = vmatpush.bf16.msra.mxu3 %v5568_v51  ;;  %v4172_v12 = vld [vmem:[%s7611_s2 + $0x8] sm:$0xf]  ;;  %v5535_v13 = vld [vmem:[%s7611_s2 + $0x10] sm:$0xf0]  ;;  %v4165_v14 = vor.u32 %v5534_v9, %v4164_v5  ;;  %v4169_v17 = vor.u32 %v5533_v10, %v4166_v11  ;;  %v5565_v19 = vld [vmem:[%s7617_s8 + $0x40] sm:$0xff]  ;;  %s7654_s22 = smov (!%p428_p4, %s6014_s22), 1 }
  0x1f   : > { %629 = vmatpush.bf16.msra.mxu1 %v4205_v49  ;;  %647 = vmatpush.bf16.msra.mxu2 %v4209_v50  ;;  %v435_v16 = vld [vmem:[%s6200_s27 + $0x8] sm:$0xff]  ;;  %v4173_v18 = vor.u32 %v5535_v13, %v4172_v12  ;;  %v5580_v23 = vld [vmem:[%s7617_s8 + $0xb8] sm:$0xff]  ;;  %v5563_v28 = vld [vmem:[%s7617_s8 + $0x30] sm:$0xff]  ;;  %s430_s28 = scalar_lea.vmem %s7620_s11, %s7654_s22  ;;  %s433_s13 = scalar_lea.vmem %s7621_s12, %s7654_s22 }
  0x20   : > { %v437_v22 = vpack.c.bf16 %v435_v16, %v434_v15  ;;  %v5588_v25 = vld [vmem:[%s7617_s8 + $0xf8] sm:$0xff]  ;;  %v5579_v29 = vld [vmem:[%s7617_s8 + $0xb0] sm:$0xff]  ;;  %v5562_v32 = vld [vmem:[%s7617_s8 + $0x28] sm:$0xff] }
  0x21   : > { %v5596_v27 = vld [vmem:[%s7617_s8 + $0x138] sm:$0xff]  ;;  %v5587_v30 = vld [vmem:[%s7617_s8 + $0xf0] sm:$0xff]  ;;  %v5578_v33 = vld [vmem:[%s7617_s8 + $0xa8] sm:$0xff] }
  0x22   : > { %612 = vmatpush.bf16.msra.mxu0 %v4189_v58  ;;  %812 = vmatpush.bf16.msra.mxu3 %v5567_v63  ;;  %v737_v21 = vld [vmem:[#allocation3 + $0x6] sm:$0xff]  ;;  %v5595_v31 = vld [vmem:[%s7617_s8 + $0x130] sm:$0xff]  ;;  %v5560_v41 = vld [vmem:[%s7617_s8 + $0x18] sm:$0xff] }
  0x23   : > { %630 = vmatpush.bf16.msra.mxu1 %v4193_v61  ;;  %648 = vmatpush.bf16.msra.mxu2 %v4197_v62  ;;  %v738_v24 = vld [vmem:[#allocation3 + $0xe] sm:$0xff]  ;;  %v5561_v36 = vld [vmem:[%s7617_s8 + $0x20] sm:$0xff]  ;;  %v5576_v44 = vld [vmem:[%s7617_s8 + $0x98] sm:$0xff] }
  0x24   : > { %v740_v26 = vpack.c.bf16 %v738_v24, %v737_v21  ;;  %v5586_v34 = vld [vmem:[%s7617_s8 + $0xe8] sm:$0xff]  ;;  %v5577_v37 = vld [vmem:[%s7617_s8 + $0xa0] sm:$0xff]  ;;  %v436_v38 = vld [vmem:[%s6200_s27 + $0x10] sm:$0xff] }
  0x25   : > { %v5594_v35 = vld [vmem:[%s7617_s8 + $0x128] sm:$0xff]  ;;  %v5585_v39 = vld [vmem:[%s7617_s8 + $0xe0] sm:$0xff]  ;;  %v739_v42 = vld [vmem:[#allocation3 + $0x16] sm:$0xff]  ;;  %v438_v43 = vpack.c.bf16 %v436_v38, %v436_v38 }
  0x26   : > { %613 = vmatpush.bf16.msra.mxu0 %v4177_v4  ;;  %813 = vmatpush.bf16.msra.mxu3 %v5566_v8  ;;  %v5593_v40 = vld [vmem:[%s7617_s8 + $0x120] sm:$0xff]  ;;  %v5584_v45 = vld [vmem:[%s7617_s8 + $0xd8] sm:$0xff]  ;;  %v741_v46 = vpack.c.bf16 %v739_v42, %v739_v42  ;;  %v5559_v48 = vld [vmem:[%s7617_s8 + $0x10] sm:$0xff] }
  0x27   : > { %631 = vmatpush.bf16.msra.mxu1 %v4181_v6  ;;  %649 = vmatpush.bf16.msra.mxu2 %v4185_v7  ;;  %v5592_v47 = vld [vmem:[%s7617_s8 + $0x118] sm:$0xff]  ;;  %v5575_v49 = vld [vmem:[%s7617_s8 + $0x90] sm:$0xff]  ;;  %v5558_v52 = vld [vmem:[%s7617_s8 + $0x8] sm:$0xff]  ;;  %v985_v7 = vpack.c.bf16 %v6170_v0, %v6170_v0 }
  0x28   : > { %v5583_v50 = vld [vmem:[%s7617_s8 + $0xd0] sm:$0xff]  ;;  %v5574_v53 = vld [vmem:[%s7617_s8 + $0x88] sm:$0xff]  ;;  %v5557_v56 = vld [vmem:[%s7617_s8] sm:$0xff] }
  0x29   : > { %v5591_v51 = vld [vmem:[%s7617_s8 + $0x110] sm:$0xff]  ;;  %v5582_v54 = vld [vmem:[%s7617_s8 + $0xc8] sm:$0xff]  ;;  %v5573_v57 = vld [vmem:[%s7617_s8 + $0x80] sm:$0xff] }
  0x2a   : > { %614 = vmatpush.bf16.msra.mxu0 %v4165_v14  ;;  %814 = vmatpush.bf16.msra.mxu3 %v5565_v19  ;;  %v5590_v55 = vld [vmem:[%s7617_s8 + $0x108] sm:$0xff]  ;;  %v5604_v58 = vld [vmem:[%s7617_s8 + $0x178] sm:$0xff]  ;;  %v5581_v62 = vld [vmem:[%s7617_s8 + $0xc0] sm:$0xff] }
  0x2b   : > { %632 = vmatpush.bf16.msra.mxu1 %v4169_v17  ;;  %650 = vmatpush.bf16.msra.mxu2 %v4173_v18  ;;  %v716_v59 = vld [vmem:[#allocation3 + $0x5] sm:$0xff]  ;;  %v717_v60 = vld [vmem:[#allocation3 + $0xd] sm:$0xff]  ;;  %v5612_v61 = vld [vmem:[%s7617_s8 + $0x1b8] sm:$0xff] }
  0x2c   : > { %v891_v63 = vld [vmem:[#allocation3 + $0x7] sm:$0xff]  ;;  %v892_v1 = vld [vmem:[#allocation3 + $0xf] sm:$0xff]  ;;  %v719_v5 = vpack.c.bf16 %v717_v60, %v716_v59  ;;  %v893_v15 = vld [vmem:[#allocation3 + $0x17] sm:$0xff] }
  0x2d   : > { %615 = vmatmul.bf16.vlgmr.msra.gmra.mxu0 %v437_v22  ;;  %815 = vmatmul.bf16.vlgmr.msra.gmra.mxu3 %v740_v26  ;;  %v5589_v2 = vld [vmem:[%s7617_s8 + $0x100] sm:$0xff]  ;;  %v1073_v3 = vld [vmem:[#allocation3 + $0x9] sm:$0xff]  ;;  %v1074_v4 = vld [vmem:[#allocation3 + $0x11] sm:$0xff]  ;;  %v894_v6 = vpack.c.bf16 %v892_v1, %v891_v63 }
  0x2e   : > { %873 = vmatpush.bf16.msrb.mxu0 %v5564_v20  ;;  %633 = vmatmul.bf16.vlgmr.msra.gmra.mxu1 %v437_v22  ;;  %v1076_v8 = vpack.c.bf16 %v1074_v4, %v1073_v3  ;;  %v5603_v9 = vld [vmem:[%s7617_s8 + $0x170] sm:$0xff]  ;;  %v5602_v0 = vld [vmem:[%s7617_s8 + $0x168] sm:$0xff]  ;;  %v5601_v12 = vld [vmem:[%s7617_s8 + $0x160] sm:$0xff]  ;;  %v895_v20 = vpack.c.bf16 %v893_v15, %v893_v15 }
  0x2f   : > { %961 = vmatpush.bf16.msrb.mxu1 %v5580_v23  ;;  %651 = vmatmul.bf16.vlgmr.msra.gmra.mxu2 %v437_v22  ;;  %v5611_v10 = vld [vmem:[%s7617_s8 + $0x1b0] sm:$0xff]  ;;  %v5610_v11 = vld [vmem:[%s7617_s8 + $0x1a8] sm:$0xff]  ;;  %v5609_v13 = vld [vmem:[%s7617_s8 + $0x1a0] sm:$0xff] }
  0x30   : > { %1052 = vmatpush.bf16.msrb.mxu2 %v5588_v25  ;;  %1143 = vmatpush.bf16.msrb.mxu3 %v5596_v27  ;;  %v718_v14 = vld [vmem:[#allocation3 + $0x15] sm:$0xff]  ;;  %v5598_v24 = vld [vmem:[%s7617_s8 + $0x148] sm:$0xff]  ;;  %v5597_v26 = vld [vmem:[%s7617_s8 + $0x140] sm:$0xff] }
  0x31   : > { %v5600_v16 = vld [vmem:[%s7617_s8 + $0x158] sm:$0xff]  ;;  %v720_v19 = vpack.c.bf16 %v718_v14, %v718_v14  ;;  %v5599_v22 = vld [vmem:[%s7617_s8 + $0x150] sm:$0xff]  ;;  %v5606_v25 = vld [vmem:[%s7617_s8 + $0x188] sm:$0xff] }
  0x32   : > { %874 = vmatpush.bf16.msrb.mxu0 %v5563_v28  ;;  %v5608_v17 = vld [vmem:[%s7617_s8 + $0x198] sm:$0xff]  ;;  %v5607_v23 = vld [vmem:[%s7617_s8 + $0x190] sm:$0xff]  ;;  %v5605_v27 = vld [vmem:[%s7617_s8 + $0x180] sm:$0xff] }
  0x33   : > { %962 = vmatpush.bf16.msrb.mxu1 %v5579_v29  ;;  %v1075_v18 = vld [vmem:[#allocation3 + $0x19] sm:$0xff]  ;;  %v1164_v28 = vld [vmem:[#allocation3 + $0xa] sm:$0xff]  ;;  %v5627_v60 = vld [vmem:[%s7613_s4 + $0x74] sm:$0xf] }
  0x34   : > { %1053 = vmatpush.bf16.msrb.mxu2 %v5587_v30  ;;  %1144 = vmatpush.bf16.msrb.mxu3 %v5595_v31  ;;  %v1077_v21 = vpack.c.bf16 %v1075_v18, %v1075_v18  ;;  %v1165_v29 = vld [vmem:[#allocation3 + $0x12] sm:$0xff]  ;;  %v471_v38 = vld [vmem:[%s7612_s3] sm:$0x7]  ;;  %v5625_v3 = vld [vmem:[%s7613_s4 + $0x64] sm:$0xf] }
  0x35   : > { %v1255_v30 = vld [vmem:[#allocation3 + $0xb] sm:$0xff]  ;;  %v1256_v31 = vld [vmem:[#allocation3 + $0x13] sm:$0xff]  ;;  %v4625_v14 = vld [vmem:[%s7613_s4 + $0x58] sm:$0xf0] }
  0x36   : > { %875 = vmatpush.bf16.msrb.mxu0 %v5562_v32  ;;  %v1167_v32 = vpack.c.bf16 %v1165_v29, %v1164_v28  ;;  %v4639_v63 = vld [vmem:[%s7613_s4 + $0x70] sm:$0xf]  ;;  %v5628_v1 = vld [vmem:[%s7613_s4 + $0x74] sm:$0xf0]  ;;  %v4633_v4 = vld [vmem:[%s7613_s4 + $0x68] sm:$0xf0] }
  0x37   : > { %963 = vmatpush.bf16.msrb.mxu1 %v5578_v33  ;;  %v1258_v33 = vpack.c.bf16 %v1256_v31, %v1255_v30  ;;  %v5621_v18 = vld [vmem:[%s7613_s4 + $0x44] sm:$0xf]  ;;  %v5619_v29 = vld [vmem:[%s7613_s4 + $0x34] sm:$0xf]  ;;  %v4609_v30 = vld [vmem:[%s7613_s4 + $0x38] sm:$0xf0] }
  0x38   : > { %1054 = vmatpush.bf16.msrb.mxu2 %v5586_v34  ;;  %1145 = vmatpush.bf16.msrb.mxu3 %v5594_v35  ;;  %v1166_v34 = vld [vmem:[#allocation3 + $0x1a] sm:$0xff]  ;;  %v4607_v31 = vld [vmem:[%s7613_s4 + $0x30] sm:$0xf] }
  0x39   : > { %v1257_v35 = vld [vmem:[#allocation3 + $0x1b] sm:$0xff] }
  0x3a   : > { %876 = vmatpush.bf16.msrb.mxu0 %v5561_v36  ;;  %v1168_v36 = vpack.c.bf16 %v1166_v34, %v1166_v34 }
  0x3b   : > { %964 = vmatpush.bf16.msrb.mxu1 %v5577_v37  ;;  %v1259_v37 = vpack.c.bf16 %v1257_v35, %v1257_v35  ;;  %v5617_v35 = vld [vmem:[%s7613_s4 + $0x24] sm:$0xf] }
  0x3c   : > { %1055 = vmatpush.bf16.msrb.mxu2 %v5585_v39  ;;  %1146 = vmatpush.bf16.msrb.mxu3 %v5593_v40  ;;  %v473_v39 = vperm.slane %v471_v38, 0  ;;  %v474_v40 = vperm.slane %v471_v38, 1 }
  0x3d   : > { %620 = vmatmul.bf16.gmra.mxu0 %v438_v43  ;;  %820 = vmatmul.bf16.gmra.mxu3 %v741_v46 }
  0x3e   : > { %877 = vmatpush.bf16.msrb.mxu0 %v5560_v41  ;;  %638 = vmatmul.bf16.gmra.mxu1 %v438_v43 }
  0x3f   : > { %965 = vmatpush.bf16.msrb.mxu1 %v5576_v44  ;;  %656 = vmatmul.bf16.gmra.mxu2 %v438_v43 }
  0x40   : > { %1056 = vmatpush.bf16.msrb.mxu2 %v5584_v45  ;;  %1147 = vmatpush.bf16.msrb.mxu3 %v5592_v47  ;;  %v475_v45 = vperm.slane %v471_v38, 2 }
  0x42   : > { %878 = vmatpush.bf16.msrb.mxu0 %v5559_v48 }
  0x43   : > { %966 = vmatpush.bf16.msrb.mxu1 %v5575_v49 }
  0x44   : > { %1057 = vmatpush.bf16.msrb.mxu2 %v5583_v50  ;;  %1148 = vmatpush.bf16.msrb.mxu3 %v5591_v51 }
  0x46   : > { %879 = vmatpush.bf16.msrb.mxu0 %v5558_v52 }
  0x47   : > { %967 = vmatpush.bf16.msrb.mxu1 %v5574_v53 }
  0x48   : > { %1058 = vmatpush.bf16.msrb.mxu2 %v5582_v54  ;;  %1149 = vmatpush.bf16.msrb.mxu3 %v5590_v55 }
  0x4a   : > { %880 = vmatpush.bf16.msrb.mxu0 %v5557_v56 }
  0x4b   : > { %968 = vmatpush.bf16.msrb.mxu1 %v5573_v57 }
  0x4c   : > { %1059 = vmatpush.bf16.msrb.mxu2 %v5581_v62  ;;  %1150 = vmatpush.bf16.msrb.mxu3 %v5589_v2  ;;  %v4640_v2 = vor.u32 %v5628_v1, %v4639_v63  ;;  %v4583_v63 = vld [vmem:[%s7613_s4] sm:$0xf] }
  0x4d   : > { %881 = vmatmul.bf16.vlgmr.msrb.gmra.mxu0 %v719_v5  ;;  %v4631_v5 = vld [vmem:[%s7613_s4 + $0x60] sm:$0xf] }
  0x4e   : > { %1234 = vmatpush.bf16.msra.mxu0 %v5604_v58  ;;  %969 = vmatmul.bf16.vlgmr.msrb.gmra.mxu1 %v894_v6 }
  0x4f   : > { %1325 = vmatpush.bf16.msra.mxu1 %v5612_v61  ;;  %1060 = vmatmul.bf16.vlgmr.msrb.gmra.mxu2 %v985_v7  ;;  %v4641_v61 = vld [vmem:[%s7613_s4 + $0x78] sm:$0xf0] }
  0x50   : > { %1151 = vmatmul.bf16.vlgmr.msrb.gmra.mxu3 %v1076_v8  ;;  %v4644_v62 = vor.u32 %v5627_v60, %v4641_v61  ;;  %1467 = vmatpush.bf16.msra.mxu2 %v4640_v2  ;;  %v5626_v8 = vld [vmem:[%s7613_s4 + $0x64] sm:$0xf0]  ;;  %v5613_v61 = vld [vmem:[%s7613_s4 + $0x4] sm:$0xf] }
  0x52   : > { %1235 = vmatpush.bf16.msra.mxu0 %v5603_v9  ;;  %1485 = vmatpush.bf16.msra.mxu3 %v4644_v62  ;;  %v4585_v62 = vld [vmem:[%s7613_s4 + $0x8] sm:$0xf0] }
  0x53   : > { %1326 = vmatpush.bf16.msra.mxu1 %v5611_v10  ;;  %v4588_v2 = vor.u32 %v5613_v61, %v4585_v62  ;;  %v5633_v61 = vld [vmem:[%s7615_s6 + $0x20] sm:$0xff] }
  0x56   : > { %1236 = vmatpush.bf16.msra.mxu0 %v5602_v0 }
  0x57   : > { %1327 = vmatpush.bf16.msra.mxu1 %v5610_v11  ;;  %v4632_v11 = vor.u32 %v5626_v8, %v4631_v5 }
  0x59   : > { %1468 = vmatpush.bf16.msra.mxu2 %v4632_v11 }
  0x5a   : > { %1237 = vmatpush.bf16.msra.mxu0 %v5601_v12 }
  0x5b   : > { %1328 = vmatpush.bf16.msra.mxu1 %v5609_v13  ;;  %v5623_v13 = vld [vmem:[%s7613_s4 + $0x54] sm:$0xf] }
  0x5c   : > { %v4628_v15 = vor.u32 %v5623_v13, %v4625_v14 }
  0x5d   : > { %886 = vmatmul.bf16.gmra.mxu0 %v720_v19 }
  0x5e   : > { %1238 = vmatpush.bf16.msra.mxu0 %v5600_v16  ;;  %974 = vmatmul.bf16.gmra.mxu1 %v895_v20  ;;  %v4623_v16 = vld [vmem:[%s7613_s4 + $0x50] sm:$0xf]  ;;  %v4617_v20 = vld [vmem:[%s7613_s4 + $0x48] sm:$0xf0] }
  0x5f   : > { %1329 = vmatpush.bf16.msra.mxu1 %v5608_v17  ;;  %1065 = vmatmul.bf16.gmra.mxu2 %v985_v7  ;;  %v4636_v7 = vor.u32 %v5625_v3, %v4633_v4  ;;  %v5624_v17 = vld [vmem:[%s7613_s4 + $0x54] sm:$0xf0]  ;;  %v5614_v3 = vld [vmem:[%s7613_s4 + $0x4] sm:$0xf0] }
  0x60   : > { %1156 = vmatmul.bf16.gmra.mxu3 %v1077_v21  ;;  %v4624_v19 = vor.u32 %v5624_v17, %v4623_v16  ;;  %v4620_v21 = vor.u32 %v5621_v18, %v4617_v20 }
  0x61   : > { %1486 = vmatpush.bf16.msra.mxu3 %v4636_v7 }
  0x62   : > { %1239 = vmatpush.bf16.msra.mxu0 %v5599_v22  ;;  %1469 = vmatpush.bf16.msra.mxu2 %v4624_v19  ;;  %v4615_v22 = vld [vmem:[%s7613_s4 + $0x40] sm:$0xf] }
  0x63   : > { %1330 = vmatpush.bf16.msra.mxu1 %v5607_v23  ;;  %v5622_v23 = vld [vmem:[%s7613_s4 + $0x44] sm:$0xf0] }
  0x65   : > { %1487 = vmatpush.bf16.msra.mxu3 %v4628_v15 }
  0x66   : > { %1240 = vmatpush.bf16.msra.mxu0 %v5598_v24 }
  0x67   : > { %1331 = vmatpush.bf16.msra.mxu1 %v5606_v25  ;;  %v4616_v25 = vor.u32 %v5622_v23, %v4615_v22 }
  0x69   : > { %1488 = vmatpush.bf16.msra.mxu3 %v4620_v21  ;;  %1470 = vmatpush.bf16.msra.mxu2 %v4616_v25 }
  0x6a   : > { %1241 = vmatpush.bf16.msra.mxu0 %v5597_v26 }
  0x6b   : > { %1332 = vmatpush.bf16.msra.mxu1 %v5605_v27 }
  0x6d   : > { %1242 = vmatmul.bf16.vlgmr.msra.gmra.mxu0 %v1167_v32  ;;  %v4612_v32 = vor.u32 %v5619_v29, %v4609_v30 }
  0x6e   : > { %1333 = vmatmul.bf16.vlgmr.msra.gmra.mxu1 %v1258_v33  ;;  %v5620_v33 = vld [vmem:[%s7613_s4 + $0x34] sm:$0xf0] }
  0x6f   : > { %v4608_v34 = vor.u32 %v5620_v33, %v4607_v31  ;;  %1489 = vmatpush.bf16.msra.mxu3 %v4612_v32 }
  0x71   : > { %1471 = vmatpush.bf16.msra.mxu2 %v4608_v34 }
  0x7d   : > { %1247 = vmatmul.bf16.gmra.mxu0 %v1168_v36  ;;  %v4601_v36 = vld [vmem:[%s7613_s4 + $0x28] sm:$0xf0] }
  0x7e   : > { %1338 = vmatmul.bf16.gmra.mxu1 %v1259_v37  ;;  %v4599_v37 = vld [vmem:[%s7613_s4 + $0x20] sm:$0xf] }
  0xaa   : > { %v616_v41 = vpop.f32.mrf.mxu0 }
  0xab   : > { %v6367_v42 = vadd.f32 %v616_v41, %v473_v39  ;;  %v634_v43 = vpop.f32.mrf.mxu1 }
  0xac   : > { %v6369_v44 = vadd.f32 %v634_v43, %v474_v40 }
  0xad   : > { %661 = vst [vmem:[#allocation2 + $0x30] sm:$0xff] %v6367_v42 }
  0xae   : > { %662 = vst [vmem:[#allocation2] sm:$0xff] %v6369_v44 }
  0xb0   : > { %v6375_v49 = vpop.f32.mrf.mxu3 }
  0xb2   : > { %v652_v46 = vpop.f32.mrf.mxu2  ;;  %v618_v48 = vpop.f32.mrf.mxu0 }
  0xb3   : > { %v6373_v47 = vadd.f32 %v652_v46, %v475_v45  ;;  %v6377_v50 = vadd.f32 %v618_v48, %v473_v39  ;;  %v636_v51 = vpop.f32.mrf.mxu1  ;;  %v5615_v48 = vld [vmem:[%s7613_s4 + $0x14] sm:$0xf] }
  0xb4   : > { %v6380_v52 = vadd.f32 %v636_v51, %v474_v40  ;;  %v4593_v51 = vld [vmem:[%s7613_s4 + $0x18] sm:$0xf0] }
  0xb5   : > { %663 = vst [vmem:[#allocation2 + $0x58] sm:$0xff] %v6373_v47 }
  0xb6   : > { %664 = vst [vmem:[#allocation2 + $0x18] sm:$0xff] %v6377_v50 }
  0xb7   : > { %665 = vst [vmem:[#allocation2 + $0x50] sm:$0xff] %v6380_v52 }
  0xb8   : > { %v6386_v56 = vpop.f32.mrf.mxu3 }
  0xba   : > { %v654_v53 = vpop.f32.mrf.mxu2  ;;  %v621_v55 = vpop.f32.mrf.mxu0 }
  0xbb   : > { %v6384_v54 = vadd.f32 %v654_v53, %v475_v45  ;;  %v6388_v57 = vadd.f32 %v621_v55, %v473_v39  ;;  %v639_v58 = vpop.f32.mrf.mxu1  ;;  %v4604_v39 = vor.u32 %v5617_v35, %v4601_v36  ;;  %v4591_v53 = vld [vmem:[%s7613_s4 + $0x10] sm:$0xf]  ;;  %v4596_v55 = vor.u32 %v5615_v48, %v4593_v51 }
  0xbc   : > { %v6391_v59 = vadd.f32 %v639_v58, %v474_v40  ;;  %v5618_v40 = vld [vmem:[%s7613_s4 + $0x24] sm:$0xf0]  ;;  %v5616_v58 = vld [vmem:[%s7613_s4 + $0x14] sm:$0xf0] }
  0xbd   : > { %666 = vst [vmem:[#allocation2 + $0x20] sm:$0xff] %v6384_v54  ;;  %1490 = vmatpush.bf16.msra.mxu3 %v4604_v39  ;;  %v4592_v60 = vor.u32 %v5616_v58, %v4591_v53  ;;  %v5636_v53 = vld [vmem:[%s7615_s6 + $0x38] sm:$0xff]  ;;  %v5634_v58 = vld [vmem:[%s7615_s6 + $0x28] sm:$0xff] }
  0xbe   : > { %667 = vst [vmem:[#allocation2 + $0x8] sm:$0xff] %v6388_v57  ;;  %1695 = vmatpush.bf16.msrb.mxu0 %v5636_v53 }
  0xbf   : > { %668 = vst [vmem:[#allocation2 + $0x38] sm:$0xff] %v6391_v59 }
  0xc0   : > { %v6421_v0 = vpop.f32.mrf.mxu3 }
  0xc1   : > { %1491 = vmatpush.bf16.msra.mxu3 %v4596_v55  ;;  %v5635_v55 = vld [vmem:[%s7615_s6 + $0x30] sm:$0xff] }
  0xc2   : > { %v657_v6 = vpop.f32.mrf.mxu2  ;;  %v623_v10 = vpop.f32.mrf.mxu0  ;;  %1696 = vmatpush.bf16.msrb.mxu0 %v5635_v55 }
  0xc3   : > { %v6419_v9 = vadd.f32 %v657_v6, %v475_v45  ;;  %v641_v12 = vpop.f32.mrf.mxu1  ;;  %v4600_v45 = vor.u32 %v5618_v40, %v4599_v37  ;;  %v4584_v6 = vor.u32 %v5614_v3, %v4583_v63  ;;  %v5632_v63 = vld [vmem:[%s7615_s6 + $0x18] sm:$0xff] }
  0xc5   : > { %669 = vst [vmem:[#allocation2 + $0x28] sm:$0xff] %v6419_v9  ;;  %1472 = vmatpush.bf16.msra.mxu2 %v4600_v45  ;;  %1492 = vmatpush.bf16.msra.mxu3 %v4588_v2 }
  0xc6   : > { %1697 = vmatpush.bf16.msrb.mxu0 %v5634_v58 }
  0xc8   : > { %v823_v26 = vpop.f32.mrf.mxu3 }
  0xc9   : > { %1473 = vmatpush.bf16.msra.mxu2 %v4592_v60  ;;  %v6529_v60 = vld [vmem:[%s7614_s5] sm:$0x3] }
  0xca   : > { %v659_v24 = vpop.f32.mrf.mxu2  ;;  %v882_v27 = vpop.f32.mrf.mxu0  ;;  %v6535_v62 = vperm.slane %v6529_v60, 1  ;;  %1698 = vmatpush.bf16.msrb.mxu0 %v5633_v61 }
  0xcb   : > { %v970_v28 = vpop.f32.mrf.mxu1  ;;  %v883_v8 = vadd.f32 %v882_v27, %v6375_v49  ;;  %v6502_v27 = vld [vmem:[%s7618_s9] ss:$0 sm:$0xff] }
  0xcd   : > { %1474 = vmatpush.bf16.msra.mxu2 %v4584_v6  ;;  %v979_v14 = vadd.f32 %v970_v28, %v883_v8 }
  0xce   : > { %1699 = vmatpush.bf16.msrb.mxu0 %v5632_v63 }
  0xd2   : > { %v1061_v38 = vpop.f32.mrf.mxu2  ;;  %v884_v41 = vpop.f32.mrf.mxu0 }
  0xd3   : > { %v1152_v43 = vpop.f32.mrf.mxu3  ;;  %v972_v46 = vpop.f32.mrf.mxu1  ;;  %v1070_v15 = vadd.f32 %v1061_v38, %v979_v14  ;;  %v885_v16 = vadd.f32 %v884_v41, %v6386_v56 }
  0xd5   : > { %v980_v20 = vadd.f32 %v972_v46, %v885_v16  ;;  %v1161_v21 = vadd.f32 %v1152_v43, %v1070_v15 }
  0xda   : > { %v1063_v1 = vpop.f32.mrf.mxu2  ;;  %v887_v4 = vpop.f32.mrf.mxu0 }
  0xdb   : > { %v1154_v5 = vpop.f32.mrf.mxu3  ;;  %v975_v7 = vpop.f32.mrf.mxu1  ;;  %v1071_v23 = vadd.f32 %v1063_v1, %v980_v20  ;;  %v888_v25 = vadd.f32 %v887_v4, %v6421_v0 }
  0xdd   : > { %v1162_v26 = vadd.f32 %v1154_v5, %v1071_v23  ;;  %v981_v29 = vadd.f32 %v975_v7, %v888_v25  ;;  %v5631_v5 = vld [vmem:[%s7615_s6 + $0x10] sm:$0xff]  ;;  %v5630_v7 = vld [vmem:[%s7615_s6 + $0x8] sm:$0xff] }
  0xde   : > { %1700 = vmatpush.bf16.msrb.mxu0 %v5631_v5 }
  0xe2   : > { %v1066_v10 = vpop.f32.mrf.mxu2  ;;  %v889_v11 = vpop.f32.mrf.mxu0  ;;  %1701 = vmatpush.bf16.msrb.mxu0 %v5630_v7 }
  0xe3   : > { %v1157_v12 = vpop.f32.mrf.mxu3  ;;  %v977_v13 = vpop.f32.mrf.mxu1  ;;  %v1072_v31 = vadd.f32 %v1066_v10, %v981_v29 }
  0xe5   : > { %v1163_v35 = vadd.f32 %v1157_v12, %v1072_v31 }
  0xea   : > { %v1068_v17 = vpop.f32.mrf.mxu2  ;;  %v1243_v18 = vpop.f32.mrf.mxu0 }
  0xeb   : > { %v1159_v19 = vpop.f32.mrf.mxu3  ;;  %v1334_v22 = vpop.f32.mrf.mxu1  ;;  %v1252_v24 = vadd.f32 %v1243_v18, %v1161_v21 }
  0xed   : > { %v1343_v49 = vadd.f32 %v1334_v22, %v1252_v24 }
  0xef   : > { %v1349_v32 = vadd.f32 %v6502_v27, %v1343_v49 }
  0xf1   : > { %v6506_v36 = vmax.f32 %v1349_v32, 0.0 }
  0xf2   : > { %v1245_v28 = vpop.f32.mrf.mxu0 }
  0xf3   : > { %v1253_v56 = vadd.f32 %v1245_v28, %v1162_v26  ;;  %v1336_v30 = vpop.f32.mrf.mxu1 }
  0xf5   : > { %v1344_v33 = vadd.f32 %v1336_v30, %v1253_v56 }
  0xf7   : > { %v1350_v34 = vadd.f32 %v6502_v27, %v1344_v33 }
  0xf9   : > { %v6508_v0 = vmax.f32 %v1350_v34, 0.0 }
  0xfa   : > { %v1248_v37 = vpop.f32.mrf.mxu0 }
  0xfb   : > { %v1254_v38 = vadd.f32 %v1248_v37, %v1163_v35  ;;  %v1339_v39 = vpop.f32.mrf.mxu1  ;;  %v1364_v40 = vpack.c.bf16 %v6508_v0, %v6506_v36 }
  0xfd   : > { %1475 = vmatmul.bf16.vlgmr.msra.gmra.mxu2 %v1364_v40  ;;  %1493 = vmatmul.bf16.vlgmr.msra.gmra.mxu3 %v1364_v40  ;;  %v1345_v41 = vadd.f32 %v1339_v39, %v1254_v38 }
  0xff   : > { %v1351_v45 = vadd.f32 %v6502_v27, %v1345_v41 }
 0x101   : > { %v6513_v48 = vmax.f32 %v1351_v45, 0.0 }
 0x102   : > { %v1250_v43 = vpop.f32.mrf.mxu0 }
 0x103   : > { %v1341_v46 = vpop.f32.mrf.mxu1  ;;  %v1365_v51 = vpack.c.bf16 %v6513_v48, %v6513_v48 }
 0x10d   : > { %1480 = vmatmul.bf16.gmra.mxu2 %v1365_v51  ;;  %1498 = vmatmul.bf16.gmra.mxu3 %v1365_v51 }
 0x180   : > { %v6540_v1 = vpop.f32.mrf.mxu2  ;;  %v1494_v2 = vpop.f32.mrf.mxu3 }
 0x181   : > { %v1495_v3 = vadd.f32 %v1494_v2, %v6535_v62 }
 0x183   : > { %v1504_v4 = vadd.f32 %v1495_v3, %v6369_v44  ;;  %v5629_v44 = vld [vmem:[%s7615_s6] sm:$0xff] }
 0x184   : > { %1702 = vmatpush.bf16.msrb.mxu0 %v5629_v44 }
 0x185   : > { %v4646_v6 = vmul.f32 -1.442695, %v1504_v4 }
 0x187   : > { %5818 = vpow2.f32 %v4646_v6 }
 0x188   : > { %v6550_v8 = vpop.f32.mrf.mxu2  ;;  %v1496_v10 = vpop.f32.mrf.mxu3 }
 0x189   : > { %v1497_v11 = vadd.f32 %v1496_v10, %v6535_v62 }
 0x18b   : > { %v1506_v12 = vadd.f32 %v1497_v11, %v6380_v52 }
 0x18d   : > { %v5819_v13 = vpop.eup %5818  ;;  %v4648_v14 = vmul.f32 -1.442695, %v1506_v12  ;;  %v6565_v12 = vperm.slane %v6529_v60, 0  ;;  %v5667_v60 = vld [vmem:[%s7617_s8 + $0xf0] sm:$0xff] }
 0x18e   : > { %v1528_v15 = vadd.f32 1.0, %v5819_v13 }
 0x18f   : > { %v1477_v13 = vadd.f32 %v6540_v1, %v6565_v12 }
 0x190   : > { %v6557_v16 = vpop.f32.mrf.mxu2  ;;  %v1499_v17 = vpop.f32.mrf.mxu3  ;;  %5820 = vrcp.f32 %v1528_v15  ;;  %v1559_v32 = vand.u32 2147483648, %v1528_v15  ;;  %vm1553_vm1 = vweird.f32 %v1528_v15  ;;  %v1557_v33 = vand.u32 2147483647, %v1528_v15 }
 0x191   : > { %v1500_v18 = vadd.f32 %v1499_v17, %v6535_v62  ;;  %5822 = vpow2.f32 %v4648_v14  ;;  %v1503_v14 = vadd.f32 %v1477_v13, %v6367_v42  ;;  %v1479_v17 = vadd.f32 %v6550_v8, %v6565_v12  ;;  %v5644_v8 = vld [vmem:[%s7617_s8 + $0x38] sm:$0xff]  ;;  %v5653_v13 = vld [vmem:[%s7617_s8 + $0x80] sm:$0xff] }
 0x192   : > { %v1560_v39 = vor.u32 1.1754944e-38, %v1559_v32  ;;  %vm1558_vm4 = vcmp.eq.f32.partialorder %v1557_v33, 8.507059e+37  ;;  %v1482_v42 = vadd.f32 %v6557_v16, %v6565_v12  ;;  %1893 = vmatpush.bf16.msrb.mxu2 %v5644_v8  ;;  %v5641_v32 = vld [vmem:[%s7617_s8 + $0x20] sm:$0xff] }
 0x193   : > { %v1508_v19 = vadd.f32 %v1500_v18, %v6391_v59  ;;  %v5668_v18 = vld [vmem:[%s7617_s8 + $0xf8] sm:$0xff]  ;;  %v5657_v33 = vld [vmem:[%s7617_s8 + $0xa0] sm:$0xff] }
 0x194   : > { %2070 = vmatpush.bf16.msra.mxu0 %v5668_v18  ;;  %v1507_v16 = vadd.f32 %v1482_v42, %v6388_v57  ;;  %v5665_v57 = vld [vmem:[%s7617_s8 + $0xe0] sm:$0xff] }
 0x195   : > { %v4650_v20 = vmul.f32 -1.442695, %v1508_v19  ;;  %v1505_v19 = vadd.f32 %v1479_v17, %v6377_v50  ;;  %v5660_v50 = vld [vmem:[%s7617_s8 + $0xb8] sm:$0xff] }
 0x196   : > { %v5821_v21 = vpop.eup %5820  ;;  %1980 = vmatpush.bf16.msrb.mxu3 %v5660_v50  ;;  %v5676_v50 = vld [vmem:[%s7617_s8 + $0x138] sm:$0xff] }
 0x197   : > { %v5823_v22 = vpop.eup %5822  ;;  %v1549_v23 = vmul.f32 %v5821_v21, %v1528_v15  ;;  %5824 = vpow2.f32 %v4650_v20  ;;  %vm1554_vm0 = vweird.f32 %v5821_v21  ;;  %v4645_v15 = vmul.f32 -1.442695, %v1503_v14  ;;  %v5652_v20 = vld [vmem:[%s7617_s8 + $0x78] sm:$0xff] }
 0x198   : > { %v1483_v24 = vpop.f32.mrf.mxu2  ;;  %v1501_v25 = vpop.f32.mrf.mxu3  ;;  %v1530_v52 = vadd.f32 1.0, %v5823_v22  ;;  %vm1555_vm2 = vmor %vm1553_vm1, %vm1554_vm0  ;;  %2071 = vmatpush.bf16.msra.mxu0 %v5667_v60  ;;  %v4647_v1 = vmul.f32 -1.442695, %v1505_v19  ;;  %v5666_v22 = vld [vmem:[%s7617_s8 + $0xe8] sm:$0xff]  ;;  %1827 = vmatpush.bf16.msrb.mxu1 %v5652_v20  ;;  %v5684_v20 = vld [vmem:[%s7617_s8 + $0x178] sm:$0xff] }
 0x199   : > { %v1550_v26 = vsub.f32 1.0, %v1549_v23  ;;  %v5643_v24 = vld [vmem:[%s7617_s8 + $0x30] sm:$0xff] }
 0x19a   : > { %5826 = vrcp.f32 %v1530_v52  ;;  %v1589_v34 = vand.u32 2147483648, %v1530_v52  ;;  %v1587_v38 = vand.u32 2147483647, %v1530_v52  ;;  %vm1583_vm5 = vweird.f32 %v1530_v52  ;;  %v5651_v25 = vld [vmem:[%s7617_s8 + $0x70] sm:$0xff]  ;;  %1894 = vmatpush.bf16.msrb.mxu2 %v5643_v24 }
 0x19b   : > { %v1551_v49 = vmul.f32 %v5821_v21, %v1550_v26  ;;  %v4649_v26 = vmul.f32 -1.442695, %v1507_v16  ;;  %v5675_v24 = vld [vmem:[%s7617_s8 + $0x130] sm:$0xff] }
 0x19c   : > { %v1590_v45 = vor.u32 1.1754944e-38, %v1589_v34  ;;  %vm1588_vm7 = vcmp.eq.f32.partialorder %v1587_v38, 8.507059e+37  ;;  %2072 = vmatpush.bf16.msra.mxu0 %v5666_v22  ;;  %1828 = vmatpush.bf16.msrb.mxu1 %v5651_v25  ;;  %v5663_v34 = vld [vmem:[%s7617_s8 + $0xd0] sm:$0xff] }
 0x19d   : > { %v5825_v28 = vpop.eup %5824  ;;  %v1552_v31 = vadd.f32 %v5821_v21, %v1551_v49  ;;  %v5642_v49 = vld [vmem:[%s7617_s8 + $0x28] sm:$0xff] }
 0x19e   : > { %v1532_v29 = vadd.f32 1.0, %v5825_v28  ;;  %v5650_v28 = vld [vmem:[%s7617_s8 + $0x68] sm:$0xff]  ;;  %1895 = vmatpush.bf16.msrb.mxu2 %v5642_v49 }
 0x19f   : > { %v1556_v35 = vsel %vm1555_vm2, %v5821_v21, %v1552_v31 }
 0x1a0   : > { %v5827_v56 = vpop.eup %5826  ;;  %5828 = vrcp.f32 %v1532_v29  ;;  %v1561_v43 = vsel %vm1558_vm4, %v1560_v39, %v1556_v35  ;;  %v1619_v4 = vand.u32 2147483648, %v1532_v29  ;;  %vm1613_vm9 = vweird.f32 %v1532_v29  ;;  %2073 = vmatpush.bf16.msra.mxu0 %v5665_v57  ;;  %1829 = vmatpush.bf16.msrb.mxu1 %v5650_v28  ;;  %v5640_v39 = vld [vmem:[%s7617_s8 + $0x18] sm:$0xff] }
 0x1a1   : > { %v1579_v30 = vmul.f32 %v5827_v56, %v1530_v52  ;;  %vm1584_vm3 = vweird.f32 %v5827_v56  ;;  %v1623_v58 = vmul.f32 %v1561_v43, %v6506_v36  ;;  %v1617_v5 = vand.u32 2147483647, %v1532_v29  ;;  %v5659_v52 = vld [vmem:[%s7617_s8 + $0xb0] sm:$0xff]  ;;  %v5662_v43 = vld [vmem:[%s7617_s8 + $0xc8] sm:$0xff] }
 0x1a2   : > { %vm1585_vm6 = vmor %vm1583_vm5, %vm1584_vm3  ;;  %v1620_v7 = vor.u32 1.1754944e-38, %v1619_v4  ;;  %5830 = vpow2.f32 %v4645_v15  ;;  %1981 = vmatpush.bf16.msrb.mxu3 %v5659_v52  ;;  %1896 = vmatpush.bf16.msrb.mxu2 %v5641_v32  ;;  %v5646_v4 = vld [vmem:[%s7617_s8 + $0x48] sm:$0xff]  ;;  %v5691_v52 = vld [vmem:[%s7617_s8 + $0x1b0] sm:$0xff] }
 0x1a3   : > { %v1580_v59 = vsub.f32 1.0, %v1579_v30  ;;  %vm1618_vm11 = vcmp.eq.f32.partialorder %v1617_v5, 8.507059e+37  ;;  %5832 = vpow2.f32 %v4647_v1  ;;  %v5664_v30 = vld [vmem:[%s7617_s8 + $0xd8] sm:$0xff]  ;;  %v5654_v5 = vld [vmem:[%s7617_s8 + $0x88] sm:$0xff] }
 0x1a4   : > { %2074 = vmatpush.bf16.msra.mxu0 %v5664_v30  ;;  %v5674_v30 = vld [vmem:[%s7617_s8 + $0x128] sm:$0xff] }
 0x1a5   : > { %v1581_v37 = vmul.f32 %v5827_v56, %v1580_v59  ;;  %v5649_v59 = vld [vmem:[%s7617_s8 + $0x60] sm:$0xff] }
 0x1a6   : > { %v5829_v40 = vpop.eup %5828  ;;  %1830 = vmatpush.bf16.msrb.mxu1 %v5649_v59  ;;  %1897 = vmatpush.bf16.msrb.mxu2 %v5640_v39 }
 0x1a7   : > { %v1582_v41 = vadd.f32 %v5827_v56, %v1581_v37  ;;  %v1609_v46 = vmul.f32 %v5829_v40, %v1532_v29  ;;  %vm1614_vm8 = vweird.f32 %v5829_v40  ;;  %v5658_v29 = vld [vmem:[%s7617_s8 + $0xa8] sm:$0xff] }
 0x1a8   : > { %vm1615_vm10 = vmor %vm1613_vm9, %vm1614_vm8  ;;  %v5831_v21 = vpop.eup %5830  ;;  %1982 = vmatpush.bf16.msrb.mxu3 %v5658_v29  ;;  %2075 = vmatpush.bf16.msra.mxu0 %v5663_v34  ;;  %vm2519_vm9 = vcmask 1040384  }
 0x1a9   : > { %v1586_v51 = vsel %vm1585_vm6, %v5827_v56, %v1582_v41  ;;  %v1610_v55 = vsub.f32 1.0, %v1609_v46  ;;  %v6594_v23 = vadd.f32 1.0, %v5831_v21  ;;  %v5833_v56 = vpop.eup %5832  ;;  %v5656_v41 = vld [vmem:[%s7617_s8 + $0x98] sm:$0xff] }
 0x1aa   : > { %v1591_v53 = vsel %vm1588_vm7, %v1590_v45, %v1586_v51  ;;  %v6621_v31 = vadd.f32 1.0, %v5833_v56  ;;  %v5639_v51 = vld [vmem:[%s7617_s8 + $0x10] sm:$0xff]  ;;  %v5692_v21 = vld [vmem:[%s7617_s8 + $0x1b8] sm:$0xff]  ;;  %v5682_v56 = vld [vmem:[%s7617_s8 + $0x168] sm:$0xff] }
 0x1ab   : > { %v1624_v61 = vmul.f32 %v1591_v53, %v6508_v0  ;;  %v1611_v63 = vmul.f32 %v5829_v40, %v1610_v55  ;;  %5834 = vrcp.f32 %v6594_v23  ;;  %v5647_v53 = vld [vmem:[%s7617_s8 + $0x50] sm:$0xff]  ;;  %1898 = vmatpush.bf16.msrb.mxu2 %v5639_v51  ;;  %v1544_v15 = vand.u32 2147483648, %v6594_v23 }
 0x1ac   : > { %5836 = vpow2.f32 %v4649_v26  ;;  %1983 = vmatpush.bf16.msrb.mxu3 %v5657_v33  ;;  %2076 = vmatpush.bf16.msra.mxu0 %v5662_v43  ;;  %v5655_v55 = vld [vmem:[%s7617_s8 + $0x90] sm:$0xff]  ;;  %vm1538_vm13 = vweird.f32 %v6594_v23  ;;  %v1542_v17 = vand.u32 2147483647, %v6594_v23  ;;  %v1574_v26 = vand.u32 2147483648, %v6621_v31  ;;  %v5673_v43 = vld [vmem:[%s7617_s8 + $0x120] sm:$0xff] }
 0x1ad   : > { %v1626_v2 = vpack.c.bf16 %v1624_v61, %v1623_v58  ;;  %v1612_v3 = vadd.f32 %v5829_v40, %v1611_v63  ;;  %5838 = vrcp.f32 %v6621_v31  ;;  %v5661_v61 = vld [vmem:[%s7617_s8 + $0xc0] sm:$0xff]  ;;  %v1545_v22 = vor.u32 1.1754944e-38, %v1544_v15 }
 0x1ae   : > { %vm1543_vm15 = vcmp.eq.f32.partialorder %v1542_v17, 8.507059e+37  ;;  %vm1568_vm1 = vweird.f32 %v6621_v31  ;;  %v1572_v28 = vand.u32 2147483647, %v6621_v31  ;;  %v675_v51 = vlaneseq }
 0x1af   : > { %1703 = vmatmul.bf16.vlgmr.msrb.gmra.mxu0 %v1626_v2  ;;  %v1616_v6 = vsel %vm1615_vm10, %v5829_v40, %v1612_v3  ;;  %v5648_v40 = vld [vmem:[%s7617_s8 + $0x58] sm:$0xff]  ;;  %v5638_v3 = vld [vmem:[%s7617_s8 + $0x8] sm:$0xff] }
 0x1b0   : > { %v1621_v10 = vsel %vm1618_vm11, %v1620_v7, %v1616_v6  ;;  %1831 = vmatpush.bf16.msrb.mxu1 %v5648_v40  ;;  %1984 = vmatpush.bf16.msrb.mxu3 %v5656_v41  ;;  %v6684_v6 = vld [vmem:[%s7616_s7] ss:$0 sm:$0xff]  ;;  %vm1573_vm3 = vcmp.eq.f32.partialorder %v1572_v28, 8.507059e+37 }
 0x1b1   : > { %v1625_v11 = vmul.f32 %v1621_v10, %v6513_v48  ;;  %v6635_v35 = vpop.eup %5834  ;;  %2077 = vmatpush.bf16.msra.mxu0 %v5661_v61  ;;  %1899 = vmatpush.bf16.msrb.mxu2 %v5638_v3  ;;  %v5681_v41 = vld [vmem:[%s7617_s8 + $0x160] sm:$0xff] }
 0x1b2   : > { %v5837_v37 = vpop.eup %5836  ;;  %v1534_v38 = vmul.f32 %v6635_v35, %v6594_v23  ;;  %vm1539_vm12 = vweird.f32 %v6635_v35  ;;  %v5683_v23 = vld [vmem:[%s7617_s8 + $0x170] sm:$0xff] }
 0x1b3   : > { %v1627_v44 = vpack.c.bf16 %v1625_v11, %v1625_v11  ;;  %v6652_v45 = vadd.f32 1.0, %v5837_v37  ;;  %v6663_v58 = vpop.eup %5838  ;;  %v5637_v11 = vld [vmem:[%s7617_s8] sm:$0xff]  ;;  %vm6702_vm14 = vmor %vm1538_vm13, %vm1539_vm12  ;;  %v1575_v37 = vor.u32 1.1754944e-38, %v1574_v26 }
 0x1b4   : > { %v1535_v46 = vsub.f32 1.0, %v1534_v38  ;;  %1832 = vmatpush.bf16.msrb.mxu1 %v5647_v53  ;;  %1985 = vmatpush.bf16.msrb.mxu3 %v5655_v55  ;;  %v1564_v63 = vmul.f32 %v6663_v58, %v6621_v31  ;;  %vm1569_vm0 = vweird.f32 %v6663_v58  ;;  %v5690_v31 = vld [vmem:[%s7617_s8 + $0x1a8] sm:$0xff] }
 0x1b5   : > { %5840 = vrcp.f32 %v6652_v45  ;;  %1900 = vmatpush.bf16.msrb.mxu2 %v5637_v11  ;;  %vm6743_vm2 = vmor %vm1568_vm1, %vm1569_vm0  ;;  %v1604_v55 = vand.u32 2147483648, %v6652_v45  ;;  %vm1598_vm5 = vweird.f32 %v6652_v45  ;;  %v1602_v61 = vand.u32 2147483647, %v6652_v45 }
 0x1b6   : > { %v1536_v2 = vmul.f32 %v6635_v35, %v1535_v46  ;;  %v1565_v7 = vsub.f32 1.0, %v1564_v63 }
 0x1b7   : > { %vm1603_vm7 = vcmp.eq.f32.partialorder %v1602_v61, 8.507059e+37 }
 0x1b8   : > { %1833 = vmatpush.bf16.msrb.mxu1 %v5646_v4  ;;  %1986 = vmatpush.bf16.msrb.mxu3 %v5654_v5  ;;  %v1537_v10 = vadd.f32 %v6635_v35, %v1536_v2  ;;  %v1566_v8 = vmul.f32 %v6663_v58, %v1565_v7  ;;  %v676_v4 = vshrl.u32 %v675_v51, 7  ;;  %v5680_v7 = vld [vmem:[%s7617_s8 + $0x158] sm:$0xff] }
 0x1b9   : > { %2250 = vmatpush.bf16.msra.mxu2 %v5684_v20  ;;  %v5678_v20 = vld [vmem:[%s7617_s8 + $0x148] sm:$0xff] }
 0x1ba   : > { %v1541_v42 = vsel %vm6702_vm14, %v6635_v35, %v1537_v10  ;;  %v5688_v10 = vld [vmem:[%s7617_s8 + $0x198] sm:$0xff] }
 0x1bb   : > { %v6697_v14 = vpop.eup %5840  ;;  %v1546_v25 = vsel %vm1543_vm15, %v1545_v22, %v1541_v42 }
 0x1bc   : > { %1987 = vmatpush.bf16.msrb.mxu3 %v5653_v13  ;;  %v1594_v1 = vmul.f32 %v6697_v14, %v6652_v45  ;;  %v1719_v49 = vsub.f32 1.0, %v1546_v25  ;;  %vm1599_vm4 = vweird.f32 %v6697_v14  ;;  %v5672_v45 = vld [vmem:[%s7617_s8 + $0x118] sm:$0xff] }
 0x1bd   : > { %2251 = vmatpush.bf16.msra.mxu2 %v5683_v23  ;;  %vm6771_vm6 = vmor %vm1598_vm5, %vm1599_vm4  ;;  %vm2702_vm5 = vcmask 1046528  }
 0x1be   : > { %v1595_v57 = vsub.f32 1.0, %v1594_v1  ;;  %v1722_v39 = vmul.f32 %v1719_v49, %v6506_v36 }
 0x1bf   : > { %1708 = vmatmul.bf16.gmra.mxu0 %v1627_v44  ;;  %v5645_v44 = vld [vmem:[%s7617_s8 + $0x40] sm:$0xff] }
 0x1c0   : > { %1834 = vmatpush.bf16.msrb.mxu1 %v5645_v44  ;;  %2340 = vmatpush.bf16.msra.mxu3 %v5692_v21  ;;  %v1596_v34 = vmul.f32 %v6697_v14, %v1595_v57  ;;  %v1605_v44 = vor.u32 1.1754944e-38, %v1604_v55  ;;  %v5686_v21 = vld [vmem:[%s7617_s8 + $0x188] sm:$0xff]  ;;  %v5669_v57 = vld [vmem:[%s7617_s8 + $0x100] sm:$0xff] }
 0x1c1   : > { %2252 = vmatpush.bf16.msra.mxu2 %v5682_v56 }
 0x1c2   : > { %v1597_v53 = vadd.f32 %v6697_v14, %v1596_v34 }
 0x1c4   : > { %2160 = vmatpush.bf16.msra.mxu1 %v5676_v50  ;;  %2341 = vmatpush.bf16.msra.mxu3 %v5691_v52  ;;  %v1601_v5 = vsel %vm6771_vm6, %v6697_v14, %v1597_v53  ;;  %v5679_v14 = vld [vmem:[%s7617_s8 + $0x150] sm:$0xff]  ;;  %v5670_v50 = vld [vmem:[%s7617_s8 + $0x108] sm:$0xff] }
 0x1c5   : > { %2253 = vmatpush.bf16.msra.mxu2 %v5681_v41  ;;  %v1606_v19 = vsel %vm1603_vm7, %v1605_v44, %v1601_v5  ;;  %v5061_v44 = vld [vmem:[%s7613_s4 + $0x70] sm:$0xf] }
 0x1c6   : > { %v1721_v1 = vsub.f32 1.0, %v1606_v19 }
 0x1c8   : > { %2161 = vmatpush.bf16.msra.mxu1 %v5675_v24  ;;  %2342 = vmatpush.bf16.msra.mxu3 %v5690_v31  ;;  %v5677_v24 = vld [vmem:[%s7617_s8 + $0x140] sm:$0xff] }
 0x1c9   : > { %2254 = vmatpush.bf16.msra.mxu2 %v5680_v7 }
 0x1cc   : > { %2162 = vmatpush.bf16.msra.mxu1 %v5674_v30 }
 0x1cd   : > { %2255 = vmatpush.bf16.msra.mxu2 %v5679_v14  ;;  %v5055_v14 = vld [vmem:[%s7613_s4 + $0x68] sm:$0xf0] }
 0x1d0   : > { %2163 = vmatpush.bf16.msra.mxu1 %v5673_v43 }
 0x1d1   : > { %2256 = vmatpush.bf16.msra.mxu2 %v5678_v20  ;;  %v5703_v20 = vld [vmem:[%s7613_s4 + $0x54] sm:$0xf] }
 0x1d4   : > { %2164 = vmatpush.bf16.msra.mxu1 %v5672_v45 }
 0x1d5   : > { %2257 = vmatpush.bf16.msra.mxu2 %v5677_v24  ;;  %v5039_v24 = vld [vmem:[%s7613_s4 + $0x48] sm:$0xf0] }
 0x22c   : > { %v1704_v18 = vpop.f32.mrf.mxu0 }
 0x22d   : > { %v1705_v60 = vadd.f32 %v6684_v6, %v1704_v18  ;;  %v5671_v18 = vld [vmem:[%s7617_s8 + $0x110] sm:$0xff] }
 0x22e   : > { %2165 = vmatpush.bf16.msra.mxu1 %v5671_v18 }
 0x22f   : > { %v1713_v16 = vadd.f32 %v1705_v60, %v6373_v47  ;;  %v1567_v47 = vadd.f32 %v6663_v58, %v1566_v8  ;;  %v6799_v60 = vadd.s32 16, %v676_v4 }
 0x231   : > { %5842 = vtanh.f32 %v1713_v16  ;;  %v1571_v33 = vsel %vm6743_vm2, %v6663_v58, %v1567_v47  ;;  %vm681_vm8 = vcmp.lt.s32.totalorder %v6799_v60, 23  ;;  %v1724_v16 = vmul.f32 %v1721_v1, %v6513_v48  ;;  %v5685_v47 = vld [vmem:[%s7617_s8 + $0x180] sm:$0xff] }
 0x232   : > { %v1576_v46 = vsel %vm1573_vm3, %v1575_v37, %v1571_v33  ;;  %2166 = vmatpush.bf16.msra.mxu1 %v5670_v50  ;;  %v5047_v50 = vld [vmem:[%s7613_s4 + $0x58] sm:$0xf0] }
 0x233   : > { %v1720_v58 = vsub.f32 1.0, %v1576_v46 }
 0x234   : > { %v1706_v29 = vpop.f32.mrf.mxu0 }
 0x235   : > { %v1707_v59 = vadd.f32 %v6684_v6, %v1706_v29  ;;  %v1723_v15 = vmul.f32 %v1720_v58, %v6508_v0 }
 0x236   : > { %2167 = vmatpush.bf16.msra.mxu1 %v5669_v57  ;;  %v5037_v57 = vld [vmem:[%s7613_s4 + $0x40] sm:$0xf] }
 0x237   : > { %v5843_v35 = vpop.eup %5842  ;;  %v1714_v38 = vadd.f32 %v1707_v59, %v6384_v54  ;;  %v5689_v54 = vld [vmem:[%s7617_s8 + $0x1a0] sm:$0xff] }
 0x238   : > { %v1725_v40 = vmul.f32 %v5843_v35, %v1546_v25  ;;  %2343 = vmatpush.bf16.msra.mxu3 %v5689_v54  ;;  %v5928_v25 = vld [vmem:[#allocation3] sm:$0xff] }
 0x239   : > { %5844 = vtanh.f32 %v1714_v38  ;;  %v4258_v52 = vsel %vm681_vm8, 1.0, %v5928_v25 }
 0x23a   : > { %v1728_v36 = vadd.f32 %v1725_v40, %v1722_v39 }
 0x23c   : > { %1734 = vst [vmem:[#allocation3 + $0x8] sm:$0xff] %v1728_v36  ;;  %v1709_v63 = vpop.f32.mrf.mxu0  ;;  %2344 = vmatpush.bf16.msra.mxu3 %v5688_v10  ;;  %v5707_v10 = vld [vmem:[%s7613_s4 + $0x74] sm:$0xf] }
 0x23d   : > { %v1710_v3 = vadd.f32 %v6684_v6, %v1709_v63 }
 0x23f   : > { %v5845_v11 = vpop.eup %5844  ;;  %v1715_v13 = vadd.f32 %v1710_v3, %v6419_v9  ;;  %v5687_v9 = vld [vmem:[%s7617_s8 + $0x190] sm:$0xff] }
 0x240   : > { %v1726_v17 = vmul.f32 %v5845_v11, %v1576_v46  ;;  %2345 = vmatpush.bf16.msra.mxu3 %v5687_v9  ;;  %v5063_v11 = vld [vmem:[%s7613_s4 + $0x78] sm:$0xf0]  ;;  %v5053_v9 = vld [vmem:[%s7613_s4 + $0x60] sm:$0xf] }
 0x241   : > { %5846 = vtanh.f32 %v1715_v13  ;;  %v5066_v13 = vor.u32 %v5707_v10, %v5063_v11 }
 0x242   : > { %v1729_v0 = vadd.f32 %v1726_v17, %v1723_v15  ;;  %v5708_v15 = vld [vmem:[%s7613_s4 + $0x74] sm:$0xf0]  ;;  %v5705_v17 = vld [vmem:[%s7613_s4 + $0x64] sm:$0xf] }
 0x243   : > { %v1758_v48 = vld [vmem:[#allocation3 + $0x6] sm:$0xff]  ;;  %v5062_v18 = vor.u32 %v5708_v15, %v5061_v44 }
 0x244   : > { %1735 = vst [vmem:[#allocation3 + $0x10] sm:$0xff] %v1729_v0  ;;  %v1711_v42 = vpop.f32.mrf.mxu0  ;;  %v2004_v8 = vpack.c.bf16 %v1729_v0, %v1728_v36  ;;  %2346 = vmatpush.bf16.msra.mxu3 %v5686_v21  ;;  %v1737_v49 = vld [vmem:[#allocation3 + $0x5] sm:$0xff]  ;;  %v5045_v21 = vld [vmem:[%s7613_s4 + $0x50] sm:$0xf] }
 0x245   : > { %v1911_v28 = vld [vmem:[#allocation3 + $0x7] sm:$0xff]  ;;  %2477 = vmatpush.bf16.msrb.mxu0 %v5062_v18 }
 0x246   : > { %2078 = vmatmul.bf16.vlgmr.msra.gmra.mxu0 %v2004_v8  ;;  %v5706_v0 = vld [vmem:[%s7613_s4 + $0x64] sm:$0xf0] }
 0x247   : > { %v5847_v22 = vpop.eup %5846  ;;  %v5054_v1 = vor.u32 %v5706_v0, %v5053_v9 }
 0x248   : > { %v1727_v23 = vmul.f32 %v5847_v22, %v1606_v19  ;;  %2347 = vmatpush.bf16.msra.mxu3 %v5685_v47  ;;  %v5058_v19 = vor.u32 %v5705_v17, %v5055_v14  ;;  %v5050_v22 = vor.u32 %v5703_v20, %v5047_v50  ;;  %v5702_v47 = vld [vmem:[%s7613_s4 + $0x44] sm:$0xf0] }
 0x249   : > { %2478 = vmatpush.bf16.msrb.mxu0 %v5054_v1 }
 0x24a   : > { %v1730_v26 = vadd.f32 %v1727_v23, %v1724_v16  ;;  %v5704_v16 = vld [vmem:[%s7613_s4 + $0x54] sm:$0xf0]  ;;  %v5701_v23 = vld [vmem:[%s7613_s4 + $0x44] sm:$0xf] }
 0x24b   : > { %v1759_v29 = vld [vmem:[#allocation3 + $0xe] sm:$0xff]  ;;  %v5046_v25 = vor.u32 %v5704_v16, %v5045_v21 }
 0x24c   : > { %v1738_v56 = vld [vmem:[#allocation3 + $0xd] sm:$0xff]  ;;  %v1733_v32 = vmul.f32 %v4258_v52, %v1730_v26  ;;  %v1761_v59 = vpack.c.bf16 %v1759_v29, %v1758_v48  ;;  %v5042_v52 = vor.u32 %v5701_v23, %v5039_v24  ;;  %v5038_v48 = vor.u32 %v5702_v47, %v5037_v57 }
 0x24d   : > { %v1912_v30 = vld [vmem:[#allocation3 + $0xf] sm:$0xff]  ;;  %v1740_v31 = vpack.c.bf16 %v1738_v56, %v1737_v49  ;;  %2479 = vmatpush.bf16.msrb.mxu0 %v5046_v25 }
 0x24e   : > { %v1914_v33 = vpack.c.bf16 %v1912_v30, %v1911_v28  ;;  %1736 = vst [vmem:[#allocation3 + $0x18] sm:$0xff] %v1733_v32  ;;  %1835 = vmatmul.bf16.vlgmr.msrb.gmra.mxu1 %v1761_v59  ;;  %v2005_v34 = vpack.c.bf16 %v1733_v32, %v1733_v32  ;;  %v2091_v36 = vld [vmem:[#allocation3 + $0x9] sm:$0xff]  ;;  %v5699_v56 = vld [vmem:[%s7613_s4 + $0x34] sm:$0xf]  ;;  %v5031_v30 = vld [vmem:[%s7613_s4 + $0x38] sm:$0xf0] }
 0x24f   : > { %1901 = vmatmul.bf16.vlgmr.msrb.gmra.mxu2 %v1740_v31  ;;  %v2181_v51 = vld [vmem:[#allocation3 + $0xa] sm:$0xff]  ;;  %2495 = vmatpush.bf16.msrb.mxu1 %v5066_v13  ;;  %v5034_v59 = vor.u32 %v5699_v56, %v5031_v30  ;;  %v5700_v31 = vld [vmem:[%s7613_s4 + $0x34] sm:$0xf0] }
 0x250   : > { %1988 = vmatmul.bf16.vlgmr.msrb.gmra.mxu3 %v1914_v33  ;;  %v2271_v58 = vld [vmem:[#allocation3 + $0xb] sm:$0xff] }
 0x251   : > { %2480 = vmatpush.bf16.msrb.mxu0 %v5038_v48  ;;  %v5029_v32 = vld [vmem:[%s7613_s4 + $0x30] sm:$0xf] }
 0x252   : > { %v5030_v33 = vor.u32 %v5700_v31, %v5029_v32 }
 0x253   : > { %2496 = vmatpush.bf16.msrb.mxu1 %v5058_v19 }
 0x255   : > { %v1760_v35 = vld [vmem:[#allocation3 + $0x16] sm:$0xff]  ;;  %2481 = vmatpush.bf16.msrb.mxu0 %v5030_v33 }
 0x256   : > { %2083 = vmatmul.bf16.gmra.mxu0 %v2005_v34  ;;  %v1739_v37 = vld [vmem:[#allocation3 + $0x15] sm:$0xff]  ;;  %v1762_v39 = vpack.c.bf16 %v1760_v35, %v1760_v35  ;;  %v5697_v34 = vld [vmem:[%s7613_s4 + $0x24] sm:$0xf]  ;;  %v5023_v35 = vld [vmem:[%s7613_s4 + $0x28] sm:$0xf0] }
 0x257   : > { %v1913_v38 = vld [vmem:[#allocation3 + $0x17] sm:$0xff]  ;;  %v1741_v40 = vpack.c.bf16 %v1739_v37, %v1739_v37  ;;  %2497 = vmatpush.bf16.msrb.mxu1 %v5050_v22  ;;  %v5021_v37 = vld [vmem:[%s7613_s4 + $0x20] sm:$0xf] }
 0x258   : > { %v1915_v41 = vpack.c.bf16 %v1913_v38, %v1913_v38  ;;  %v2092_v43 = vld [vmem:[#allocation3 + $0x11] sm:$0xff]  ;;  %v2093_v63 = vld [vmem:[#allocation3 + $0x19] sm:$0xff] }
 0x259   : > { %v2182_v46 = vld [vmem:[#allocation3 + $0x12] sm:$0xff]  ;;  %v2094_v53 = vpack.c.bf16 %v2092_v43, %v2091_v36  ;;  %v2183_v2 = vld [vmem:[#allocation3 + $0x1a] sm:$0xff]  ;;  %v2095_v4 = vpack.c.bf16 %v2093_v63, %v2093_v63  ;;  %v5693_v63 = vld [vmem:[%s7613_s4 + $0x4] sm:$0xf] }
 0x25a   : > { %v2272_v54 = vld [vmem:[#allocation3 + $0x13] sm:$0xff]  ;;  %v2184_v55 = vpack.c.bf16 %v2182_v46, %v2181_v51  ;;  %v2273_v3 = vld [vmem:[#allocation3 + $0x1b] sm:$0xff]  ;;  %v2185_v5 = vpack.c.bf16 %v2183_v2, %v2183_v2  ;;  %v5007_v2 = vld [vmem:[%s7613_s4 + $0x8] sm:$0xf0] }
 0x25b   : > { %v2274_v61 = vpack.c.bf16 %v2272_v54, %v2271_v58  ;;  %v2275_v7 = vpack.c.bf16 %v2273_v3, %v2273_v3  ;;  %2498 = vmatpush.bf16.msrb.mxu1 %v5042_v52  ;;  %v5695_v36 = vld [vmem:[%s7613_s4 + $0x14] sm:$0xf]  ;;  %v5015_v51 = vld [vmem:[%s7613_s4 + $0x18] sm:$0xf0]  ;;  %v5696_v58 = vld [vmem:[%s7613_s4 + $0x14] sm:$0xf0] }
 0x25e   : > { %1840 = vmatmul.bf16.gmra.mxu1 %v1762_v39  ;;  %v5026_v39 = vor.u32 %v5697_v34, %v5023_v35 }
 0x25f   : > { %1906 = vmatmul.bf16.gmra.mxu2 %v1741_v40  ;;  %2499 = vmatpush.bf16.msrb.mxu1 %v5034_v59  ;;  %v5698_v40 = vld [vmem:[%s7613_s4 + $0x24] sm:$0xf0] }
 0x260   : > { %1993 = vmatmul.bf16.gmra.mxu3 %v1915_v41  ;;  %v5022_v43 = vor.u32 %v5698_v40, %v5021_v37 }
 0x262   : > { %2482 = vmatpush.bf16.msrb.mxu0 %v5022_v43 }
 0x263   : > { %2500 = vmatpush.bf16.msrb.mxu1 %v5026_v39 }
 0x26e   : > { %2168 = vmatmul.bf16.vlgmr.msra.gmra.mxu1 %v2094_v53  ;;  %v5013_v53 = vld [vmem:[%s7613_s4 + $0x10] sm:$0xf] }
 0x26f   : > { %2258 = vmatmul.bf16.vlgmr.msra.gmra.mxu2 %v2184_v55  ;;  %v5018_v55 = vor.u32 %v5695_v36, %v5015_v51  ;;  %v2368_v51 = vld [vmem:[#allocation2] sm:$0xfe] }
 0x270   : > { %2348 = vmatmul.bf16.vlgmr.msra.gmra.mxu3 %v2274_v61  ;;  %v5014_v61 = vor.u32 %v5696_v58, %v5013_v53 }
 0x271   : > { %2501 = vmatpush.bf16.msrb.mxu1 %v5018_v55  ;;  %v5714_v55 = vld [vmem:[%s7615_s6 + $0x28] sm:$0xff] }
 0x272   : > { %2483 = vmatpush.bf16.msrb.mxu0 %v5014_v61 }
 0x27e   : > { %2173 = vmatmul.bf16.gmra.mxu1 %v2095_v4  ;;  %v5010_v4 = vor.u32 %v5693_v63, %v5007_v2 }
 0x27f   : > { %2263 = vmatmul.bf16.gmra.mxu2 %v2185_v5  ;;  %v5005_v5 = vld [vmem:[%s7613_s4] sm:$0xf] }
 0x280   : > { %2353 = vmatmul.bf16.gmra.mxu3 %v2275_v7  ;;  %v5694_v7 = vld [vmem:[%s7613_s4 + $0x4] sm:$0xf0]  ;;  %2502 = vmatpush.bf16.msrb.mxu1 %v5010_v4 }
 0x281   : > { %v5006_v11 = vor.u32 %v5694_v7, %v5005_v5  ;;  %v5713_v5 = vld [vmem:[%s7615_s6 + $0x20] sm:$0xff] }
 0x283   : > { %2484 = vmatpush.bf16.msrb.mxu0 %v5006_v11 }
 0x2c3   : > { %v6821_v45 = vpop.f32.mrf.mxu0 }
 0x2cb   : > { %v6847_v42 = vpop.f32.mrf.mxu1  ;;  %v6849_v8 = vpop.f32.mrf.mxu0 }
 0x2d2   : > { %v1902_v26 = vpop.f32.mrf.mxu2 }
 0x2d3   : > { %v1989_v49 = vpop.f32.mrf.mxu3  ;;  %v1838_v28 = vpop.f32.mrf.mxu1  ;;  %v1903_v13 = vadd.f32 %v1902_v26, %v6847_v42 }
 0x2d4   : > { %v6875_v29 = vpop.f32.mrf.mxu0 }
 0x2d5   : > { %v1998_v18 = vadd.f32 %v1989_v49, %v1903_v13  ;;  %v2370_v13 = vld [vmem:[#allocation2 + $0x50] sm:$0xff] }
 0x2d7   : > { %v2088_v9 = vadd.f32 %v6821_v45, %v1998_v18  ;;  %v5711_v18 = vld [vmem:[%s7615_s6 + $0x10] sm:$0xff] }
 0x2da   : > { %v1904_v38 = vpop.f32.mrf.mxu2 }
 0x2db   : > { %v1991_v41 = vpop.f32.mrf.mxu3  ;;  %v1841_v46 = vpop.f32.mrf.mxu1  ;;  %v1905_v19 = vadd.f32 %v1904_v38, %v1838_v28 }
 0x2dc   : > { %v2086_v54 = vpop.f32.mrf.mxu0 }
 0x2dd   : > { %v1999_v1 = vadd.f32 %v1991_v41, %v1905_v19  ;;  %v5716_v41 = vld [vmem:[%s7615_s6 + $0x38] sm:$0xff] }
 0x2de   : > { %2782 = vmatpush.bf16.msrb.mxu2 %v5716_v41 }
 0x2df   : > { %v2089_v23 = vadd.f32 %v6849_v8, %v1999_v1 }
 0x2e2   : > { %v1907_v3 = vpop.f32.mrf.mxu2 }
 0x2e3   : > { %v1994_v10 = vpop.f32.mrf.mxu3  ;;  %v1843_v44 = vpop.f32.mrf.mxu1  ;;  %v1908_v16 = vadd.f32 %v1907_v3, %v1841_v46 }
 0x2e5   : > { %v2000_v42 = vadd.f32 %v1994_v10, %v1908_v16  ;;  %v2374_v16 = vld [vmem:[#allocation2 + $0x10] sm:$0x1] }
 0x2e7   : > { %v2090_v28 = vadd.f32 %v6875_v29, %v2000_v42 }
 0x2ea   : > { %v1909_v15 = vpop.f32.mrf.mxu2 }
 0x2eb   : > { %v1996_v17 = vpop.f32.mrf.mxu3  ;;  %v2169_v14 = vpop.f32.mrf.mxu1 }
 0x2ec   : > { %v2178_v20 = vadd.f32 %v2169_v14, %v2088_v9  ;;  %v5712_v17 = vld [vmem:[%s7615_s6 + $0x18] sm:$0xff] }
 0x2f2   : > { %v2259_v0 = vpop.f32.mrf.mxu2 }
 0x2f3   : > { %v2349_v50 = vpop.f32.mrf.mxu3  ;;  %v2171_v21 = vpop.f32.mrf.mxu1  ;;  %v2268_v22 = vadd.f32 %v2259_v0, %v2178_v20 }
 0x2f4   : > { %v2179_v25 = vadd.f32 %v2171_v21, %v2089_v23  ;;  %v5710_v23 = vld [vmem:[%s7615_s6 + $0x8] sm:$0xff] }
 0x2f5   : > { %v2358_v24 = vadd.f32 %v2349_v50, %v2268_v22 }
 0x2f7   : > { %v2361_v48 = vadd.f32 %v6502_v27, %v2358_v24 }
 0x2f9   : > { %v6931_v56 = vmax.f32 %v2361_v48, 0.0 }
 0x2fa   : > { %v2261_v52 = vpop.f32.mrf.mxu2 }
 0x2fb   : > { %v2269_v57 = vadd.f32 %v2261_v52, %v2179_v25  ;;  %v2351_v47 = vpop.f32.mrf.mxu3  ;;  %v2174_v26 = vpop.f32.mrf.mxu1  ;;  %v2372_v52 = vld [vmem:[#allocation2 + $0x38] sm:$0xff] }
 0x2fc   : > { %v2180_v32 = vadd.f32 %v2174_v26, %v2090_v28  ;;  %v5709_v26 = vld [vmem:[%s7615_s6] sm:$0xff] }
 0x2fd   : > { %v2359_v49 = vadd.f32 %v2351_v47, %v2269_v57 }
 0x2ff   : > { %v2362_v45 = vadd.f32 %v6502_v27, %v2359_v49 }
 0x301   : > { %v6933_v30 = vmax.f32 %v2362_v45, 0.0 }
 0x302   : > { %v2264_v8 = vpop.f32.mrf.mxu2 }
 0x303   : > { %v2270_v59 = vadd.f32 %v2264_v8, %v2180_v32  ;;  %v2354_v31 = vpop.f32.mrf.mxu3  ;;  %v2379_v33 = vpack.c.bf16 %v6933_v30, %v6931_v56  ;;  %v2176_v34 = vpop.f32.mrf.mxu1 }
 0x305   : > { %2485 = vmatmul.bf16.vlgmr.msrb.gmra.mxu0 %v2379_v33  ;;  %2503 = vmatmul.bf16.vlgmr.msrb.gmra.mxu1 %v2379_v33  ;;  %v2360_v35 = vadd.f32 %v2354_v31, %v2270_v59 }
 0x307   : > { %v2363_v38 = vadd.f32 %v6502_v27, %v2360_v35  ;;  %v5715_v27 = vld [vmem:[%s7615_s6 + $0x30] sm:$0xff] }
 0x308   : > { %2783 = vmatpush.bf16.msrb.mxu2 %v5715_v27 }
 0x309   : > { %v6938_v29 = vmax.f32 %v2363_v38, 0.0 }
 0x30a   : > { %v2266_v37 = vpop.f32.mrf.mxu2 }
 0x30b   : > { %v2356_v39 = vpop.f32.mrf.mxu3  ;;  %v2380_v40 = vpack.c.bf16 %v6938_v29, %v6938_v29 }
 0x30c   : > { %2784 = vmatpush.bf16.msrb.mxu2 %v5714_v55 }
 0x310   : > { %2785 = vmatpush.bf16.msrb.mxu2 %v5713_v5 }
 0x314   : > { %2786 = vmatpush.bf16.msrb.mxu2 %v5712_v17 }
 0x315   : > { %2490 = vmatmul.bf16.gmra.mxu0 %v2380_v40  ;;  %2508 = vmatmul.bf16.gmra.mxu1 %v2380_v40 }
 0x318   : > { %2787 = vmatpush.bf16.msrb.mxu2 %v5711_v18 }
 0x31c   : > { %2788 = vmatpush.bf16.msrb.mxu2 %v5710_v23 }
 0x320   : > { %2789 = vmatpush.bf16.msrb.mxu2 %v5709_v26 }
 0x382   : > { %v2486_v43 = vpop.f32.mrf.mxu0  ;;  %v2504_v46 = vpop.f32.mrf.mxu1 }
 0x383   : > { %v2505_v54 = vadd.f32 %v2504_v46, %v6535_v62  ;;  %v6953_v58 = vadd.f32 %v2486_v43, %v6565_v12 }
 0x385   : > { %v2521_v36 = vrot.slane %v2505_v54, 7  ;;  %v2520_v7 = vrot.slane %v6953_v58, 7 }
 0x387   : > { %v2539_v53 = vadd.f32 %v2521_v36, %v2368_v51 }
 0x389   : > { %v5068_v61 = vmul.f32 -1.442695, %v2539_v53 }
 0x38a   : > { %v2488_v63 = vpop.f32.mrf.mxu0  ;;  %v2506_v2 = vpop.f32.mrf.mxu1 }
 0x38b   : > { %v2489_v3 = vadd.f32 %v2488_v63, %v6565_v12  ;;  %v2507_v4 = vadd.f32 %v2506_v2, %v6535_v62  ;;  %5848 = vpow2.f32 %v5068_v61  ;;  %v5732_v61 = vld [vmem:[%s7617_s8 + $0x78] sm:$0xff] }
 0x38c   : > { %2958 = vmatpush.bf16.msrb.mxu3 %v5732_v61 }
 0x38d   : > { %v2522_v10 = vrot.slane %v2489_v3, 7  ;;  %v2524_v11 = vrot.slane %v2507_v4, 7 }
 0x38f   : > { %v6964_v44 = vsel %vm2519_vm9, %v2520_v7, %v2522_v10  ;;  %v2525_v15 = vsel %vm2519_vm9, %v2521_v36, %v2524_v11 }
 0x390   : > { %v2541_v14 = vadd.f32 %v2525_v15, %v2370_v13 }
 0x391   : > { %v5849_v19 = vpop.eup %5848 }
 0x392   : > { %v2491_v9 = vpop.f32.mrf.mxu0  ;;  %v2509_v0 = vpop.f32.mrf.mxu1  ;;  %v6973_v1 = vadd.f32 1.0, %v5849_v19  ;;  %v5070_v20 = vmul.f32 -1.442695, %v2541_v14 }
 0x393   : > { %v6976_v50 = vadd.f32 %v2491_v9, %v6565_v12  ;;  %v2510_v21 = vadd.f32 %v2509_v0, %v6535_v62 }
 0x394   : > { %5850 = vrcp.f32 %v6973_v1  ;;  %vm2598_vm12 = vweird.f32 %v6973_v1  ;;  %v2604_v53 = vand.u32 2147483648, %v6973_v1  ;;  %v2602_v2 = vand.u32 2147483647, %v6973_v1 }
 0x395   : > { %v2526_v22 = vrot.slane %v6976_v50, 7  ;;  %v2528_v24 = vrot.slane %v2510_v21, 7  ;;  %5852 = vpow2.f32 %v5070_v20  ;;  %v5724_v50 = vld [vmem:[%s7617_s8 + $0x38] sm:$0xff] }
 0x396   : > { %v2605_v15 = vor.u32 1.1754944e-38, %v2604_v53  ;;  %vm2603_vm1 = vcmp.eq.f32.partialorder %v2602_v2, 8.507059e+37  ;;  %3024 = vmatpush.bf16.msra.mxu0 %v5724_v50  ;;  %v5731_v2 = vld [vmem:[%s7617_s8 + $0x70] sm:$0xff]  ;;  %v5733_v50 = vld [vmem:[%s7617_s8 + $0x80] sm:$0xff] }
 0x397   : > { %v6987_v25 = vsel %vm2519_vm9, %v2522_v10, %v2526_v22  ;;  %v2529_v42 = vsel %vm2519_vm9, %v2524_v11, %v2528_v24  ;;  %v2545_v57 = vadd.f32 %v2528_v24, %v2374_v16  ;;  %2959 = vmatpush.bf16.msrb.mxu3 %v5731_v2  ;;  %v5772_v2 = vld [vmem:[%s7617_s8 + $0x1b8] sm:$0xff] }
 0x398   : > { %v2543_v47 = vadd.f32 %v2529_v42, %v2372_v52 }
 0x399   : > { %v5074_v48 = vmul.f32 -1.442695, %v2545_v57 }
 0x39a   : > { %v2493_v49 = vpop.f32.mrf.mxu0  ;;  %v2511_v45 = vpop.f32.mrf.mxu1  ;;  %v5072_v28 = vmul.f32 -1.442695, %v2543_v47 }
 0x39b   : > { %v5851_v32 = vpop.eup %5850 }
 0x39c   : > { %v5853_v8 = vpop.eup %5852  ;;  %5854 = vpow2.f32 %v5072_v28  ;;  %v2594_v31 = vmul.f32 %v5851_v32, %v6973_v1  ;;  %vm2599_vm10 = vweird.f32 %v5851_v32 }
 0x39d   : > { %v2573_v59 = vadd.f32 1.0, %v5853_v8  ;;  %5856 = vpow2.f32 %v5074_v48  ;;  %vm6999_vm13 = vmor %vm2598_vm12, %vm2599_vm10 }
 0x39e   : > { %v2595_v34 = vsub.f32 1.0, %v2594_v31 }
 0x39f   : > { %5858 = vrcp.f32 %v2573_v59  ;;  %v2634_v46 = vand.u32 2147483648, %v2573_v59  ;;  %v2632_v36 = vand.u32 2147483647, %v2573_v59  ;;  %vm2628_vm14 = vweird.f32 %v2573_v59 }
 0x3a0   : > { %v2596_v40 = vmul.f32 %v5851_v32, %v2595_v34 }
 0x3a1   : > { %v2635_v5 = vor.u32 1.1754944e-38, %v2634_v46  ;;  %vm2633_vm0 = vcmp.eq.f32.partialorder %v2632_v36, 8.507059e+37 }
 0x3a2   : > { %v5855_v33 = vpop.eup %5854  ;;  %v2597_v54 = vadd.f32 %v5851_v32, %v2596_v40 }
 0x3a3   : > { %v5857_v35 = vpop.eup %5856  ;;  %v2575_v37 = vadd.f32 1.0, %v5855_v33 }
 0x3a4   : > { %v6994_v38 = vadd.f32 1.0, %v5857_v35  ;;  %v2601_v11 = vsel %vm6999_vm13, %v5851_v32, %v2597_v54  ;;  %v2373_v54 = vld [vmem:[#allocation2 + $0x48] sm:$0x1] }
 0x3a5   : > { %v5859_v39 = vpop.eup %5858  ;;  %5860 = vrcp.f32 %v2575_v37  ;;  %v2664_v14 = vand.u32 2147483648, %v2575_v37  ;;  %v2662_v9 = vand.u32 2147483647, %v2575_v37  ;;  %v2606_v0 = vsel %vm2603_vm1, %v2605_v15, %v2601_v11  ;;  %v5738_v15 = vld [vmem:[%s7617_s8 + $0xa8] sm:$0xff] }
 0x3a6   : > { %v2624_v41 = vmul.f32 %v5859_v39, %v2573_v59  ;;  %5862 = vrcp.f32 %v6994_v38  ;;  %vm2629_vm11 = vweird.f32 %v5859_v39  ;;  %vm2658_vm3 = vweird.f32 %v2575_v37 }
 0x3a7   : > { %vm2630_vm15 = vmor %vm2628_vm14, %vm2629_vm11  ;;  %v2665_v16 = vor.u32 1.1754944e-38, %v2664_v14  ;;  %vm2663_vm6 = vcmp.eq.f32.partialorder %v2662_v9, 8.507059e+37  ;;  %v2703_v24 = vrot.slane %v2606_v0, 1  ;;  %v2694_v26 = vand.u32 2147483648, %v6994_v38  ;;  %v5737_v9 = vld [vmem:[%s7617_s8 + $0xa0] sm:$0xff] }
 0x3a8   : > { %v2625_v43 = vsub.f32 1.0, %v2624_v41  ;;  %vm2688_vm8 = vweird.f32 %v6994_v38  ;;  %v2692_v49 = vand.u32 2147483647, %v6994_v38  ;;  %v2369_v41 = vld [vmem:[#allocation2 + $0x18] sm:$0xff]  ;;  %v2544_v53 = vadd.f32 %v2526_v22, %v2373_v54 }
 0x3a9   : > { %v2695_v59 = vor.u32 1.1754944e-38, %v2694_v26 }
 0x3aa   : > { %v2626_v27 = vmul.f32 %v5859_v39, %v2625_v43  ;;  %vm2693_vm11 = vcmp.eq.f32.partialorder %v2692_v49, 8.507059e+37  ;;  %v2540_v43 = vadd.f32 %v6964_v44, %v2369_v41  ;;  %v5739_v44 = vld [vmem:[%s7617_s8 + $0xb0] sm:$0xff]  ;;  %v5729_v49 = vld [vmem:[%s7617_s8 + $0x60] sm:$0xff]  ;;  %v5746_v41 = vld [vmem:[%s7617_s8 + $0xe8] sm:$0xff] }
 0x3ab   : > { %v5861_v51 = vpop.eup %5860 }
 0x3ac   : > { %v5863_v55 = vpop.eup %5862  ;;  %v2654_v63 = vmul.f32 %v5861_v51, %v2575_v37  ;;  %v2627_v3 = vadd.f32 %v5859_v39, %v2626_v27  ;;  %vm2659_vm2 = vweird.f32 %v5861_v51  ;;  %v5069_v46 = vmul.f32 -1.442695, %v2540_v43  ;;  %v5740_v27 = vld [vmem:[%s7617_s8 + $0xb8] sm:$0xff] }
 0x3ad   : > { %v2684_v4 = vmul.f32 %v5863_v55, %v6994_v38  ;;  %vm2660_vm4 = vmor %vm2658_vm3, %vm2659_vm2  ;;  %vm2689_vm7 = vweird.f32 %v5863_v55  ;;  %3111 = vmatpush.bf16.msra.mxu1 %v5740_v27 }
 0x3ae   : > { %v2655_v10 = vsub.f32 1.0, %v2654_v63  ;;  %v2631_v13 = vsel %vm2630_vm15, %v5859_v39, %v2627_v3  ;;  %vm2690_vm10 = vmor %vm2688_vm8, %vm2689_vm7  ;;  %v2367_v39 = vld [vmem:[#allocation2 + $0x30] sm:$0xfe] }
 0x3af   : > { %v2636_v17 = vsel %vm2633_vm0, %v2635_v5, %v2631_v13  ;;  %v2685_v18 = vsub.f32 1.0, %v2684_v4  ;;  %v2538_v38 = vadd.f32 %v2520_v7, %v2367_v39  ;;  %v5723_v3 = vld [vmem:[%s7617_s8 + $0x30] sm:$0xff]  ;;  %v5730_v5 = vld [vmem:[%s7617_s8 + $0x68] sm:$0xff] }
 0x3b0   : > { %v2656_v19 = vmul.f32 %v5861_v51, %v2655_v10  ;;  %v2704_v20 = vrot.slane %v2636_v17, 1  ;;  %3025 = vmatpush.bf16.msra.mxu0 %v5723_v3  ;;  %2960 = vmatpush.bf16.msrb.mxu3 %v5730_v5  ;;  %v2827_v5 = vrot.slane %v6931_v56, 7 }
 0x3b1   : > { %v2686_v21 = vmul.f32 %v5863_v55, %v2685_v18  ;;  %v5067_v40 = vmul.f32 -1.442695, %v2538_v38  ;;  %3112 = vmatpush.bf16.msra.mxu1 %v5739_v44  ;;  %v5728_v38 = vld [vmem:[%s7617_s8 + $0x58] sm:$0xff] }
 0x3b2   : > { %v2657_v1 = vadd.f32 %v5861_v51, %v2656_v19  ;;  %v2705_v42 = vsel %vm2702_vm5, %v2703_v24, %v2704_v20 }
 0x3b3   : > { %v2687_v47 = vadd.f32 %v5863_v55, %v2686_v21  ;;  %v2713_v45 = vmul.f32 %v2705_v42, %v6931_v56  ;;  %5864 = vpow2.f32 %v5067_v40  ;;  %v5748_v21 = vld [vmem:[%s7617_s8 + $0xf8] sm:$0xff] }
 0x3b4   : > { %v2661_v23 = vsel %vm2660_vm4, %v5861_v51, %v2657_v1  ;;  %5866 = vpow2.f32 %v5069_v46  ;;  %v2371_v51 = vld [vmem:[#allocation2 + $0x8] sm:$0xff]  ;;  %3201 = vmatpush.bf16.msra.mxu2 %v5748_v21  ;;  %2961 = vmatpush.bf16.msrb.mxu3 %v5729_v49  ;;  %v5720_v40 = vld [vmem:[%s7617_s8 + $0x18] sm:$0xff]  ;;  %v5942_v21 = vmov 1.0  }
 0x3b5   : > { %v2666_v52 = vsel %vm2663_vm6, %v2665_v16, %v2661_v23  ;;  %v2691_v32 = vsel %vm2690_vm10, %v5863_v55, %v2687_v47  ;;  %v2542_v7 = vadd.f32 %v6987_v25, %v2371_v51  ;;  %v5073_v55 = vmul.f32 -1.442695, %v2544_v53  ;;  %3113 = vmatpush.bf16.msra.mxu1 %v5738_v15  ;;  %v5736_v16 = vld [vmem:[%s7617_s8 + $0x98] sm:$0xff]  ;;  %v5734_v46 = vld [vmem:[%s7617_s8 + $0x88] sm:$0xff]  ;;  %v5727_v51 = vld [vmem:[%s7617_s8 + $0x50] sm:$0xff] }
 0x3b6   : > { %v2706_v57 = vrot.slane %v2666_v52, 1  ;;  %v2696_v31 = vsel %vm2693_vm11, %v2695_v59, %v2691_v32  ;;  %v5719_v53 = vld [vmem:[%s7617_s8 + $0x10] sm:$0xff] }
 0x3b7   : > { %v2708_v33 = vrot.slane %v2696_v31, 1  ;;  %v5071_v63 = vmul.f32 -1.442695, %v2542_v7  ;;  %v2375_v31 = vld [vmem:[#allocation2 + $0x58] sm:$0xfe] }
 0x3b8   : > { %v2707_v48 = vsel %vm2702_vm5, %v2704_v20, %v2706_v57  ;;  %v5722_v20 = vld [vmem:[%s7617_s8 + $0x28] sm:$0xff]  ;;  %2962 = vmatpush.bf16.msrb.mxu3 %v5728_v38  ;;  %v5764_v38 = vld [vmem:[%s7617_s8 + $0x178] sm:$0xff] }
 0x3b9   : > { %v2714_v28 = vmul.f32 %v2707_v48, %v6933_v30  ;;  %v2709_v34 = vsel %vm2702_vm5, %v2706_v57, %v2708_v33  ;;  %v5865_v36 = vpop.eup %5864  ;;  %3114 = vmatpush.bf16.msra.mxu1 %v5737_v9  ;;  %3026 = vmatpush.bf16.msra.mxu0 %v5722_v20 }
 0x3ba   : > { %v2715_v35 = vmul.f32 %v2709_v34, %v6938_v29  ;;  %v7024_v58 = vadd.f32 1.0, %v5865_v36  ;;  %v5867_v22 = vpop.eup %5866 }
 0x3bb   : > { %v2716_v8 = vpack.c.bf16 %v2714_v28, %v2713_v45  ;;  %v7037_v25 = vadd.f32 1.0, %v5867_v22  ;;  %v5721_v45 = vld [vmem:[%s7617_s8 + $0x20] sm:$0xff] }
 0x3bc   : > { %v2717_v37 = vpack.c.bf16 %v2715_v35, %v2715_v35  ;;  %5868 = vrcp.f32 %v7024_v58  ;;  %v2589_v57 = vand.u32 2147483648, %v7024_v58  ;;  %vm2583_vm13 = vweird.f32 %v7024_v58  ;;  %2963 = vmatpush.bf16.msrb.mxu3 %v5727_v51  ;;  %v5717_v28 = vld [vmem:[%s7617_s8] sm:$0xff] }
 0x3bd   : > { %2790 = vmatmul.bf16.vlgmr.msrb.gmra.mxu2 %v2716_v8  ;;  %5870 = vpow2.f32 %v5073_v55  ;;  %3115 = vmatpush.bf16.msra.mxu1 %v5736_v16  ;;  %v2587_v48 = vand.u32 2147483647, %v7024_v58  ;;  %v5735_v8 = vld [vmem:[%s7617_s8 + $0x90] sm:$0xff]  ;;  %v2617_v7 = vand.u32 2147483647, %v7037_v25  ;;  %v2619_v44 = vand.u32 2147483648, %v7037_v25 }
 0x3be   : > { %5872 = vpow2.f32 %v5071_v63  ;;  %3027 = vmatpush.bf16.msra.mxu0 %v5721_v45  ;;  %v5929_v55 = vld [vmem:[%s7616_s7] ss:$0 sm:$0xff]  ;;  %vm2613_vm1 = vweird.f32 %v7037_v25  ;;  %v7172_v16 = vrot.slane %v5942_v21, 7 }
 0x3bf   : > { %5874 = vrcp.f32 %v7037_v25  ;;  %vm2588_vm15 = vcmp.eq.f32.partialorder %v2587_v48, 8.507059e+37  ;;  %v5745_v63 = vld [vmem:[%s7617_s8 + $0xe0] sm:$0xff]  ;;  %vm2618_vm3 = vcmp.eq.f32.partialorder %v2617_v7, 8.507059e+37  ;;  %v2620_v56 = vor.u32 1.1754944e-38, %v2619_v44  ;;  %v5742_v44 = vld [vmem:[%s7617_s8 + $0xc8] sm:$0xff] }
 0x3c1   : > { %3116 = vmatpush.bf16.msra.mxu1 %v5735_v8 }
 0x3c2   : > { %v5869_v4 = vpop.eup %5868  ;;  %3028 = vmatpush.bf16.msra.mxu0 %v5720_v40  ;;  %v5770_v40 = vld [vmem:[%s7617_s8 + $0x1a8] sm:$0xff] }
 0x3c3   : > { %v5871_v10 = vpop.eup %5870  ;;  %v2579_v11 = vmul.f32 %v5869_v4, %v7024_v58  ;;  %vm2584_vm12 = vweird.f32 %v5869_v4 }
 0x3c4   : > { %v5873_v13 = vpop.eup %5872  ;;  %v7053_v17 = vadd.f32 1.0, %v5871_v10  ;;  %vm7094_vm14 = vmor %vm2583_vm13, %vm2584_vm12  ;;  %vm690_vm12 = vcmp.lt.s32.totalorder %v6799_v60, 22 }
 0x3c5   : > { %v2580_v14 = vsub.f32 1.0, %v2579_v11  ;;  %v7055_v18 = vadd.f32 1.0, %v5873_v13  ;;  %v7057_v19 = vpop.eup %5874  ;;  %3117 = vmatpush.bf16.msra.mxu1 %v5734_v46  ;;  %v5726_v11 = vld [vmem:[%s7617_s8 + $0x48] sm:$0xff] }
 0x3c6   : > { %5876 = vrcp.f32 %v7053_v17  ;;  %v2609_v0 = vmul.f32 %v7057_v19, %v7037_v25  ;;  %vm2614_vm0 = vweird.f32 %v7057_v19  ;;  %3029 = vmatpush.bf16.msra.mxu0 %v5719_v53  ;;  %v5718_v13 = vld [vmem:[%s7617_s8 + $0x8] sm:$0xff]  ;;  %2964 = vmatpush.bf16.msrb.mxu3 %v5726_v11  ;;  %vm2673_vm6 = vweird.f32 %v7053_v17 }
 0x3c7   : > { %5878 = vrcp.f32 %v7055_v18  ;;  %v2581_v1 = vmul.f32 %v5869_v4, %v2580_v14  ;;  %vm7148_vm2 = vmor %vm2613_vm1, %vm2614_vm0  ;;  %v2376_v14 = vld [vmem:[#allocation2 + $0x20] sm:$0xff]  ;;  %v2649_v8 = vand.u32 2147483648, %v7055_v18  ;;  %vm2643_vm7 = vweird.f32 %v7055_v18 }
 0x3c8   : > { %v2610_v23 = vsub.f32 1.0, %v2609_v0  ;;  %v5744_v0 = vld [vmem:[%s7617_s8 + $0xd8] sm:$0xff] }
 0x3c9   : > { %v2582_v24 = vadd.f32 %v5869_v4, %v2581_v1  ;;  %3118 = vmatpush.bf16.msra.mxu1 %v5733_v50  ;;  %v5769_v50 = vld [vmem:[%s7617_s8 + $0x1a0] sm:$0xff] }
 0x3ca   : > { %v2611_v34 = vmul.f32 %v7057_v19, %v2610_v23  ;;  %3030 = vmatpush.bf16.msra.mxu0 %v5718_v13  ;;  %v5741_v13 = vld [vmem:[%s7617_s8 + $0xc0] sm:$0xff] }
 0x3cb   : > { %v2586_v33 = vsel %vm7094_vm14, %v5869_v4, %v2582_v24  ;;  %v5771_v24 = vld [vmem:[%s7617_s8 + $0x1b0] sm:$0xff] }
 0x3cc   : > { %v7075_v42 = vpop.eup %5876  ;;  %v2612_v27 = vadd.f32 %v7057_v19, %v2611_v34  ;;  %v5756_v34 = vld [vmem:[%s7617_s8 + $0x138] sm:$0xff] }
 0x3cd   : > { %2795 = vmatmul.bf16.gmra.mxu2 %v2717_v37  ;;  %v7081_v26 = vpop.eup %5878  ;;  %v2669_v59 = vmul.f32 %v7075_v42, %v7053_v17  ;;  %v2590_v37 = vor.u32 1.1754944e-38, %v2589_v57  ;;  %3471 = vmatpush.bf16.msrb.mxu1 %v5772_v2  ;;  %vm2674_vm5 = vweird.f32 %v7075_v42 }
 0x3ce   : > { %v2639_v35 = vmul.f32 %v7081_v26, %v7055_v18  ;;  %v2616_v10 = vsel %vm7148_vm2, %v7057_v19, %v2612_v27  ;;  %vm2644_vm4 = vweird.f32 %v7081_v26  ;;  %vm7209_vm8 = vmor %vm2673_vm6, %vm2674_vm5  ;;  %3031 = vmatpush.bf16.msra.mxu0 %v5717_v28  ;;  %v5767_v28 = vld [vmem:[%s7617_s8 + $0x190] sm:$0xff] }
 0x3cf   : > { %v2591_v43 = vsel %vm2588_vm15, %v2590_v37, %v2586_v33  ;;  %v2670_v54 = vsub.f32 1.0, %v2669_v59  ;;  %v2621_v57 = vsel %vm2618_vm3, %v2620_v56, %v2616_v10  ;;  %v2679_v59 = vand.u32 2147483648, %v7053_v17  ;;  %v5743_v33 = vld [vmem:[%s7617_s8 + $0xd0] sm:$0xff]  ;;  %v2378_v37 = vld [vmem:[#allocation2 + $0x40] sm:$0x1]  ;;  %vm7218_vm10 = vmor %vm2643_vm7, %vm2644_vm4 }
 0x3d0   : > { %v2640_v58 = vsub.f32 1.0, %v2639_v35  ;;  %v2820_v22 = vsub.f32 1.0, %v2591_v43  ;;  %vm3833_vm7 = vcmask 1045504  }
 0x3d1   : > { %v2671_v25 = vmul.f32 %v7075_v42, %v2670_v54  ;;  %3472 = vmatpush.bf16.msrb.mxu1 %v5771_v24  ;;  %v2680_v53 = vor.u32 1.1754944e-38, %v2679_v59  ;;  %v5765_v54 = vld [vmem:[%s7617_s8 + $0x180] sm:$0xff] }
 0x3d2   : > { %v2641_v9 = vmul.f32 %v7081_v26, %v2640_v58  ;;  %v2836_v1 = vmul.f32 %v2827_v5, %v2820_v22  ;;  %3381 = vmatpush.bf16.msrb.mxu0 %v5764_v38 }
 0x3d3   : > { %v2672_v49 = vadd.f32 %v7075_v42, %v2671_v25  ;;  %v7250_v25 = vld [vmem:[#allocation3] sm:$0xff] }
 0x3d4   : > { %v4259_v11 = vsel %vm690_vm12, 1.0, %v7250_v25 }
 0x3d5   : > { %v2676_v27 = vsel %vm7209_vm8, %v7075_v42, %v2672_v49  ;;  %v5755_v42 = vld [vmem:[%s7617_s8 + $0x130] sm:$0xff]  ;;  %3473 = vmatpush.bf16.msrb.mxu1 %v5770_v40 }
 0x3d9   : > { %3474 = vmatpush.bf16.msrb.mxu1 %v5769_v50 }
 0x440   : > { %v2791_v52 = vpop.f32.mrf.mxu2 }
 0x441   : > { %v7079_v47 = vadd.f32 %v6684_v6, %v2791_v52  ;;  %v5747_v6 = vld [vmem:[%s7617_s8 + $0xf0] sm:$0xff]  ;;  %v2828_v52 = vrot.slane %v6933_v30, 7 }
 0x442   : > { %3202 = vmatpush.bf16.msra.mxu2 %v5747_v6  ;;  %v5725_v6 = vld [vmem:[%s7617_s8 + $0x40] sm:$0xff] }
 0x443   : > { %v2803_v32 = vrot.slane %v7079_v47, 7  ;;  %v2647_v47 = vand.u32 2147483647, %v7055_v18  ;;  %2965 = vmatpush.bf16.msrb.mxu3 %v5725_v6  ;;  %v5761_v6 = vld [vmem:[%s7617_s8 + $0x160] sm:$0xff]  ;;  %v5750_v18 = vld [vmem:[%s7617_s8 + $0x108] sm:$0xff] }
 0x445   : > { %v2812_v39 = vadd.f32 %v2803_v32, %v2375_v31  ;;  %vm7222_vm11 = vcmp.eq.f32.partialorder %v2647_v47, 8.507059e+37 }
 0x446   : > { %3203 = vmatpush.bf16.msra.mxu2 %v5746_v41  ;;  %v2821_v41 = vsub.f32 1.0, %v2621_v57 }
 0x447   : > { %5880 = vtanh.f32 %v2812_v39  ;;  %v2677_v39 = vand.u32 2147483647, %v7053_v17  ;;  %v2829_v17 = vsel %vm2519_vm9, %v2827_v5, %v2828_v52  ;;  %3291 = vmatpush.bf16.msra.mxu3 %v5756_v34  ;;  %v5760_v34 = vld [vmem:[%s7617_s8 + $0x158] sm:$0xff] }
 0x448   : > { %v2793_v36 = vpop.f32.mrf.mxu2  ;;  %v2837_v22 = vmul.f32 %v2829_v17, %v2821_v41  ;;  %v5759_v17 = vld [vmem:[%s7617_s8 + $0x150] sm:$0xff] }
 0x449   : > { %v7134_v61 = vadd.f32 %v5929_v55, %v2793_v36  ;;  %v2377_v36 = vld [vmem:[#allocation2 + $0x28] sm:$0xff]  ;;  %vm2678_vm13 = vcmp.eq.f32.partialorder %v2677_v39, 8.507059e+37 }
 0x44a   : > { %3204 = vmatpush.bf16.msra.mxu2 %v5745_v63  ;;  %v2681_v3 = vsel %vm2678_vm13, %v2680_v53, %v2676_v27  ;;  %v5758_v27 = vld [vmem:[%s7617_s8 + $0x148] sm:$0xff] }
 0x44b   : > { %v2804_v4 = vrot.slane %v7134_v61, 7  ;;  %v5763_v61 = vld [vmem:[%s7617_s8 + $0x170] sm:$0xff]  ;;  %3292 = vmatpush.bf16.msra.mxu3 %v5755_v42  ;;  %v2823_v56 = vsub.f32 1.0, %v2681_v3 }
 0x44c   : > { %3382 = vmatpush.bf16.msrb.mxu0 %v5763_v61 }
 0x44d   : > { %v5881_v15 = vpop.eup %5880  ;;  %v2805_v19 = vsel %vm2519_vm9, %v2803_v32, %v2804_v4  ;;  %v2642_v32 = vadd.f32 %v7081_v26, %v2641_v9  ;;  %v5768_v9 = vld [vmem:[%s7617_s8 + $0x198] sm:$0xff] }
 0x44e   : > { %v2840_v20 = vmul.f32 %v5881_v15, %v2591_v43  ;;  %v2813_v23 = vadd.f32 %v2805_v19, %v2376_v14  ;;  %3205 = vmatpush.bf16.msra.mxu2 %v5744_v0  ;;  %v5754_v15 = vld [vmem:[%s7617_s8 + $0x128] sm:$0xff]  ;;  %v2830_v14 = vrot.slane %v6938_v29, 7  ;;  %v5753_v29 = vld [vmem:[%s7617_s8 + $0x120] sm:$0xff]  ;;  %3475 = vmatpush.bf16.msrb.mxu1 %v5768_v9 }
 0x44f   : > { %v2646_v51 = vsel %vm7218_vm10, %v7081_v26, %v2642_v32  ;;  %v2650_v26 = vor.u32 1.1754944e-38, %v2649_v8  ;;  %v5762_v19 = vld [vmem:[%s7617_s8 + $0x168] sm:$0xff]  ;;  %3293 = vmatpush.bf16.msra.mxu3 %v5754_v15 }
 0x450   : > { %v2844_v48 = vadd.f32 %v2840_v20, %v2836_v1  ;;  %5882 = vtanh.f32 %v2813_v23  ;;  %v2796_v45 = vpop.f32.mrf.mxu2  ;;  %v2854_v23 = vrot.slane %v4259_v11, 7  ;;  %v2839_v49 = vmul.f32 %v2830_v14, %v2823_v56  ;;  %3383 = vmatpush.bf16.msrb.mxu0 %v5762_v19 }
 0x451   : > { %v2797_v31 = vadd.f32 %v5929_v55, %v2796_v45 }
 0x452   : > { %v2860_v35 = vmul.f32 %v7172_v16, %v2844_v48  ;;  %3206 = vmatpush.bf16.msra.mxu2 %v5743_v33  ;;  %v2831_v48 = vsel %vm2519_vm9, %v2828_v52, %v2830_v14  ;;  %v2855_v30 = vsel %vm2519_vm9, %v7172_v16, %v2854_v23  ;;  %3476 = vmatpush.bf16.msrb.mxu1 %v5767_v28 }
 0x453   : > { %v2806_v46 = vrot.slane %v2797_v31, 7  ;;  %3294 = vmatpush.bf16.msra.mxu3 %v5753_v29  ;;  %v5752_v31 = vld [vmem:[%s7617_s8 + $0x118] sm:$0xff] }
 0x454   : > { %2864 = vst [vmem:[#allocation3 + $0x7] sm:$0xfe] %v2860_v35  ;;  %3384 = vmatpush.bf16.msrb.mxu0 %v5761_v6  ;;  %v5766_v35 = vld [vmem:[%s7617_s8 + $0x188] sm:$0xff] }
 0x455   : > { %v2807_v58 = vsel %vm2519_vm9, %v2804_v4, %v2806_v46  ;;  %v2815_v7 = vadd.f32 %v2806_v46, %v2378_v37  ;;  %v2651_v4 = vsel %vm7222_vm11, %v2650_v26, %v2646_v51  ;;  %v5751_v46 = vld [vmem:[%s7617_s8 + $0x110] sm:$0xff]  ;;  %vm3650_vm9 = vcmask 1041408  }
 0x456   : > { %v5883_v55 = vpop.eup %5882  ;;  %v2814_v63 = vadd.f32 %v2807_v58, %v2377_v36  ;;  %3207 = vmatpush.bf16.msra.mxu2 %v5742_v44  ;;  %v2822_v1 = vsub.f32 1.0, %v2651_v4  ;;  %3477 = vmatpush.bf16.msrb.mxu1 %v5766_v35  ;;  %v5757_v44 = vld [vmem:[%s7617_s8 + $0x140] sm:$0xff] }
 0x457   : > { %v2841_v2 = vmul.f32 %v5883_v55, %v2621_v57  ;;  %5884 = vtanh.f32 %v2815_v7  ;;  %3295 = vmatpush.bf16.msra.mxu3 %v5752_v31  ;;  %v5749_v7 = vld [vmem:[%s7617_s8 + $0x100] sm:$0xff]  ;;  %v5471_v31 = vld [vmem:[%s7613_s4 + $0x58] sm:$0xf0] }
 0x458   : > { %5886 = vtanh.f32 %v2814_v63  ;;  %v2798_v5 = vpop.f32.mrf.mxu2  ;;  %v2838_v32 = vmul.f32 %v2831_v48, %v2822_v1  ;;  %3385 = vmatpush.bf16.msrb.mxu0 %v5760_v34  ;;  %v5784_v34 = vld [vmem:[%s7613_s4 + $0x54] sm:$0xf0] }
 0x459   : > { %v2845_v10 = vadd.f32 %v2841_v2, %v2837_v22 }
 0x45a   : > { %3208 = vmatpush.bf16.msra.mxu2 %v5741_v13  ;;  %3478 = vmatpush.bf16.msrb.mxu1 %v5765_v54  ;;  %v5463_v54 = vld [vmem:[%s7613_s4 + $0x48] sm:$0xf0] }
 0x45b   : > { %v2861_v0 = vmul.f32 %v7172_v16, %v2845_v10  ;;  %v3042_v20 = vld [vmem:[#allocation3 + $0x7] sm:$0xff]  ;;  %3296 = vmatpush.bf16.msra.mxu3 %v5751_v46 }
 0x45c   : > { %v2889_v39 = vld [vmem:[#allocation3 + $0x6] sm:$0xff]  ;;  %3386 = vmatpush.bf16.msrb.mxu0 %v5759_v17 }
 0x45d   : > { %v5885_v24 = vpop.eup %5884  ;;  %2865 = vst [vmem:[#allocation3 + $0xf] sm:$0xff] %v2861_v0  ;;  %v3045_v57 = vpack.c.bf16 %v2861_v0, %v3042_v20  ;;  %v2868_v38 = vld [vmem:[#allocation3 + $0x5] sm:$0xff] }
 0x45e   : > { %v5887_v47 = vpop.eup %5886  ;;  %v2843_v45 = vmul.f32 %v5885_v24, %v2681_v3  ;;  %v5487_v24 = vld [vmem:[%s7613_s4 + $0x78] sm:$0xf0]  ;;  %v5781_v17 = vld [vmem:[%s7613_s4 + $0x44] sm:$0xf] }
 0x45f   : > { %v2842_v8 = vmul.f32 %v5887_v47, %v2651_v4  ;;  %3119 = vmatmul.bf16.vlgmr.msra.gmra.mxu1 %v3045_v57  ;;  %3297 = vmatpush.bf16.msra.mxu3 %v5750_v18  ;;  %v5485_v57 = vld [vmem:[%s7613_s4 + $0x70] sm:$0xf]  ;;  %v5788_v47 = vld [vmem:[%s7613_s4 + $0x74] sm:$0xf0]  ;;  %v5461_v18 = vld [vmem:[%s7613_s4 + $0x40] sm:$0xf] }
 0x460   : > { %v2847_v59 = vadd.f32 %v2843_v45, %v2839_v49  ;;  %3387 = vmatpush.bf16.msrb.mxu0 %v5758_v27  ;;  %v5486_v48 = vor.u32 %v5788_v47, %v5485_v57  ;;  %v5785_v49 = vld [vmem:[%s7613_s4 + $0x64] sm:$0xf]  ;;  %v5479_v45 = vld [vmem:[%s7613_s4 + $0x68] sm:$0xf0]  ;;  %v5466_v27 = vor.u32 %v5781_v17, %v5463_v54 }
 0x461   : > { %v2846_v52 = vadd.f32 %v2842_v8, %v2838_v32  ;;  %v5482_v32 = vor.u32 %v5785_v49, %v5479_v45  ;;  %v5477_v8 = vld [vmem:[%s7613_s4 + $0x60] sm:$0xf]  ;;  %v5431_v47 = vld [vmem:[%s7613_s4 + $0x8] sm:$0xf0]  ;;  %v5774_v45 = vld [vmem:[%s7613_s4 + $0x4] sm:$0xf0] }
 0x462   : > { %v2863_v33 = vmul.f32 %v2854_v23, %v2847_v59  ;;  %v5787_v23 = vld [vmem:[%s7613_s4 + $0x74] sm:$0xf]  ;;  %3608 = vmatpush.bf16.msrb.mxu2 %v5486_v48  ;;  %v5786_v59 = vld [vmem:[%s7613_s4 + $0x64] sm:$0xf0]  ;;  %v5429_v48 = vld [vmem:[%s7613_s4] sm:$0xf] }
 0x463   : > { %v2862_v37 = vmul.f32 %v2855_v30, %v2846_v52  ;;  %3298 = vmatpush.bf16.msra.mxu3 %v5749_v7  ;;  %v5490_v29 = vor.u32 %v5787_v23, %v5487_v24  ;;  %v5783_v30 = vld [vmem:[%s7613_s4 + $0x54] sm:$0xf]  ;;  %v5478_v52 = vor.u32 %v5786_v59, %v5477_v8  ;;  %v5453_v7 = vld [vmem:[%s7613_s4 + $0x30] sm:$0xf] }
 0x464   : > { %2867 = vst [vmem:[#allocation3 + $0x1f] sm:$0x1] %v2863_v33  ;;  %v2890_v16 = vld [vmem:[#allocation3 + $0xe] sm:$0xff]  ;;  %3388 = vmatpush.bf16.msrb.mxu0 %v5757_v44  ;;  %v5474_v35 = vor.u32 %v5783_v30, %v5471_v31  ;;  %v5780_v44 = vld [vmem:[%s7613_s4 + $0x34] sm:$0xf0] }
 0x465   : > { %v2869_v40 = vld [vmem:[#allocation3 + $0xd] sm:$0xff]  ;;  %2866 = vst [vmem:[#allocation3 + $0x17] sm:$0xff] %v2862_v37  ;;  %v2892_v41 = vpack.c.bf16 %v2890_v16, %v2889_v39  ;;  %v3046_v58 = vpack.c.bf16 %v2862_v37, %v2862_v37 }
 0x466   : > { %v2871_v43 = vpack.c.bf16 %v2869_v40, %v2868_v38  ;;  %v3132_v36 = vld [vmem:[#allocation3 + $0x8] sm:$0xff]  ;;  %v5469_v33 = vld [vmem:[%s7613_s4 + $0x50] sm:$0xf]  ;;  %3609 = vmatpush.bf16.msrb.mxu2 %v5478_v52 }
 0x467   : > { %2966 = vmatmul.bf16.vlgmr.msrb.gmra.mxu3 %v2892_v41  ;;  %v3402_v22 = vld [vmem:[#allocation3 + $0xb] sm:$0xff]  ;;  %v5470_v37 = vor.u32 %v5784_v34, %v5469_v33 }
 0x468   : > { %3032 = vmatmul.bf16.vlgmr.msra.gmra.mxu0 %v2871_v43  ;;  %v3222_v10 = vld [vmem:[#allocation3 + $0x9] sm:$0xff]  ;;  %3626 = vmatpush.bf16.msrb.mxu3 %v5490_v29  ;;  %v5773_v29 = vld [vmem:[%s7613_s4 + $0x4] sm:$0xf] }
 0x469   : > { %v3312_v11 = vld [vmem:[#allocation3 + $0xa] sm:$0xff]  ;;  %v5434_v49 = vor.u32 %v5773_v29, %v5431_v47 }
 0x46a   : > { %3610 = vmatpush.bf16.msrb.mxu2 %v5470_v37 }
 0x46c   : > { %v3133_v51 = vld [vmem:[#allocation3 + $0x10] sm:$0xff]  ;;  %v3134_v61 = vld [vmem:[#allocation3 + $0x18] sm:$0xff]  ;;  %3627 = vmatpush.bf16.msrb.mxu3 %v5482_v32 }
 0x46d   : > { %v3135_v53 = vpack.c.bf16 %v3133_v51, %v3132_v36  ;;  %v2891_v42 = vld [vmem:[#allocation3 + $0x16] sm:$0xff]  ;;  %v3136_v2 = vpack.c.bf16 %v3134_v61, %v3134_v61  ;;  %v5782_v36 = vld [vmem:[%s7613_s4 + $0x44] sm:$0xf0] }
 0x46e   : > { %v2870_v55 = vld [vmem:[#allocation3 + $0x15] sm:$0xff]  ;;  %v2893_v26 = vpack.c.bf16 %v2891_v42, %v2891_v42 }
 0x46f   : > { %3209 = vmatmul.bf16.vlgmr.msra.gmra.mxu2 %v3135_v53  ;;  %3124 = vmatmul.bf16.gmra.mxu1 %v3046_v58  ;;  %v2872_v63 = vpack.c.bf16 %v2870_v55, %v2870_v55  ;;  %v3403_v50 = vld [vmem:[#allocation3 + $0x13] sm:$0xff]  ;;  %v3404_v14 = vld [vmem:[#allocation3 + $0x1b] sm:$0xff]  ;;  %v5462_v58 = vor.u32 %v5782_v36, %v5461_v18  ;;  %v5454_v55 = vor.u32 %v5780_v44, %v5453_v7 }
 0x470   : > { %v3405_v3 = vpack.c.bf16 %v3403_v50, %v3402_v22  ;;  %v3223_v4 = vld [vmem:[#allocation3 + $0x11] sm:$0xff]  ;;  %v3406_v56 = vpack.c.bf16 %v3404_v14, %v3404_v14  ;;  %v3224_v19 = vld [vmem:[#allocation3 + $0x19] sm:$0xff]  ;;  %3628 = vmatpush.bf16.msrb.mxu3 %v5474_v35  ;;  %v5777_v22 = vld [vmem:[%s7613_s4 + $0x24] sm:$0xf] }
 0x471   : > { %v3313_v5 = vld [vmem:[#allocation3 + $0x12] sm:$0xff]  ;;  %v3225_v13 = vpack.c.bf16 %v3223_v4, %v3222_v10  ;;  %v3314_v9 = vld [vmem:[#allocation3 + $0x1a] sm:$0xff]  ;;  %v3226_v0 = vpack.c.bf16 %v3224_v19, %v3224_v19  ;;  %3611 = vmatpush.bf16.msrb.mxu2 %v5462_v58 }
 0x472   : > { %v3315_v15 = vpack.c.bf16 %v3313_v5, %v3312_v11  ;;  %v3316_v1 = vpack.c.bf16 %v3314_v9, %v3314_v9  ;;  %v5779_v51 = vld [vmem:[%s7613_s4 + $0x34] sm:$0xf]  ;;  %v5455_v53 = vld [vmem:[%s7613_s4 + $0x38] sm:$0xf0]  ;;  %v5778_v5 = vld [vmem:[%s7613_s4 + $0x24] sm:$0xf0] }
 0x473   : > { %v5458_v42 = vor.u32 %v5779_v51, %v5455_v53  ;;  %v5775_v10 = vld [vmem:[%s7613_s4 + $0x14] sm:$0xf]  ;;  %v5439_v11 = vld [vmem:[%s7613_s4 + $0x18] sm:$0xf0]  ;;  %v5776_v14 = vld [vmem:[%s7613_s4 + $0x14] sm:$0xf0] }
 0x474   : > { %3629 = vmatpush.bf16.msrb.mxu3 %v5466_v27  ;;  %v5442_v9 = vor.u32 %v5775_v10, %v5439_v11 }
 0x475   : > { %3612 = vmatpush.bf16.msrb.mxu2 %v5454_v55 }
 0x477   : > { %2971 = vmatmul.bf16.gmra.mxu3 %v2893_v26 }
 0x478   : > { %3037 = vmatmul.bf16.gmra.mxu0 %v2872_v63  ;;  %3630 = vmatpush.bf16.msrb.mxu3 %v5458_v42 }
 0x47f   : > { %3214 = vmatmul.bf16.gmra.mxu2 %v3136_v2  ;;  %3479 = vmatmul.bf16.vlgmr.msrb.gmra.mxu1 %v3405_v3  ;;  %v5447_v2 = vld [vmem:[%s7613_s4 + $0x28] sm:$0xf0]  ;;  %v5445_v3 = vld [vmem:[%s7613_s4 + $0x20] sm:$0xf] }
 0x480   : > { %v5450_v4 = vor.u32 %v5777_v22, %v5447_v2 }
 0x482   : > { %3631 = vmatpush.bf16.msrb.mxu3 %v5450_v4 }
 0x486   : > { %3632 = vmatpush.bf16.msrb.mxu3 %v5442_v9  ;;  %v5796_v9 = vld [vmem:[%s7615_s6 + $0x38] sm:$0xff] }
 0x487   : > { %3299 = vmatmul.bf16.vlgmr.msra.gmra.mxu3 %v3225_v13  ;;  %v5446_v13 = vor.u32 %v5778_v5, %v5445_v3  ;;  %v3499_v5 = vld [vmem:[#allocation2] sm:$0xfc]  ;;  %3913 = vmatpush.bf16.msra.mxu0 %v5796_v9 }
 0x488   : > { %3389 = vmatmul.bf16.vlgmr.msrb.gmra.mxu0 %v3315_v15  ;;  %v5437_v15 = vld [vmem:[%s7613_s4 + $0x10] sm:$0xf]  ;;  %5797 = vmatpush.bf16.msra.mxu1 %v5796_v9 }
 0x489   : > { %3613 = vmatpush.bf16.msrb.mxu2 %v5446_v13 }
 0x48a   : > { %3633 = vmatpush.bf16.msrb.mxu3 %v5434_v49 }
 0x48f   : > { %3484 = vmatmul.bf16.gmra.mxu1 %v3406_v56 }
 0x497   : > { %3304 = vmatmul.bf16.gmra.mxu3 %v3226_v0 }
 0x498   : > { %3394 = vmatmul.bf16.gmra.mxu0 %v3316_v1  ;;  %v5438_v1 = vor.u32 %v5776_v14, %v5437_v15 }
 0x49a   : > { %3614 = vmatpush.bf16.msrb.mxu2 %v5438_v1 }
 0x4dc   : > { %v7313_v20 = vpop.f32.mrf.mxu1 }
 0x4e4   : > { %v7333_v28 = vpop.f32.mrf.mxu1 }
 0x4e5   : > { %v3033_v6 = vpop.f32.mrf.mxu0 }
 0x4ea   : > { %v2967_v39 = vpop.f32.mrf.mxu3 }
 0x4eb   : > { %v3034_v0 = vadd.f32 %v3033_v6, %v2967_v39 }
 0x4ec   : > { %v7353_v38 = vpop.f32.mrf.mxu1 }
 0x4ed   : > { %v3035_v16 = vpop.f32.mrf.mxu0  ;;  %v3129_v57 = vadd.f32 %v7313_v20, %v3034_v0  ;;  %v5430_v20 = vor.u32 %v5774_v45, %v5429_v48  ;;  %v5795_v48 = vld [vmem:[%s7615_s6 + $0x30] sm:$0xff] }
 0x4ee   : > { %3914 = vmatpush.bf16.msra.mxu0 %v5795_v48  ;;  %5798 = vmatpush.bf16.msra.mxu1 %v5795_v48 }
 0x4ef   : > { %3615 = vmatpush.bf16.msrb.mxu2 %v5430_v20 }
 0x4f2   : > { %v2969_v40 = vpop.f32.mrf.mxu3  ;;  %v3210_v41 = vpop.f32.mrf.mxu2 }
 0x4f3   : > { %v3219_v6 = vadd.f32 %v3210_v41, %v3129_v57  ;;  %v3036_v59 = vadd.f32 %v3035_v16, %v2969_v40  ;;  %v5931_v16 = vld [vmem:[%s7618_s9] ss:$0 sm:$0xff]  ;;  %v3501_v57 = vld [vmem:[#allocation2 + $0x50] sm:$0xff] }
 0x4f4   : > { %v3127_v46 = vpop.f32.mrf.mxu1 }
 0x4f5   : > { %v7355_v43 = vpop.f32.mrf.mxu0  ;;  %v3130_v33 = vadd.f32 %v7333_v28, %v3036_v59 }
 0x4fa   : > { %v2972_v26 = vpop.f32.mrf.mxu3  ;;  %v3212_v63 = vpop.f32.mrf.mxu2 }
 0x4fb   : > { %v3220_v35 = vadd.f32 %v3212_v63, %v3130_v33  ;;  %v3039_v39 = vadd.f32 %v7355_v43, %v2972_v26 }
 0x4fc   : > { %v3480_v50 = vpop.f32.mrf.mxu1 }
 0x4fd   : > { %v3040_v61 = vpop.f32.mrf.mxu0  ;;  %v3131_v27 = vadd.f32 %v7353_v38, %v3039_v39 }
 0x502   : > { %v2974_v56 = vpop.f32.mrf.mxu3  ;;  %v3215_v19 = vpop.f32.mrf.mxu2 }
 0x503   : > { %v3221_v51 = vadd.f32 %v3215_v19, %v3131_v27 }
 0x504   : > { %v3482_v24 = vpop.f32.mrf.mxu1 }
 0x505   : > { %v3390_v23 = vpop.f32.mrf.mxu0 }
 0x50a   : > { %v3217_v32 = vpop.f32.mrf.mxu2  ;;  %v3300_v8 = vpop.f32.mrf.mxu3 }
 0x50b   : > { %v3309_v30 = vadd.f32 %v3300_v8, %v3219_v6 }
 0x50c   : > { %v3485_v31 = vpop.f32.mrf.mxu1 }
 0x50d   : > { %v3392_v52 = vpop.f32.mrf.mxu0  ;;  %v3399_v34 = vadd.f32 %v3390_v23, %v3309_v30  ;;  %v5794_v30 = vld [vmem:[%s7615_s6 + $0x28] sm:$0xff] }
 0x50e   : > { %3915 = vmatpush.bf16.msra.mxu0 %v5794_v30  ;;  %5799 = vmatpush.bf16.msra.mxu1 %v5794_v30 }
 0x50f   : > { %v3489_v46 = vadd.f32 %v3480_v50, %v3399_v34  ;;  %v3503_v34 = vld [vmem:[#allocation2 + $0x38] sm:$0xff] }
 0x511   : > { %v3492_v40 = vadd.f32 %v5931_v16, %v3489_v46 }
 0x512   : > { %v3302_v37 = vpop.f32.mrf.mxu3 }
 0x513   : > { %v3310_v17 = vadd.f32 %v3302_v37, %v3220_v35  ;;  %v7424_v58 = vmax.f32 %v3492_v40, 0.0 }
 0x514   : > { %v3487_v41 = vpop.f32.mrf.mxu1 }
 0x515   : > { %v3395_v54 = vpop.f32.mrf.mxu0  ;;  %v3400_v18 = vadd.f32 %v3392_v52, %v3310_v17 }
 0x517   : > { %v3490_v36 = vadd.f32 %v3482_v24, %v3400_v18 }
 0x519   : > { %v3493_v28 = vadd.f32 %v5931_v16, %v3490_v36  ;;  %v5791_v36 = vld [vmem:[%s7615_s6 + $0x10] sm:$0xff] }
 0x51a   : > { %v3305_v53 = vpop.f32.mrf.mxu3 }
 0x51b   : > { %v7426_v7 = vmax.f32 %v3493_v28, 0.0  ;;  %v3311_v43 = vadd.f32 %v3305_v53, %v3221_v51  ;;  %v5790_v28 = vld [vmem:[%s7615_s6 + $0x8] sm:$0xff] }
 0x51d   : > { %v3397_v44 = vpop.f32.mrf.mxu0  ;;  %v3510_v42 = vpack.c.bf16 %v7426_v7, %v7424_v58  ;;  %v3401_v55 = vadd.f32 %v3395_v54, %v3311_v43  ;;  %v5792_v54 = vld [vmem:[%s7615_s6 + $0x18] sm:$0xff] }
 0x51f   : > { %3616 = vmatmul.bf16.vlgmr.msrb.gmra.mxu2 %v3510_v42  ;;  %3634 = vmatmul.bf16.vlgmr.msrb.gmra.mxu3 %v3510_v42  ;;  %v3491_v38 = vadd.f32 %v3485_v31, %v3401_v55  ;;  %v3505_v31 = vld [vmem:[#allocation2 + $0x10] sm:$0x3]  ;;  %v5789_v55 = vld [vmem:[%s7615_s6] sm:$0xff] }
 0x521   : > { %v3494_v63 = vadd.f32 %v5931_v16, %v3491_v38 }
 0x522   : > { %v3307_v26 = vpop.f32.mrf.mxu3 }
 0x523   : > { %v7430_v61 = vmax.f32 %v3494_v63, 0.0 }
 0x525   : > { %v3511_v50 = vpack.c.bf16 %v7430_v61, %v7430_v61 }
 0x52f   : > { %3621 = vmatmul.bf16.gmra.mxu2 %v3511_v50  ;;  %3639 = vmatmul.bf16.gmra.mxu3 %v3511_v50 }
 0x5a2   : > { %v3617_v22 = vpop.f32.mrf.mxu2  ;;  %v3635_v2 = vpop.f32.mrf.mxu3 }
 0x5a3   : > { %v3636_v3 = vadd.f32 %v3635_v2, %v6535_v62  ;;  %v7436_v11 = vadd.f32 %v3617_v22, %v6565_v12 }
 0x5a5   : > { %v3652_v4 = vrot.slane %v3636_v3, 6  ;;  %v3651_v0 = vrot.slane %v7436_v11, 6 }
 0x5a7   : > { %v3670_v10 = vadd.f32 %v3652_v4, %v3499_v5 }
 0x5a9   : > { %v5492_v13 = vmul.f32 -1.442695, %v3670_v10 }
 0x5aa   : > { %v3619_v15 = vpop.f32.mrf.mxu2  ;;  %v3637_v14 = vpop.f32.mrf.mxu3 }
 0x5ab   : > { %v3620_v56 = vadd.f32 %v3619_v15, %v6565_v12  ;;  %v3638_v19 = vadd.f32 %v3637_v14, %v6535_v62  ;;  %5888 = vpow2.f32 %v5492_v13 }
 0x5ad   : > { %v3653_v1 = vrot.slane %v3620_v56, 6  ;;  %v3655_v23 = vrot.slane %v3638_v19, 6 }
 0x5af   : > { %v7447_v24 = vsel %vm3650_vm9, %v3651_v0, %v3653_v1  ;;  %v3656_v29 = vsel %vm3650_vm9, %v3652_v4, %v3655_v23 }
 0x5b0   : > { %v3672_v47 = vadd.f32 %v3656_v29, %v3501_v57 }
 0x5b1   : > { %v5889_v49 = vpop.eup %5888 }
 0x5b2   : > { %v3622_v45 = vpop.f32.mrf.mxu2  ;;  %v3640_v6 = vpop.f32.mrf.mxu3  ;;  %v7453_v20 = vadd.f32 1.0, %v5889_v49  ;;  %v5494_v32 = vmul.f32 -1.442695, %v3672_v47 }
 0x5b3   : > { %v7456_v8 = vadd.f32 %v3622_v45, %v6565_v12  ;;  %v3641_v59 = vadd.f32 %v3640_v6, %v6535_v62  ;;  %v5793_v12 = vld [vmem:[%s7615_s6 + $0x20] sm:$0xff] }
 0x5b4   : > { %5890 = vrcp.f32 %v7453_v20  ;;  %3916 = vmatpush.bf16.msra.mxu0 %v5793_v12  ;;  %5800 = vmatpush.bf16.msra.mxu1 %v5793_v12  ;;  %v3735_v13 = vand.u32 2147483648, %v7453_v20  ;;  %vm3729_vm1 = vweird.f32 %v7453_v20  ;;  %v3733_v14 = vand.u32 2147483647, %v7453_v20 }
 0x5b5   : > { %v3657_v52 = vrot.slane %v7456_v8, 6  ;;  %v3659_v33 = vrot.slane %v3641_v59, 6  ;;  %5892 = vpow2.f32 %v5494_v32 }
 0x5b6   : > { %v3736_v47 = vor.u32 1.1754944e-38, %v3735_v13  ;;  %vm3734_vm5 = vcmp.eq.f32.partialorder %v3733_v14, 8.507059e+37 }
 0x5b7   : > { %v7470_v62 = vsel %vm3650_vm9, %v3653_v1, %v3657_v52  ;;  %v3660_v35 = vsel %vm3650_vm9, %v3655_v23, %v3659_v33  ;;  %v3676_v39 = vadd.f32 %v3659_v33, %v3505_v31 }
 0x5b8   : > { %v3674_v37 = vadd.f32 %v3660_v35, %v3503_v34  ;;  %3917 = vmatpush.bf16.msra.mxu0 %v5792_v54  ;;  %5801 = vmatpush.bf16.msra.mxu1 %v5792_v54 }
 0x5b9   : > { %v5498_v16 = vmul.f32 -1.442695, %v3676_v39 }
 0x5ba   : > { %v3624_v46 = vpop.f32.mrf.mxu2  ;;  %v3642_v17 = vpop.f32.mrf.mxu3  ;;  %v5496_v41 = vmul.f32 -1.442695, %v3674_v37 }
 0x5bb   : > { %v5891_v18 = vpop.eup %5890 }
 0x5bc   : > { %v5893_v27 = vpop.eup %5892  ;;  %5894 = vpow2.f32 %v5496_v41  ;;  %v3725_v51 = vmul.f32 %v5891_v18, %v7453_v20  ;;  %3918 = vmatpush.bf16.msra.mxu0 %v5791_v36  ;;  %5802 = vmatpush.bf16.msra.mxu1 %v5791_v36  ;;  %vm3730_vm15 = vweird.f32 %v5891_v18 }
 0x5bd   : > { %v3704_v40 = vadd.f32 1.0, %v5893_v27  ;;  %vm7489_vm3 = vmor %vm3729_vm1, %vm3730_vm15 }
 0x5be   : > { %v3726_v43 = vsub.f32 1.0, %v3725_v51 }
 0x5bf   : > { %5896 = vrcp.f32 %v3704_v40  ;;  %v3765_v3 = vand.u32 2147483648, %v3704_v40  ;;  %v3763_v5 = vand.u32 2147483647, %v3704_v40  ;;  %vm3759_vm0 = vweird.f32 %v3704_v40 }
 0x5c0   : > { %5898 = vpow2.f32 %v5498_v16  ;;  %3919 = vmatpush.bf16.msra.mxu0 %v5790_v28  ;;  %5803 = vmatpush.bf16.msra.mxu1 %v5790_v28  ;;  %v3727_v63 = vmul.f32 %v5891_v18, %v3726_v43 }
 0x5c1   : > { %v3766_v9 = vor.u32 1.1754944e-38, %v3765_v3  ;;  %vm3764_vm4 = vcmp.eq.f32.partialorder %v3763_v5, 8.507059e+37 }
 0x5c2   : > { %v5895_v53 = vpop.eup %5894  ;;  %v3728_v4 = vadd.f32 %v5891_v18, %v3727_v63 }
 0x5c3   : > { %v3706_v44 = vadd.f32 1.0, %v5895_v53 }
 0x5c4   : > { %3920 = vmatpush.bf16.msra.mxu0 %v5789_v55  ;;  %5804 = vmatpush.bf16.msra.mxu1 %v5789_v55  ;;  %v3732_v57 = vsel %vm7489_vm3, %v5891_v18, %v3728_v4  ;;  %v3498_v55 = vld [vmem:[#allocation2 + $0x30] sm:$0xfc]  ;;  %v3502_v4 = vld [vmem:[#allocation2 + $0x8] sm:$0xff] }
 0x5c5   : > { %v5897_v42 = vpop.eup %5896  ;;  %5900 = vrcp.f32 %v3706_v44  ;;  %v3795_v48 = vand.u32 2147483648, %v3706_v44  ;;  %v3793_v20 = vand.u32 2147483647, %v3706_v44  ;;  %v3737_v59 = vsel %vm3734_vm5, %v3736_v47, %v3732_v57 }
 0x5c6   : > { %v5899_v38 = vpop.eup %5898  ;;  %v3755_v26 = vmul.f32 %v5897_v42, %v3704_v40  ;;  %vm3760_vm14 = vweird.f32 %v5897_v42  ;;  %vm3789_vm8 = vweird.f32 %v3706_v44  ;;  %v3834_v39 = vrot.slane %v3737_v59, 2 }
 0x5c7   : > { %v3708_v50 = vadd.f32 1.0, %v5899_v38  ;;  %vm3761_vm2 = vmor %vm3759_vm0, %vm3760_vm14  ;;  %v3796_v12 = vor.u32 1.1754944e-38, %v3795_v48  ;;  %vm3794_vm12 = vcmp.eq.f32.partialorder %v3793_v20, 8.507059e+37  ;;  %v3669_v38 = vadd.f32 %v3651_v0, %v3498_v55 }
 0x5c8   : > { %v3756_v22 = vsub.f32 1.0, %v3755_v26  ;;  %v3504_v26 = vld [vmem:[#allocation2 + $0x48] sm:$0x3]  ;;  %v3673_v5 = vadd.f32 %v7470_v62, %v3502_v4 }
 0x5c9   : > { %5902 = vrcp.f32 %v3708_v50  ;;  %v3825_v31 = vand.u32 2147483648, %v3708_v50  ;;  %v3823_v35 = vand.u32 2147483647, %v3708_v50  ;;  %vm3819_vm13 = vweird.f32 %v3708_v50 }
 0x5ca   : > { %v3757_v2 = vmul.f32 %v5897_v42, %v3756_v22  ;;  %v5491_v63 = vmul.f32 -1.442695, %v3669_v38 }
 0x5cb   : > { %v5901_v10 = vpop.eup %5900  ;;  %v3826_v54 = vor.u32 1.1754944e-38, %v3825_v31  ;;  %vm3824_vm15 = vcmp.eq.f32.partialorder %v3823_v35, 8.507059e+37  ;;  %v5932_v35 = vld [vmem:[%s7616_s7] ss:$0 sm:$0xff] }
 0x5cc   : > { %v3758_v15 = vadd.f32 %v5897_v42, %v3757_v2  ;;  %v3785_v56 = vmul.f32 %v5901_v10, %v3706_v44  ;;  %vm3790_vm6 = vweird.f32 %v5901_v10  ;;  %5904 = vpow2.f32 %v5491_v63  ;;  %v3500_v2 = vld [vmem:[#allocation2 + $0x18] sm:$0xff] }
 0x5cd   : > { %vm3791_vm10 = vmor %vm3789_vm8, %vm3790_vm6  ;;  %v3671_v3 = vadd.f32 %v7447_v24, %v3500_v2 }
 0x5ce   : > { %v3762_v1 = vsel %vm3761_vm2, %v5897_v42, %v3758_v15  ;;  %v3786_v29 = vsub.f32 1.0, %v3785_v56  ;;  %v5495_v15 = vmul.f32 -1.442695, %v3673_v5 }
 0x5cf   : > { %v5903_v23 = vpop.eup %5902  ;;  %v3767_v45 = vsel %vm3764_vm4, %v3766_v9, %v3762_v1  ;;  %v5493_v13 = vmul.f32 -1.442695, %v3671_v3 }
 0x5d0   : > { %v3815_v49 = vmul.f32 %v5903_v23, %v3708_v50  ;;  %v3787_v6 = vmul.f32 %v5901_v10, %v3786_v29  ;;  %v3835_v33 = vrot.slane %v3767_v45, 2  ;;  %vm3820_vm11 = vweird.f32 %v5903_v23 }
 0x5d1   : > { %vm3821_vm14 = vmor %vm3819_vm13, %vm3820_vm11  ;;  %v3675_v50 = vadd.f32 %v3657_v52, %v3504_v26  ;;  %vm699_vm13 = vcmp.lt.s32.totalorder %v6799_v60, 21 }
 0x5d2   : > { %v3816_v32 = vsub.f32 1.0, %v3815_v49  ;;  %v3788_v30 = vadd.f32 %v5901_v10, %v3787_v6  ;;  %v3836_v41 = vsel %vm3833_vm7, %v3834_v39, %v3835_v33 }
 0x5d3   : > { %v3844_v36 = vmul.f32 %v3836_v41, %v7424_v58  ;;  %v5497_v22 = vmul.f32 -1.442695, %v3675_v50 }
 0x5d4   : > { %v3817_v34 = vmul.f32 %v5903_v23, %v3816_v32  ;;  %v3792_v37 = vsel %vm3791_vm10, %v5901_v10, %v3788_v30  ;;  %v5905_v10 = vpop.eup %5904 }
 0x5d5   : > { %v3797_v17 = vsel %vm3794_vm12, %v3796_v12, %v3792_v37  ;;  %5906 = vpow2.f32 %v5497_v22  ;;  %v3701_v14 = vadd.f32 1.0, %v5905_v10 }
 0x5d6   : > { %v3818_v46 = vadd.f32 %v5903_v23, %v3817_v34  ;;  %v3837_v18 = vrot.slane %v3797_v17, 2  ;;  %5908 = vpow2.f32 %v5493_v13 }
 0x5d7   : > { %5910 = vpow2.f32 %v5495_v15  ;;  %v3720_v20 = vand.u32 2147483648, %v3701_v14  ;;  %vm3714_vm1 = vweird.f32 %v3701_v14  ;;  %v3718_v59 = vand.u32 2147483647, %v3701_v14 }
 0x5d8   : > { %v3822_v27 = vsel %vm3821_vm14, %v5903_v23, %v3818_v46  ;;  %v3838_v16 = vsel %vm3833_vm7, %v3835_v33, %v3837_v18  ;;  %5912 = vrcp.f32 %v3701_v14 }
 0x5d9   : > { %v3827_v40 = vsel %vm3824_vm15, %v3826_v54, %v3822_v27  ;;  %v3845_v51 = vmul.f32 %v3838_v16, %v7426_v7  ;;  %v3721_v39 = vor.u32 1.1754944e-38, %v3720_v20  ;;  %vm3719_vm4 = vcmp.eq.f32.partialorder %v3718_v59, 8.507059e+37  ;;  %v3506_v27 = vld [vmem:[#allocation2 + $0x58] sm:$0xfc] }
 0x5da   : > { %v3839_v28 = vrot.slane %v3827_v40, 2 }
 0x5db   : > { %v3847_v53 = vpack.c.bf16 %v3845_v51, %v3844_v36  ;;  %v5907_v11 = vpop.eup %5906 }
 0x5dc   : > { %v3840_v43 = vsel %vm3833_vm7, %v3837_v18, %v3839_v28  ;;  %v3707_v0 = vadd.f32 1.0, %v5907_v11  ;;  %v5909_v8 = vpop.eup %5908  ;;  %v3509_v28 = vld [vmem:[#allocation2 + $0x40] sm:$0x3] }
 0x5dd   : > { %v3846_v44 = vmul.f32 %v3840_v43, %v7430_v61  ;;  %3921 = vmatmul.bf16.vlgmr.msra.gmra.mxu0 %v3847_v53  ;;  %v5911_v52 = vpop.eup %5910  ;;  %v7507_v19 = vadd.f32 1.0, %v5909_v8 }
 0x5de   : > { %5914 = vrcp.f32 %v3707_v0  ;;  %v5913_v56 = vpop.eup %5912  ;;  %v7509_v24 = vadd.f32 1.0, %v5911_v52  ;;  %v3808_v54 = vand.u32 2147483647, %v3707_v0  ;;  %v3810_v41 = vand.u32 2147483648, %v3707_v0 }
 0x5df   : > { %v3848_v42 = vpack.c.bf16 %v3846_v44, %v3846_v44  ;;  %v3710_v9 = vmul.f32 %v5913_v56, %v3701_v14  ;;  %5916 = vrcp.f32 %v7507_v19  ;;  %vm3715_vm0 = vweird.f32 %v5913_v56 }
 0x5e0   : > { %5918 = vrcp.f32 %v7509_v24  ;;  %vm7521_vm2 = vmor %vm3714_vm1, %vm3715_vm0  ;;  %vm3804_vm5 = vweird.f32 %v3707_v0  ;;  %v3958_v44 = vrot.slane %v7424_v58, 6  ;;  %v3750_v38 = vand.u32 2147483648, %v7507_v19 }
 0x5e1   : > { %3926 = vmatmul.bf16.vlgmr.msra.gmra.mxu1 %v3848_v42  ;;  %v3711_v1 = vsub.f32 1.0, %v3710_v9  ;;  %vm3809_vm8 = vcmp.eq.f32.partialorder %v3808_v54, 8.507059e+37  ;;  %v3811_v63 = vor.u32 1.1754944e-38, %v3810_v41  ;;  %v3780_v2 = vand.u32 2147483648, %v7509_v24 }
 0x5e2   : > { %vm3744_vm12 = vweird.f32 %v7507_v19  ;;  %v3748_v13 = vand.u32 2147483647, %v7507_v19  ;;  %v3751_v15 = vor.u32 1.1754944e-38, %v3750_v38  ;;  %vm3774_vm15 = vweird.f32 %v7509_v24 }
 0x5e3   : > { %v3712_v29 = vmul.f32 %v5913_v56, %v3711_v1  ;;  %v3778_v11 = vand.u32 2147483647, %v7509_v24 }
 0x5e4   : > { %v5915_v62 = vpop.eup %5914  ;;  %vm3749_vm1 = vcmp.eq.f32.partialorder %v3748_v13, 8.507059e+37 }
 0x5e5   : > { %v3800_v23 = vmul.f32 %v5915_v62, %v3707_v0  ;;  %v7513_v57 = vpop.eup %5916  ;;  %v3713_v6 = vadd.f32 %v5913_v56, %v3712_v29  ;;  %vm3805_vm3 = vweird.f32 %v5915_v62  ;;  %v3508_v29 = vld [vmem:[#allocation2 + $0x28] sm:$0xff] }
 0x5e6   : > { %v7515_v47 = vpop.eup %5918  ;;  %v3740_v49 = vmul.f32 %v7513_v57, %v7507_v19  ;;  %vm7531_vm6 = vmor %vm3804_vm5, %vm3805_vm3  ;;  %vm3745_vm10 = vweird.f32 %v7513_v57 }
 0x5e7   : > { %v3801_v48 = vsub.f32 1.0, %v3800_v23  ;;  %v3770_v45 = vmul.f32 %v7515_v47, %v7509_v24  ;;  %v3717_v34 = vsel %vm7521_vm2, %v5913_v56, %v3713_v6  ;;  %vm3775_vm11 = vweird.f32 %v7515_v47  ;;  %vm7548_vm14 = vmor %vm3744_vm12, %vm3745_vm10  ;;  %v3507_v23 = vld [vmem:[#allocation2 + $0x20] sm:$0xff] }
 0x5e8   : > { %v3741_v30 = vsub.f32 1.0, %v3740_v49  ;;  %v3722_v16 = vsel %vm3719_vm4, %v3721_v39, %v3717_v34  ;;  %vm7561_vm0 = vmor %vm3774_vm15, %vm3775_vm11  ;;  %v3982_v24 = vrot.slane %v5942_v21, 6  ;;  %v4260_v6 = vsel %vm699_vm13, 1.0, %v7250_v25 }
 0x5e9   : > { %v3802_v32 = vmul.f32 %v5915_v62, %v3801_v48  ;;  %v3771_v12 = vsub.f32 1.0, %v3770_v45  ;;  %v3951_v26 = vsub.f32 1.0, %v3722_v16  ;;  %v3961_v21 = vrot.slane %v7430_v61, 6 }
 0x5ea   : > { %v3742_v36 = vmul.f32 %v7513_v57, %v3741_v30  ;;  %vm3779_vm2 = vcmp.eq.f32.partialorder %v3778_v11, 8.507059e+37  ;;  %v3959_v61 = vrot.slane %v7426_v7, 6 }
 0x5eb   : > { %v3803_v46 = vadd.f32 %v5915_v62, %v3802_v32  ;;  %v3772_v43 = vmul.f32 %v7515_v47, %v3771_v12  ;;  %v3967_v52 = vmul.f32 %v3958_v44, %v3951_v26 }
 0x5ec   : > { %v3743_v22 = vadd.f32 %v7513_v57, %v3742_v36  ;;  %v3962_v41 = vsel %vm3650_vm9, %v3959_v61, %v3961_v21 }
 0x5ed   : > { %v3807_v42 = vsel %vm7531_vm6, %v5915_v62, %v3803_v46  ;;  %v3773_v5 = vadd.f32 %v7515_v47, %v3772_v43  ;;  %v3781_v62 = vor.u32 1.1754944e-38, %v3780_v2 }
 0x5ee   : > { %v3812_v4 = vsel %vm3809_vm8, %v3811_v63, %v3807_v42  ;;  %v3747_v19 = vsel %vm7548_vm14, %v7513_v57, %v3743_v22 }
 0x5ef   : > { %v3954_v56 = vsub.f32 1.0, %v3812_v4  ;;  %v3777_v48 = vsel %vm7561_vm0, %v7515_v47, %v3773_v5  ;;  %v3752_v31 = vsel %vm3749_vm1, %v3751_v15, %v3747_v19  ;;  %v3985_v47 = vrot.slane %v4260_v6, 6 }
 0x5f1   : > { %v3970_v60 = vmul.f32 %v3961_v21, %v3954_v56  ;;  %v3986_v36 = vsel %vm3650_vm9, %v3982_v24, %v3985_v47 }
 0x65a   : > { %v3922_v33 = vpop.f32.mrf.mxu0 }
 0x65b   : > { %v3923_v37 = vadd.f32 %v5932_v35, %v3922_v33  ;;  %v3782_v33 = vsel %vm3779_vm2, %v3781_v62, %v3777_v48 }
 0x65d   : > { %v3934_v17 = vrot.slane %v3923_v37, 6  ;;  %v3953_v37 = vsub.f32 1.0, %v3782_v33 }
 0x65e   : > { %v3927_v18 = vpop.f32.mrf.mxu1 }
 0x65f   : > { %v3928_v40 = vadd.f32 %v5932_v35, %v3927_v18  ;;  %v3943_v51 = vadd.f32 %v3934_v17, %v3506_v27  ;;  %v3969_v7 = vmul.f32 %v3962_v41, %v3953_v37 }
 0x661   : > { %v3937_v55 = vrot.slane %v3928_v40, 6  ;;  %5920 = vtanh.f32 %v3943_v51 }
 0x662   : > { %v3924_v3 = vpop.f32.mrf.mxu0 }
 0x663   : > { %v3946_v50 = vadd.f32 %v3937_v55, %v3509_v28  ;;  %v3925_v10 = vadd.f32 %v5932_v35, %v3924_v3  ;;  %v3952_v35 = vsub.f32 1.0, %v3752_v31 }
 0x665   : > { %5922 = vtanh.f32 %v3946_v50  ;;  %v3935_v0 = vrot.slane %v3925_v10, 6 }
 0x666   : > { %v3929_v8 = vpop.f32.mrf.mxu1 }
 0x667   : > { %v5921_v1 = vpop.eup %5920  ;;  %v3936_v49 = vsel %vm3650_vm9, %v3934_v17, %v3935_v0  ;;  %v3938_v57 = vsel %vm3650_vm9, %v3935_v0, %v3937_v55  ;;  %v3960_v17 = vsel %vm3650_vm9, %v3958_v44, %v3959_v61 }
 0x668   : > { %v3971_v45 = vmul.f32 %v5921_v1, %v3722_v16  ;;  %v3944_v20 = vadd.f32 %v3936_v49, %v3507_v23  ;;  %v3945_v32 = vadd.f32 %v3938_v57, %v3508_v29  ;;  %v3968_v18 = vmul.f32 %v3960_v17, %v3952_v35 }
 0x66a   : > { %v3975_v30 = vadd.f32 %v3971_v45, %v3967_v52  ;;  %5924 = vtanh.f32 %v3944_v20 }
 0x66b   : > { %v5923_v59 = vpop.eup %5922  ;;  %5926 = vtanh.f32 %v3945_v32 }
 0x66c   : > { %v3974_v25 = vmul.f32 %v5923_v59, %v3812_v4  ;;  %v3991_v12 = vmul.f32 %v3982_v24, %v3975_v30 }
 0x66e   : > { %v3978_v34 = vadd.f32 %v3974_v25, %v3970_v60  ;;  %3995 = vst [vmem:[%s7580_s26 - $0x2] sm:$0xfc] %v3991_v12  ;;  %v4022_v28 = vmul.f32 %v3991_v12, %v3991_v12  ;;  %v4003_v42 = vrot.slane %v3991_v12, 2 }
 0x670   : > { %v3994_v39 = vmul.f32 %v3985_v47, %v3978_v34  ;;  %v5925_v46 = vpop.eup %5924  ;;  %v4030_v50 = vrot.slane %v4022_v28, 2 }
 0x671   : > { %v5927_v54 = vpop.eup %5926  ;;  %v3972_v27 = vmul.f32 %v5925_v46, %v3752_v31 }
 0x672   : > { %3998 = vst [vmem:[%s7580_s26 + $0x16] sm:$0x3] %v3994_v39  ;;  %v3973_v16 = vmul.f32 %v5927_v54, %v3782_v33  ;;  %v4025_v43 = vmul.f32 %v3994_v39, %v3994_v39  ;;  %v4008_v38 = vrot.slane %v3994_v39, 2 }
 0x673   : > { %v3976_v40 = vadd.f32 %v3972_v27, %v3968_v18 }
 0x674   : > { %v3977_v51 = vadd.f32 %v3973_v16, %v3969_v7  ;;  %v4035_v3 = vrot.slane %v4025_v43, 2 }
 0x675   : > { %v3992_v53 = vmul.f32 %v3982_v24, %v3976_v40 }
 0x676   : > { %v3993_v58 = vmul.f32 %v3986_v36, %v3977_v51 }
 0x677   : > { %3996 = vst [vmem:[%s7580_s26 + $0x6] sm:$0xff] %v3992_v53  ;;  %v4004_v44 = vrot.slane %v3992_v53, 2  ;;  %v4023_v55 = vmul.f32 %v3992_v53, %v3992_v53 }
 0x678   : > { %3997 = vst [vmem:[%s7580_s26 + $0xe] sm:$0xff] %v3993_v58  ;;  %v4006_v26 = vrot.slane %v3993_v58, 2  ;;  %v4024_v63 = vmul.f32 %v3993_v58, %v3993_v58 }
 0x679   : > { %v4005_v22 = vsel %vm3833_vm7, %v4003_v42, %v4004_v44  ;;  %v4031_v2 = vrot.slane %v4023_v55, 2 }
 0x67a   : > { %v4007_v4 = vsel %vm3833_vm7, %v4004_v44, %v4006_v26  ;;  %v4009_v5 = vsel %vm3833_vm7, %v4006_v26, %v4008_v38  ;;  %v4033_v10 = vrot.slane %v4024_v63, 2 }
 0x67b   : > { %v4013_v13 = vadd.f32 %v4007_v4, %v4005_v22  ;;  %v4032_v15 = vsel %vm3833_vm7, %v4030_v50, %v4031_v2 }
 0x67c   : > { %v4034_v14 = vsel %vm3833_vm7, %v4031_v2, %v4033_v10  ;;  %v4036_v11 = vsel %vm3833_vm7, %v4033_v10, %v4035_v3 }
 0x67d   : > { %v4014_v0 = vadd.f32 %v4013_v13, %v4009_v5  ;;  %v4040_v8 = vadd.f32 %v4034_v14, %v4032_v15 }
 0x67f   : > { %v4015_v52 = vrot.slane %v4014_v0, 4  ;;  %v4041_v56 = vadd.f32 %v4040_v8, %v4036_v11 }
 0x681   : > { %v4016_v19 = vadd.f32 %v4015_v52, %v4014_v0  ;;  %v4042_v9 = vrot.slane %v4041_v56, 4 }
 0x683   : > { %v4017_v62 = vrot.slane %v4016_v19, 2  ;;  %v4043_v1 = vadd.f32 %v4042_v9, %v4041_v56 }
 0x685   : > { %v4018_v24 = vadd.f32 %v4017_v62, %v4016_v19  ;;  %v4044_v23 = vrot.slane %v4043_v1, 2 }
 0x687   : > { %v4019_v29 = vrot.slane %v4018_v24, 1  ;;  %v4045_v48 = vadd.f32 %v4044_v23, %v4043_v1 }
 0x689   : > { %v4020_v49 = vadd.f32 %v4019_v29, %v4018_v24  ;;  %v4046_v57 = vrot.slane %v4045_v48, 1 }
 0x68b   : > { %4021 = vst [vmem:[%s430_s28] sm:$0x1] %v4020_v49  ;;  %v4047_v45 = vadd.f32 %v4046_v57, %v4045_v48 }
 0x68d   : > { %4048 = vst [vmem:[%s433_s13] sm:$0x1] %v4047_v45 }
 0x68e PF: > { %s23_s21 = sadd.s32 1, %s5939_s21  }
 0x68f   : > { %p20_p5 = scmp.ge.s32.totalorder %s23_s21, 4  }
 0x691   :  { %22 = sbr.rel (!%p20_p5) target bundleno = 1 (0x1), region = 120 }

</bundles_post_ra>
